<compile_context>
chip_gen: v5e
topology: v5e:2x2
jax: 0.10.0
libtpu: 0.0.40
codegen_flags: <defaults>
</compile_context>

<pallas_src>
from functools import partial

import jax
import jax.numpy as jnp
from jax.experimental import pallas as pl
from jax.experimental.pallas import tpu as pltpu


# ----------------------------- tiling helpers ------------------------------

# Comfortably under v7x's 64 MiB physical VMEM; the tile choices below keep
# double-buffered live tiles well inside this budget on v5e/v6e/v7x.
_VMEM_LIMIT_BYTES = 32 * 1024 * 1024


def _round_up(x, m):
    return ((x + m - 1) // m) * m


def _pick_tile(dim, target, align):
    """Largest tile <= target that is a multiple of `align` and divides `dim`.

    Falls back to the full dim, which is always a legal BlockSpec block.
    """
    if dim <= target:
        return dim
    t = (target // align) * align
    while t >= align:
        if dim % t == 0:
            return t
        t -= align
    return dim


def _row_tiles(M, target=256, align=16):
    """(padded_rows, row_tile) for activation matrices; pads instead of the
    old full-dim fallback so pipelining survives awkward row counts (B*197)."""
    if M <= target:
        Mp = _round_up(M, align)
        return Mp, Mp
    return _round_up(M, target), target


# ------------------------------ linear kernel ------------------------------

def _linear_kernel(*refs, activation, has_residual, multi_k):
    """One (tm, tn) output tile; optional K grid axis, bias/GELU/residual fused."""
    if multi_k:
        acc_ref = refs[-1]
        refs = refs[:-1]
    o_ref = refs[-1]
    x_ref, w_ref, b_ref = refs[:3]
    r_ref = refs[3] if has_residual else None

    def matmul():
        return jnp.dot(x_ref[...].astype(jnp.bfloat16),
                       w_ref[...].astype(jnp.bfloat16),
                       preferred_element_type=jnp.float32)

    def epilogue(acc):
        y = acc + b_ref[...]
        if activation == "gelu":
            # TODO(synk): PyTorch nn.GELU / BERT use the exact erf form; the
            # tanh approximation (EUP-friendly) is used here, ~1e-3 max diff.
            y = jax.nn.gelu(y, approximate=True)
        if r_ref is not None:
            y = y + r_ref[...].astype(jnp.float32)
        o_ref[...] = y.astype(o_ref.dtype)

    if not multi_k:
        epilogue(matmul())
    else:
        @pl.when(pl.program_id(2) == 0)
        def _():
            acc_ref[...] = jnp.zeros_like(acc_ref)

        acc_ref[...] += matmul()

        @pl.when(pl.program_id(2) == pl.num_programs(2) - 1)
        def _():
            epilogue(acc_ref[...])


def linear(x, w, b, activation=None, residual=None, out_dtype=jnp.bfloat16):
    """(..., K) @ (K, N) + (N,) [+gelu] [+residual] -> (..., N), tiled MXU."""
    lead = x.shape[:-1]
    K = x.shape[-1]
    N = w.shape[-1]
    x2 = x.reshape(-1, K)
    M = x2.shape[0]

    Mp, tm = _row_tiles(M, target=256, align=16)   # 16: bf16 sublane packing
    tn = _pick_tile(N, 512, 128)
    tk = _pick_tile(K, 1024, 128)
    nk = K // tk
    multi_k = nk > 1

    if Mp != M:
        x2 = jnp.pad(x2, ((0, Mp - M), (0, 0)))

    args = [x2, w, b.reshape(1, N).astype(jnp.float32)]
    if multi_k:
        x_spec = pl.BlockSpec((tm, tk), lambda i, j, k: (i, k))
        w_spec = pl.BlockSpec((tk, tn), lambda i, j, k: (k, j))
        b_spec = pl.BlockSpec((1, tn), lambda i, j, k: (0, j))
        o_spec = pl.BlockSpec((tm, tn), lambda i, j, k: (i, j))
        r_spec = pl.BlockSpec((tm, tn), lambda i, j, k: (i, j))
        grid = (Mp // tm, N // tn, nk)
        semantics = ("parallel", "parallel", "arbitrary")
        scratch = [pltpu.VMEM((tm, tn), jnp.float32)]
    else:
        x_spec = pl.BlockSpec((tm, K), lambda i, j: (i, 0))
        w_spec = pl.BlockSpec((K, tn), lambda i, j: (0, j))
        b_spec = pl.BlockSpec((1, tn), lambda i, j: (0, j))
        o_spec = pl.BlockSpec((tm, tn), lambda i, j: (i, j))
        r_spec = pl.BlockSpec((tm, tn), lambda i, j: (i, j))
        grid = (Mp // tm, N // tn)
        semantics = ("parallel", "parallel")
        scratch = []

    in_specs = [x_spec, w_spec, b_spec]
    if residual is not None:
        r2 = residual.reshape(-1, N)
        if Mp != M:
            r2 = jnp.pad(r2, ((0, Mp - M), (0, 0)))
        args.append(r2)
        in_specs.append(r_spec)

    out = pl.pallas_call(
        partial(_linear_kernel, activation=activation,
                has_residual=residual is not None, multi_k=multi_k),
        grid=grid,
        in_specs=in_specs,
        out_specs=o_spec,
        out_shape=jax.ShapeDtypeStruct((Mp, N), out_dtype),
        scratch_shapes=scratch,
        compiler_params=pltpu.CompilerParams(
            dimension_semantics=semantics,
            vmem_limit_bytes=_VMEM_LIMIT_BYTES),
    )(*args)
    if Mp != M:
        out = out[:M]
    return out.reshape(*lead, N)


# ------------------------------ layernorm ----------------------------------

def _layernorm_kernel(x_ref, g_ref, b_ref, o_ref, *, eps):
    x = x_ref[...].astype(jnp.float32)
    mu = jnp.mean(x, axis=-1, keepdims=True)
    var = jnp.mean(jnp.square(x - mu), axis=-1, keepdims=True)
    y = (x - mu) * jax.lax.rsqrt(var + eps)
    o_ref[...] = (y * g_ref[...] + b_ref[...]).astype(o_ref.dtype)


def _layernorm_res_kernel(x_ref, r_ref, g_ref, b_ref, o_ref, *, eps):
    x = x_ref[...].astype(jnp.float32) + r_ref[...].astype(jnp.float32)
    mu = jnp.mean(x, axis=-1, keepdims=True)
    var = jnp.mean(jnp.square(x - mu), axis=-1, keepdims=True)
    y = (x - mu) * jax.lax.rsqrt(var + eps)
    o_ref[...] = (y * g_ref[...] + b_ref[...]).astype(o_ref.dtype)


def layernorm(x, g, b, eps, residual=None, out_dtype=jnp.float32):
    """Row-tiled LayerNorm; optionally fuses a residual add (post-LN BERT)."""
    lead = x.shape[:-1]
    D = x.shape[-1]
    x2 = x.reshape(-1, D)
    M = x2.shape[0]
    Mp, tm = _row_tiles(M, target=256, align=16)
    if Mp != M:
        x2 = jnp.pad(x2, ((0, Mp - M), (0, 0)))
    grid = (Mp // tm,)

    row_spec = pl.BlockSpec((tm, D), lambda i: (i, 0))
    vec_spec = pl.BlockSpec((1, D), lambda i: (0, 0))
    g2 = g.reshape(1, D).astype(jnp.float32)
    b2 = b.reshape(1, D).astype(jnp.float32)
    cp = pltpu.CompilerParams(dimension_semantics=("parallel",),
                              vmem_limit_bytes=_VMEM_LIMIT_BYTES)

    if residual is None:
        out = pl.pallas_call(
            partial(_layernorm_kernel, eps=eps),
            grid=grid,
            in_specs=[row_spec, vec_spec, vec_spec],
            out_specs=row_spec,
            out_shape=jax.ShapeDtypeStruct((Mp, D), out_dtype),
            compiler_params=cp,
        )(x2, g2, b2)
    else:
        r2 = residual.reshape(-1, D)
        if Mp != M:
            r2 = jnp.pad(r2, ((0, Mp - M), (0, 0)))
        out = pl.pallas_call(
            partial(_layernorm_res_kernel, eps=eps),
            grid=grid,
            in_specs=[row_spec, row_spec, vec_spec, vec_spec],
            out_specs=row_spec,
            out_shape=jax.ShapeDtypeStruct((Mp, D), out_dtype),
            compiler_params=cp,
        )(x2, r2, g2, b2)
    if Mp != M:
        out = out[:M]
    return out.reshape(*lead, D)


# ------------------------------ attention -----------------------------------

def _mha_heads_to_out(q_full, k_full, v_full, bias, o_ref, *,
                      num_heads, dh, scale):
    """Loop over heads in-kernel; per-head PV written into the (1,S,D) block."""
    for h in range(num_heads):          # static unroll; offsets are static
        lo = h * dh
        q = q_full[:, lo:lo + dh]
        k = k_full[:, lo:lo + dh]
        v = v_full[:, lo:lo + dh]
        # A @ B^T via dot_general (no in-kernel transpose).
        s = jax.lax.dot_general(q, k, (((1,), (1,)), ((), ())),
                                preferred_element_type=jnp.float32) * scale
        if bias is not None:
            s = s + bias
        s = s - jnp.max(s, axis=-1, keepdims=True)
        p = jnp.exp(s)
        inv = pl.reciprocal(jnp.sum(p, axis=-1, keepdims=True), approx=True)
        p = (p * inv).astype(v.dtype)
        pv = jnp.dot(p, v, preferred_element_type=jnp.float32)
        o_ref[0, :, lo:lo + dh] = pv.astype(o_ref.dtype)


def _sa_packed_kernel(qkv_ref, o_ref, *, num_heads, dh, scale):
    """Unmasked self-attention straight from the packed (1, S, 3D) qkv tile."""
    qkv = qkv_ref[0]                    # (S, 3D) bf16
    D = num_heads * dh
    _mha_heads_to_out(qkv[:, :D], qkv[:, D:2 * D], qkv[:, 2 * D:3 * D],
                      None, o_ref, num_heads=num_heads, dh=dh, scale=scale)


def _mha_kernel(q_ref, k_ref, v_ref, o_ref, *, num_heads, dh, scale):
    _mha_heads_to_out(q_ref[0], k_ref[0], v_ref[0], None, o_ref,
                      num_heads=num_heads, dh=dh, scale=scale)


def _mha_masked_kernel(q_ref, k_ref, v_ref, km_ref, o_ref, *,
                       num_heads, dh, scale):
    bias = (1.0 - km_ref[0].astype(jnp.float32)) * -10000.0   # (1, Sk)
    _mha_heads_to_out(q_ref[0], k_ref[0], v_ref[0], bias, o_ref,
                      num_heads=num_heads, dh=dh, scale=scale)


def self_attention_packed(qkv, num_heads, scale):
    """qkv: (B, S, 3D) -> (B, S, D); grid=(B,), heads looped in-kernel."""
    B, S, threeD = qkv.shape
    D = threeD // 3
    dh = D // num_heads
    return pl.pallas_call(
        partial(_sa_packed_kernel, num_heads=num_heads, dh=dh, scale=scale),
        grid=(B,),
        in_specs=[pl.BlockSpec((1, S, threeD), lambda b: (b, 0, 0))],
        out_specs=pl.BlockSpec((1, S, D), lambda b: (b, 0, 0)),
        out_shape=jax.ShapeDtypeStruct((B, S, D), jnp.bfloat16),
        compiler_params=pltpu.CompilerParams(
            dimension_semantics=("parallel",),
            vmem_limit_bytes=_VMEM_LIMIT_BYTES),
    )(qkv.astype(jnp.bfloat16))


def multi_head_attention(q, k, v, num_heads, scale, key_mask=None):
    """q: (B,Sq,D), k/v: (B,Sk,D); key_mask: optional (B,Sk) 1/0 padding mask."""
    B, Sq, D = q.shape
    Sk = k.shape[1]
    dh = D // num_heads
    args = [q.astype(jnp.bfloat16), k.astype(jnp.bfloat16),
            v.astype(jnp.bfloat16)]
    in_specs = [
        pl.BlockSpec((1, Sq, D), lambda b: (b, 0, 0)),
        pl.BlockSpec((1, Sk, D), lambda b: (b, 0, 0)),
        pl.BlockSpec((1, Sk, D), lambda b: (b, 0, 0)),
    ]
    if key_mask is None:
        kernel = partial(_mha_kernel, num_heads=num_heads, dh=dh, scale=scale)
    else:
        kernel = partial(_mha_masked_kernel, num_heads=num_heads, dh=dh,
                         scale=scale)
        in_specs.append(pl.BlockSpec((1, 1, Sk), lambda b: (b, 0, 0)))
        args.append(key_mask.astype(jnp.float32).reshape(B, 1, Sk))

    return pl.pallas_call(
        kernel,
        grid=(B,),
        in_specs=in_specs,
        out_specs=pl.BlockSpec((1, Sq, D), lambda b: (b, 0, 0)),
        out_shape=jax.ShapeDtypeStruct((B, Sq, D), jnp.bfloat16),
        compiler_params=pltpu.CompilerParams(
            dimension_semantics=("parallel",),
            vmem_limit_bytes=_VMEM_LIMIT_BYTES),
    )(*args)


# ----------------------------- model components ----------------------------

def vit_forward(p, image, num_heads, patch_size):
    """timm-style pre-LN ViT: patch-embed + cls + pos, blocks, final LN."""
    B, C, H, W = image.shape
    ps = patch_size
    D = p["pos_embed"].shape[-1]
    nh, nw = H // ps, W // ps
    # patchify (NCHW -> (B, Np, C*p*p)); equivalent to Conv2d(k=s=patch).
    patches = image.reshape(B, C, nh, ps, nw, ps)
    patches = patches.transpose(0, 2, 4, 1, 3, 5).reshape(B, nh * nw, C * ps * ps)
    x = linear(patches, p["patch_w"], p["patch_b"], out_dtype=jnp.float32)
    cls = jnp.broadcast_to(p["cls_token"], (B, 1, D))
    x = jnp.concatenate([cls, x], axis=1) + p["pos_embed"]   # f32 residual carry
    scale = (D // num_heads) ** -0.5
    for blk in p["blocks"]:
        h = layernorm(x, blk["ln1_g"], blk["ln1_b"], eps=1e-6,
                      out_dtype=jnp.bfloat16)
        qkv = linear(h, blk["qkv_w"], blk["qkv_b"])            # (B, S, 3D) bf16
        a = self_attention_packed(qkv, num_heads, scale)       # (B, S, D) bf16
        x = linear(a, blk["proj_w"], blk["proj_b"], residual=x,
                   out_dtype=jnp.float32)                      # residual fused
        h = layernorm(x, blk["ln2_g"], blk["ln2_b"], eps=1e-6,
                      out_dtype=jnp.bfloat16)
        h = linear(h, blk["fc1_w"], blk["fc1_b"], activation="gelu")
        x = linear(h, blk["fc2_w"], blk["fc2_b"], residual=x,
                   out_dtype=jnp.float32)                      # residual fused
    return layernorm(x, p["norm_g"], p["norm_b"], eps=1e-6,
                     out_dtype=jnp.bfloat16)


def _attn_sublayer(x, kv, ap, key_mask, num_heads, scale):
    q = linear(x, ap["q_w"], ap["q_b"])
    k = linear(kv, ap["k_w"], ap["k_b"])
    v = linear(kv, ap["v_w"], ap["v_b"])
    ctx = multi_head_attention(q, k, v, num_heads, scale, key_mask=key_mask)
    out = linear(ctx, ap["o_w"], ap["o_b"])                    # bf16 branch
    # post-LN with the residual add fused into the layernorm kernel (f32 carry)
    return layernorm(out, ap["ln_g"], ap["ln_b"], eps=1e-12, residual=x,
                     out_dtype=jnp.float32)


def bert_layer(x, lp, text_mask, num_heads, scale, cross_kv=None):
    x = _attn_sublayer(x, x, lp["sa"], text_mask, num_heads, scale)
    if cross_kv is not None:
        # fusion layer: cross-attention to image tokens. image_atts is all
        # ones in the reference forward, so the additive bias is identically
        # zero -> skip the mask operand entirely.
        x = _attn_sublayer(x, cross_kv, lp["cross"], None, num_heads, scale)
    h = linear(x, lp["ffn"]["i_w"], lp["ffn"]["i_b"], activation="gelu")
    h = linear(h, lp["ffn"]["o_w"], lp["ffn"]["o_b"])
    return layernorm(h, lp["ffn"]["ln_g"], lp["ffn"]["ln_b"], eps=1e-12,
                     residual=x, out_dtype=jnp.float32)


def bert_embed(p, input_ids):
    B, S = input_ids.shape
    we = p["word_emb"][input_ids]                 # gather (glue, plain JAX)
    pe = p["pos_emb"][:S][None]
    te = p["type_emb"][0][None, None]             # token_type_ids == 0
    return layernorm(we + pe + te, p["emb_ln_g"], p["emb_ln_b"], eps=1e-12,
                     out_dtype=jnp.float32)


def l2_normalize(x):
    return x / jnp.maximum(jnp.linalg.norm(x, axis=-1, keepdims=True), 1e-12)


def albef_forward(params, image, input_ids, attention_mask, *,
                  patch_size, vit_heads, bert_heads):
    vp, tp = params["vit"], params["bert"]
    # --- vision encoder ---
    image_embeds = vit_forward(vp, image, vit_heads, patch_size)   # (B, Si, D)

    # Tiny CLS projection + L2-norm in plain JAX (lane-sparse, launch-bound);
    # computed as in the reference forward but unused -> DCE'd under jit.
    image_feat = l2_normalize(
        image_embeds[:, 0, :].astype(jnp.float32) @ params["vision_proj_w"]
        + params["vision_proj_b"])

    # --- text encoder (mode='text': self-attention-only layers) ---
    Dt = tp["word_emb"].shape[1]
    heads = bert_heads
    scale = (Dt // heads) ** -0.5
    h = bert_embed(tp, input_ids)
    for lp in tp["text_layers"]:
        h = bert_layer(h, lp, attention_mask, heads, scale)
    text_embeds = h
    text_feat = l2_normalize(
        text_embeds[:, 0, :] @ params["text_proj_w"] + params["text_proj_b"])
    del image_feat, text_feat  # computed (as in the reference) but not returned

    # --- fusion encoder (mode='fusion': self-attn + cross-attn to image) ---
    x = text_embeds
    for lp in tp["fusion_layers"]:
        x = bert_layer(x, lp, attention_mask, heads, scale,
                       cross_kv=image_embeds)

    vl_embeddings = x[:, 0, :]
    # ITM head: (B, Dt) @ (Dt, 2) -- lane-sparse output, run in plain JAX.
    vl_output = vl_embeddings @ params["itm_w"] + params["itm_b"]
    return vl_output


# ----------------------------- parameter init ------------------------------

def init_params(key, cfg):
    ks = iter(jax.random.split(key, 512))

    def nrm(*shape):
        return jax.random.normal(next(ks), shape, jnp.float32) * 0.02

    def zeros(*shape):
        return jnp.zeros(shape, jnp.float32)

    def ones(*shape):
        return jnp.ones(shape, jnp.float32)

    Dv, ps, C = cfg["vdim"], cfg["patch"], cfg["C"]
    n_patches = (cfg["img"] // ps) ** 2
    vit = dict(
        patch_w=nrm(C * ps * ps, Dv), patch_b=zeros(Dv),
        cls_token=nrm(1, 1, Dv), pos_embed=nrm(1, n_patches + 1, Dv),
        norm_g=ones(Dv), norm_b=zeros(Dv),
        blocks=[dict(
            ln1_g=ones(Dv), ln1_b=zeros(Dv),
            qkv_w=nrm(Dv, 3 * Dv), qkv_b=zeros(3 * Dv),
            proj_w=nrm(Dv, Dv), proj_b=zeros(Dv),
            ln2_g=ones(Dv), ln2_b=zeros(Dv),
            fc1_w=nrm(Dv, 4 * Dv), fc1_b=zeros(4 * Dv),
            fc2_w=nrm(4 * Dv, Dv), fc2_b=zeros(Dv),
        ) for _ in range(cfg["vdepth"])],
    )

    Dt, I = cfg["tdim"], cfg["inter"]

    def attn_params():
        return dict(q_w=nrm(Dt, Dt), q_b=zeros(Dt), k_w=nrm(Dt, Dt), k_b=zeros(Dt),
                    v_w=nrm(Dt, Dt), v_b=zeros(Dt), o_w=nrm(Dt, Dt), o_b=zeros(Dt),
                    ln_g=ones(Dt), ln_b=zeros(Dt))

    def ffn_params():
        return dict(i_w=nrm(Dt, I), i_b=zeros(I), o_w=nrm(I, Dt), o_b=zeros(Dt),
                    ln_g=ones(Dt), ln_b=zeros(Dt))

    bert = dict(
        word_emb=nrm(cfg["vocab"], Dt), pos_emb=nrm(cfg["maxpos"], Dt),
        type_emb=nrm(2, Dt), emb_ln_g=ones(Dt), emb_ln_b=zeros(Dt),
        text_layers=[dict(sa=attn_params(), ffn=ffn_params())
                     for _ in range(cfg["ntext"])],
        fusion_layers=[dict(sa=attn_params(), cross=attn_params(), ffn=ffn_params())
                       for _ in range(cfg["nfusion"])],
    )

    return dict(
        vit=vit, bert=bert,
        vision_proj_w=nrm(Dv, cfg["embed_dim"]), vision_proj_b=zeros(cfg["embed_dim"]),
        text_proj_w=nrm(Dt, cfg["embed_dim"]), text_proj_b=zeros(cfg["embed_dim"]),
        itm_w=nrm(Dt, 2), itm_b=zeros(2),
    )


# ---------------------------------- main ------------------------------------

if __name__ == "__main__":
    # Small-shape analogue of the ALBEF config (vision_width == text hidden).
    cfg = dict(B=2, C=3, img=16, patch=4, vdim=32, vdepth=2, vheads=2,
               vocab=64, tdim=32, theads=2, ntext=2, nfusion=2, inter=128,
               seq=8, maxpos=16, embed_dim=16)

    key = jax.random.PRNGKey(0)
    kp, ki, kt = jax.random.split(key, 3)
    params = init_params(kp, cfg)

    image = jax.random.normal(ki, (cfg["B"], cfg["C"], cfg["img"], cfg["img"]),
                              jnp.float32)                         # NCHW
    input_ids = jax.random.randint(kt, (cfg["B"], cfg["seq"]), 0, cfg["vocab"],
                                   dtype=jnp.int32)
    attention_mask = jnp.array([[1, 1, 1, 1, 1, 1, 1, 1],
                                [1, 1, 1, 1, 1, 1, 0, 0]], dtype=jnp.int32)

    fwd = jax.jit(partial(albef_forward,
                          patch_size=cfg["patch"],
                          vit_heads=cfg["vheads"],
                          bert_heads=cfg["theads"]))
    vl_output = fwd(params, image, input_ids, attention_mask)
    vl_output = jax.block_until_ready(vl_output)
    assert vl_output.shape == (cfg["B"], 2)
    assert bool(jnp.all(jnp.isfinite(vl_output)))
    print("KERNEL_OK")
</pallas_src>

<mosaic_0001>
module attributes {stable_mosaic.version = 11 : i64} {
  func.func @_layernorm_kernel(%arg0: i32, %arg1: memref<16x32xf32, #tpu.memory_space<vmem>>, %arg2: memref<1x32xf32, #tpu.memory_space<vmem>>, %arg3: memref<1x32xf32, #tpu.memory_space<vmem>>, %arg4: memref<16x32xf32, #tpu.memory_space<vmem>>) attributes {dimension_semantics = [#tpu.dimension_semantics<parallel>], iteration_bounds = array<i64: 1>, scalar_prefetch = 0 : i64, scratch_operands = 0 : i64, tpu.core_type = #tpu.core_type<tc>, window_params = [{transform_indices = @transform_0, window_bounds = array<i64: 16, 32>}, {pipeline_mode = #tpu.pipeline_mode<synchronous>, transform_indices = @transform_1, window_bounds = array<i64: 1, 32>}, {pipeline_mode = #tpu.pipeline_mode<synchronous>, transform_indices = @transform_2, window_bounds = array<i64: 1, 32>}, {transform_indices = @transform_3, window_bounds = array<i64: 16, 32>}]} {
    %c0 = arith.constant 0 : index
    %c0_0 = arith.constant 0 : index
    %0 = vector.load %arg1[%c0, %c0_0] : memref<16x32xf32, #tpu.memory_space<vmem>>, vector<16x32xf32>
    %cst = arith.constant dense<0.000000e+00> : vector<16xf32>
    %1 = vector.multi_reduction <add>, %0, %cst [1] : vector<16x32xf32> to vector<16xf32>
    %2 = vector.shape_cast %1 : vector<16xf32> to vector<16x1xf32>
    %cst_1 = arith.constant 3.200000e+01 : f32
    %3 = vector.broadcast %cst_1 : f32 to vector<16x1xf32>
    %4 = arith.divf %2, %3 : vector<16x1xf32>
    %5 = vector.broadcast %4 : vector<16x1xf32> to vector<16x32xf32>
    %6 = arith.subf %0, %5 : vector<16x32xf32>
    %7 = arith.mulf %6, %6 : vector<16x32xf32>
    %cst_2 = arith.constant dense<0.000000e+00> : vector<16xf32>
    %8 = vector.multi_reduction <add>, %7, %cst_2 [1] : vector<16x32xf32> to vector<16xf32>
    %9 = vector.shape_cast %8 : vector<16xf32> to vector<16x1xf32>
    %cst_3 = arith.constant 3.200000e+01 : f32
    %10 = vector.broadcast %cst_3 : f32 to vector<16x1xf32>
    %11 = arith.divf %9, %10 : vector<16x1xf32>
    %12 = vector.broadcast %4 : vector<16x1xf32> to vector<16x32xf32>
    %13 = arith.subf %0, %12 : vector<16x32xf32>
    %cst_4 = arith.constant 9.99999996E-13 : f32
    %14 = vector.broadcast %cst_4 : f32 to vector<16x1xf32>
    %15 = arith.addf %11, %14 : vector<16x1xf32>
    %16 = math.rsqrt %15 : vector<16x1xf32>
    %17 = vector.broadcast %16 : vector<16x1xf32> to vector<16x32xf32>
    %18 = arith.mulf %13, %17 : vector<16x32xf32>
    %c0_5 = arith.constant 0 : index
    %c0_6 = arith.constant 0 : index
    %19 = vector.load %arg2[%c0_5, %c0_6] : memref<1x32xf32, #tpu.memory_space<vmem>>, vector<1x32xf32>
    %20 = vector.broadcast %19 : vector<1x32xf32> to vector<16x32xf32>
    %21 = arith.mulf %18, %20 : vector<16x32xf32>
    %c0_7 = arith.constant 0 : index
    %c0_8 = arith.constant 0 : index
    %22 = vector.load %arg3[%c0_7, %c0_8] : memref<1x32xf32, #tpu.memory_space<vmem>>, vector<1x32xf32>
    %23 = vector.broadcast %22 : vector<1x32xf32> to vector<16x32xf32>
    %24 = arith.addf %21, %23 : vector<16x32xf32>
    %c0_9 = arith.constant 0 : index
    %c0_10 = arith.constant 0 : index
    %25 = vector.load %arg4[%c0_9, %c0_10] : memref<16x32xf32, #tpu.memory_space<vmem>>, vector<16x32xf32>
    tpu.vector_store %arg4[%c0_9, %c0_10], %24 {strides = array<i32>} : memref<16x32xf32, #tpu.memory_space<vmem>>, vector<16x32xf32>,
    return
  }
  func.func @transform_0(%arg0: i32) -> (i32, i32) {
    %c0_i32 = arith.constant 0 : i32
    %c0_i32_0 = arith.constant 0 : i32
    return %arg0, %c0_i32 : i32, i32
  }
  func.func @transform_1(%arg0: i32) -> (i32, i32) {
    %c0_i32 = arith.constant 0 : i32
    %c0_i32_0 = arith.constant 0 : i32
    %c0_i32_1 = arith.constant 0 : i32
    return %c0_i32, %c0_i32_0 : i32, i32
  }
  func.func @transform_2(%arg0: i32) -> (i32, i32) {
    %c0_i32 = arith.constant 0 : i32
    %c0_i32_0 = arith.constant 0 : i32
    %c0_i32_1 = arith.constant 0 : i32
    return %c0_i32, %c0_i32_0 : i32, i32
  }
  func.func @transform_3(%arg0: i32) -> (i32, i32) {
    %c0_i32 = arith.constant 0 : i32
    %c0_i32_0 = arith.constant 0 : i32
    return %arg0, %c0_i32 : i32, i32
  }
}

module attributes {stable_mosaic.version = 11 : i64} {
  func.func @_linear_kernel(%arg0: i32, %arg1: i32, %arg2: memref<16x32xf32, #tpu.memory_space<vmem>>, %arg3: memref<32x32xf32, #tpu.memory_space<vmem>>, %arg4: memref<1x32xf32, #tpu.memory_space<vmem>>, %arg5: memref<16x32xbf16, #tpu.memory_space<vmem>>) attributes {dimension_semantics = [#tpu.dimension_semantics<parallel>, #tpu.dimension_semantics<parallel>], iteration_bounds = array<i64: 1, 1>, scalar_prefetch = 0 : i64, scratch_operands = 0 : i64, tpu.core_type = #tpu.core_type<tc>, window_params = [{transform_indices = @transform_0, window_bounds = array<i64: 16, 32>}, {transform_indices = @transform_1, window_bounds = array<i64: 32, 32>}, {transform_indices = @transform_2, window_bounds = array<i64: 1, 32>}, {transform_indices = @transform_3, window_bounds = array<i64: 16, 32>}]} {
    %c0 = arith.constant 0 : index
    %c0_0 = arith.constant 0 : index
    %0 = vector.load %arg2[%c0, %c0_0] : memref<16x32xf32, #tpu.memory_space<vmem>>, vector<16x32xf32>
    %1 = arith.truncf %0 : vector<16x32xf32> to vector<16x32xbf16>
    %c0_1 = arith.constant 0 : index
    %c0_2 = arith.constant 0 : index
    %2 = vector.load %arg3[%c0_1, %c0_2] : memref<32x32xf32, #tpu.memory_space<vmem>>, vector<32x32xf32>
    %3 = arith.truncf %2 : vector<32x32xf32> to vector<32x32xbf16>
    %cst = arith.constant dense<0.000000e+00> : vector<16x32xf32>
    %4 = tpu.matmul %1, %3, %cst {dimension_numbers = #tpu.dot_dimension_numbers<[1], [0], [0], [1], [0, 0, 1, 1], [], []>} : vector<16x32xbf16>, vector<32x32xbf16>, vector<16x32xf32> -> vector<16x32xf32>
    %c0_3 = arith.constant 0 : index
    %c0_4 = arith.constant 0 : index
    %5 = vector.load %arg4[%c0_3, %c0_4] : memref<1x32xf32, #tpu.memory_space<vmem>>, vector<1x32xf32>
    %6 = vector.broadcast %5 : vector<1x32xf32> to vector<16x32xf32>
    %7 = arith.addf %4, %6 : vector<16x32xf32>
    %8 = arith.truncf %7 : vector<16x32xf32> to vector<16x32xbf16>
    %c0_5 = arith.constant 0 : index
    %c0_6 = arith.constant 0 : index
    %9 = vector.load %arg5[%c0_5, %c0_6] : memref<16x32xbf16, #tpu.memory_space<vmem>>, vector<16x32xbf16>
    tpu.vector_store %arg5[%c0_5, %c0_6], %8 {strides = array<i32>} : memref<16x32xbf16, #tpu.memory_space<vmem>>, vector<16x32xbf16>,
    return
  }
  func.func @transform_0(%arg0: i32, %arg1: i32) -> (i32, i32) {
    %c0_i32 = arith.constant 0 : i32
    %c0_i32_0 = arith.constant 0 : i32
    return %arg0, %c0_i32 : i32, i32
  }
  func.func @transform_1(%arg0: i32, %arg1: i32) -> (i32, i32) {
    %c0_i32 = arith.constant 0 : i32
    %c0_i32_0 = arith.constant 0 : i32
    return %c0_i32, %arg1 : i32, i32
  }
  func.func @transform_2(%arg0: i32, %arg1: i32) -> (i32, i32) {
    %c0_i32 = arith.constant 0 : i32
    %c0_i32_0 = arith.constant 0 : i32
    return %c0_i32, %arg1 : i32, i32
  }
  func.func @transform_3(%arg0: i32, %arg1: i32) -> (i32, i32) {
    %c0_i32 = arith.constant 0 : i32
    return %arg0, %arg1 : i32, i32
  }
}

module attributes {stable_mosaic.version = 11 : i64} {
  func.func @_linear_kernel(%arg0: i32, %arg1: i32, %arg2: memref<16x32xbf16, #tpu.memory_space<vmem>>, %arg3: memref<32x32xf32, #tpu.memory_space<vmem>>, %arg4: memref<1x32xf32, #tpu.memory_space<vmem>>, %arg5: memref<16x32xbf16, #tpu.memory_space<vmem>>) attributes {dimension_semantics = [#tpu.dimension_semantics<parallel>, #tpu.dimension_semantics<parallel>], iteration_bounds = array<i64: 1, 1>, scalar_prefetch = 0 : i64, scratch_operands = 0 : i64, tpu.core_type = #tpu.core_type<tc>, window_params = [{transform_indices = @transform_0, window_bounds = array<i64: 16, 32>}, {transform_indices = @transform_1, window_bounds = array<i64: 32, 32>}, {transform_indices = @transform_2, window_bounds = array<i64: 1, 32>}, {transform_indices = @transform_3, window_bounds = array<i64: 16, 32>}]} {
    %c0 = arith.constant 0 : index
    %c0_0 = arith.constant 0 : index
    %0 = vector.load %arg2[%c0, %c0_0] : memref<16x32xbf16, #tpu.memory_space<vmem>>, vector<16x32xbf16>
    %c0_1 = arith.constant 0 : index
    %c0_2 = arith.constant 0 : index
    %1 = vector.load %arg3[%c0_1, %c0_2] : memref<32x32xf32, #tpu.memory_space<vmem>>, vector<32x32xf32>
    %2 = arith.truncf %1 : vector<32x32xf32> to vector<32x32xbf16>
    %cst = arith.constant dense<0.000000e+00> : vector<16x32xf32>
    %3 = tpu.matmul %0, %2, %cst {dimension_numbers = #tpu.dot_dimension_numbers<[1], [0], [0], [1], [0, 0, 1, 1], [], []>} : vector<16x32xbf16>, vector<32x32xbf16>, vector<16x32xf32> -> vector<16x32xf32>
    %c0_3 = arith.constant 0 : index
    %c0_4 = arith.constant 0 : index
    %4 = vector.load %arg4[%c0_3, %c0_4] : memref<1x32xf32, #tpu.memory_space<vmem>>, vector<1x32xf32>
    %5 = vector.broadcast %4 : vector<1x32xf32> to vector<16x32xf32>
    %6 = arith.addf %3, %5 : vector<16x32xf32>
    %7 = arith.truncf %6 : vector<16x32xf32> to vector<16x32xbf16>
    %c0_5 = arith.constant 0 : index
    %c0_6 = arith.constant 0 : index
    %8 = vector.load %arg5[%c0_5, %c0_6] : memref<16x32xbf16, #tpu.memory_space<vmem>>, vector<16x32xbf16>
    tpu.vector_store %arg5[%c0_5, %c0_6], %7 {strides = array<i32>} : memref<16x32xbf16, #tpu.memory_space<vmem>>, vector<16x32xbf16>,
    return
  }
  func.func @transform_0(%arg0: i32, %arg1: i32) -> (i32, i32) {
    %c0_i32 = arith.constant 0 : i32
    %c0_i32_0 = arith.constant 0 : i32
    return %arg0, %c0_i32 : i32, i32
  }
  func.func @transform_1(%arg0: i32, %arg1: i32) -> (i32, i32) {
    %c0_i32 = arith.constant 0 : i32
    %c0_i32_0 = arith.constant 0 : i32
    return %c0_i32, %arg1 : i32, i32
  }
  func.func @transform_2(%arg0: i32, %arg1: i32) -> (i32, i32) {
    %c0_i32 = arith.constant 0 : i32
    %c0_i32_0 = arith.constant 0 : i32
    return %c0_i32, %arg1 : i32, i32
  }
  func.func @transform_3(%arg0: i32, %arg1: i32) -> (i32, i32) {
    %c0_i32 = arith.constant 0 : i32
    return %arg0, %arg1 : i32, i32
  }
}

module attributes {stable_mosaic.version = 11 : i64} {
  func.func @_mha_masked_kernel(%arg0: i32, %arg1: memref<1x8x32xbf16, #tpu.memory_space<vmem>>, %arg2: memref<1x8x32xbf16, #tpu.memory_space<vmem>>, %arg3: memref<1x8x32xbf16, #tpu.memory_space<vmem>>, %arg4: memref<1x1x8xf32, #tpu.memory_space<vmem>>, %arg5: memref<1x8x32xbf16, #tpu.memory_space<vmem>>) attributes {dimension_semantics = [#tpu.dimension_semantics<parallel>], iteration_bounds = array<i64: 2>, scalar_prefetch = 0 : i64, scratch_operands = 0 : i64, tpu.core_type = #tpu.core_type<tc>, window_params = [{transform_indices = @transform_0, window_bounds = array<i64: 1, 8, 32>}, {transform_indices = @transform_1, window_bounds = array<i64: 1, 8, 32>}, {transform_indices = @transform_2, window_bounds = array<i64: 1, 8, 32>}, {transform_indices = @transform_3, window_bounds = array<i64: 1, 1, 8>}, {transform_indices = @transform_4, window_bounds = array<i64: 1, 8, 32>}]} {
    %c0 = arith.constant 0 : index
    %c0_0 = arith.constant 0 : index
    %c0_1 = arith.constant 0 : index
    %0 = vector.load %arg4[%c0, %c0_0, %c0_1] : memref<1x1x8xf32, #tpu.memory_space<vmem>>, vector<1x1x8xf32>
    %1 = vector.shape_cast %0 : vector<1x1x8xf32> to vector<1x8xf32>
    %cst = arith.constant 1.000000e+00 : f32
    %2 = vector.broadcast %cst : f32 to vector<1x8xf32>
    %3 = arith.subf %2, %1 : vector<1x8xf32>
    %cst_2 = arith.constant -1.000000e+04 : f32
    %4 = vector.broadcast %cst_2 : f32 to vector<1x8xf32>
    %5 = arith.mulf %3, %4 : vector<1x8xf32>
    %c0_3 = arith.constant 0 : index
    %c0_4 = arith.constant 0 : index
    %c0_5 = arith.constant 0 : index
    %6 = vector.load %arg1[%c0_3, %c0_4, %c0_5] : memref<1x8x32xbf16, #tpu.memory_space<vmem>>, vector<1x8x32xbf16>
    %7 = vector.shape_cast %6 : vector<1x8x32xbf16> to vector<8x32xbf16>
    %c0_6 = arith.constant 0 : index
    %c0_7 = arith.constant 0 : index
    %c0_8 = arith.constant 0 : index
    %8 = vector.load %arg2[%c0_6, %c0_7, %c0_8] : memref<1x8x32xbf16, #tpu.memory_space<vmem>>, vector<1x8x32xbf16>
    %9 = vector.shape_cast %8 : vector<1x8x32xbf16> to vector<8x32xbf16>
    %c0_9 = arith.constant 0 : index
    %c0_10 = arith.constant 0 : index
    %c0_11 = arith.constant 0 : index
    %10 = vector.load %arg3[%c0_9, %c0_10, %c0_11] : memref<1x8x32xbf16, #tpu.memory_space<vmem>>, vector<1x8x32xbf16>
    %11 = vector.shape_cast %10 : vector<1x8x32xbf16> to vector<8x32xbf16>
    %12 = vector.extract_strided_slice %7 {offsets = [0, 0], sizes = [8, 16], strides = [1, 1]} : vector<8x32xbf16> to vector<8x16xbf16>
    %13 = vector.extract_strided_slice %9 {offsets = [0, 0], sizes = [8, 16], strides = [1, 1]} : vector<8x32xbf16> to vector<8x16xbf16>
    %14 = vector.extract_strided_slice %11 {offsets = [0, 0], sizes = [8, 16], strides = [1, 1]} : vector<8x32xbf16> to vector<8x16xbf16>
    %cst_12 = arith.constant dense<0.000000e+00> : vector<8x8xf32>
    %15 = tpu.matmul %12, %13, %cst_12 {dimension_numbers = #tpu.dot_dimension_numbers<[1], [1], [0], [0], [0, 0, 1, 0], [], []>} : vector<8x16xbf16>, vector<8x16xbf16>, vector<8x8xf32> -> vector<8x8xf32>
    %cst_13 = arith.constant 2.500000e-01 : f32
    %16 = vector.broadcast %cst_13 : f32 to vector<8x8xf32>
    %17 = arith.mulf %15, %16 : vector<8x8xf32>
    %18 = vector.broadcast %5 : vector<1x8xf32> to vector<8x8xf32>
    %19 = arith.addf %17, %18 : vector<8x8xf32>
    %cst_14 = arith.constant dense<0xFF800000> : vector<8xf32>
    %20 = vector.multi_reduction <maximumf>, %19, %cst_14 [1] : vector<8x8xf32> to vector<8xf32>
    %21 = vector.shape_cast %20 : vector<8xf32> to vector<8x1xf32>
    %22 = vector.broadcast %21 : vector<8x1xf32> to vector<8x8xf32>
    %23 = arith.subf %19, %22 : vector<8x8xf32>
    %24 = math.exp %23 : vector<8x8xf32>
    %cst_15 = arith.constant dense<0.000000e+00> : vector<8xf32>
    %25 = vector.multi_reduction <add>, %24, %cst_15 [1] : vector<8x8xf32> to vector<8xf32>
    %26 = vector.shape_cast %25 : vector<8xf32> to vector<8x1xf32>
    %27 = tpu.reciprocal %26 {approx = true} : vector<8x1xf32> -> vector<8x1xf32>
    %28 = vector.broadcast %27 : vector<8x1xf32> to vector<8x8xf32>
    %29 = arith.mulf %24, %28 : vector<8x8xf32>
    %30 = arith.truncf %29 : vector<8x8xf32> to vector<8x8xbf16>
    %cst_16 = arith.constant dense<0.000000e+00> : vector<8x16xf32>
    %31 = tpu.matmul %30, %14, %cst_16 {dimension_numbers = #tpu.dot_dimension_numbers<[1], [0], [0], [1], [0, 0, 1, 1], [], []>} : vector<8x8xbf16>, vector<8x16xbf16>, vector<8x16xf32> -> vector<8x16xf32>
    %32 = arith.truncf %31 : vector<8x16xf32> to vector<8x16xbf16>
    %c0_17 = arith.constant 0 : index
    %c0_18 = arith.constant 0 : index
    %c0_19 = arith.constant 0 : index
    %33 = vector.load %arg5[%c0_17, %c0_18, %c0_19] : memref<1x8x32xbf16, #tpu.memory_space<vmem>>, vector<1x8x16xbf16>
    %34 = vector.shape_cast %33 : vector<1x8x16xbf16> to vector<8x16xbf16>
    %35 = vector.shape_cast %32 : vector<8x16xbf16> to vector<1x8x16xbf16>
    tpu.vector_store %arg5[%c0_17, %c0_18, %c0_19], %35 {strides = array<i32>} : memref<1x8x32xbf16, #tpu.memory_space<vmem>>, vector<1x8x16xbf16>,
    %36 = vector.extract_strided_slice %7 {offsets = [0, 16], sizes = [8, 16], strides = [1, 1]} : vector<8x32xbf16> to vector<8x16xbf16>
    %37 = vector.extract_strided_slice %9 {offsets = [0, 16], sizes = [8, 16], strides = [1, 1]} : vector<8x32xbf16> to vector<8x16xbf16>
    %38 = vector.extract_strided_slice %11 {offsets = [0, 16], sizes = [8, 16], strides = [1, 1]} : vector<8x32xbf16> to vector<8x16xbf16>
    %cst_20 = arith.constant dense<0.000000e+00> : vector<8x8xf32>
    %39 = tpu.matmul %36, %37, %cst_20 {dimension_numbers = #tpu.dot_dimension_numbers<[1], [1], [0], [0], [0, 0, 1, 0], [], []>} : vector<8x16xbf16>, vector<8x16xbf16>, vector<8x8xf32> -> vector<8x8xf32>
    %cst_21 = arith.constant 2.500000e-01 : f32
    %40 = vector.broadcast %cst_21 : f32 to vector<8x8xf32>
    %41 = arith.mulf %39, %40 : vector<8x8xf32>
    %42 = vector.broadcast %5 : vector<1x8xf32> to vector<8x8xf32>
    %43 = arith.addf %41, %42 : vector<8x8xf32>
    %cst_22 = arith.constant dense<0xFF800000> : vector<8xf32>
    %44 = vector.multi_reduction <maximumf>, %43, %cst_22 [1] : vector<8x8xf32> to vector<8xf32>
    %45 = vector.shape_cast %44 : vector<8xf32> to vector<8x1xf32>
    %46 = vector.broadcast %45 : vector<8x1xf32> to vector<8x8xf32>
    %47 = arith.subf %43, %46 : vector<8x8xf32>
    %48 = math.exp %47 : vector<8x8xf32>
    %cst_23 = arith.constant dense<0.000000e+00> : vector<8xf32>
    %49 = vector.multi_reduction <add>, %48, %cst_23 [1] : vector<8x8xf32> to vector<8xf32>
    %50 = vector.shape_cast %49 : vector<8xf32> to vector<8x1xf32>
    %51 = tpu.reciprocal %50 {approx = true} : vector<8x1xf32> -> vector<8x1xf32>
    %52 = vector.broadcast %51 : vector<8x1xf32> to vector<8x8xf32>
    %53 = arith.mulf %48, %52 : vector<8x8xf32>
    %54 = arith.truncf %53 : vector<8x8xf32> to vector<8x8xbf16>
    %cst_24 = arith.constant dense<0.000000e+00> : vector<8x16xf32>
    %55 = tpu.matmul %54, %38, %cst_24 {dimension_numbers = #tpu.dot_dimension_numbers<[1], [0], [0], [1], [0, 0, 1, 1], [], []>} : vector<8x8xbf16>, vector<8x16xbf16>, vector<8x16xf32> -> vector<8x16xf32>
    %56 = arith.truncf %55 : vector<8x16xf32> to vector<8x16xbf16>
    %c0_25 = arith.constant 0 : index
    %c0_26 = arith.constant 0 : index
    %c16 = arith.constant 16 : index
    %57 = vector.load %arg5[%c0_25, %c0_26, %c16] : memref<1x8x32xbf16, #tpu.memory_space<vmem>>, vector<1x8x16xbf16>
    %58 = vector.shape_cast %57 : vector<1x8x16xbf16> to vector<8x16xbf16>
    %59 = vector.shape_cast %56 : vector<8x16xbf16> to vector<1x8x16xbf16>
    tpu.vector_store %arg5[%c0_25, %c0_26, %c16], %59 {strides = array<i32>} : memref<1x8x32xbf16, #tpu.memory_space<vmem>>, vector<1x8x16xbf16>,
    return
  }
  func.func @transform_0(%arg0: i32) -> (i32, i32, i32) {
    %c0_i32 = arith.constant 0 : i32
    %c0_i32_0 = arith.constant 0 : i32
    %c0_i32_1 = arith.constant 0 : i32
    return %arg0, %c0_i32, %c0_i32_0 : i32, i32, i32
  }
  func.func @transform_1(%arg0: i32) -> (i32, i32, i32) {
    %c0_i32 = arith.constant 0 : i32
    %c0_i32_0 = arith.constant 0 : i32
    %c0_i32_1 = arith.constant 0 : i32
    return %arg0, %c0_i32, %c0_i32_0 : i32, i32, i32
  }
  func.func @transform_2(%arg0: i32) -> (i32, i32, i32) {
    %c0_i32 = arith.constant 0 : i32
    %c0_i32_0 = arith.constant 0 : i32
    %c0_i32_1 = arith.constant 0 : i32
    return %arg0, %c0_i32, %c0_i32_0 : i32, i32, i32
  }
  func.func @transform_3(%arg0: i32) -> (i32, i32, i32) {
    %c0_i32 = arith.constant 0 : i32
    %c0_i32_0 = arith.constant 0 : i32
    %c0_i32_1 = arith.constant 0 : i32
    return %arg0, %c0_i32, %c0_i32_0 : i32, i32, i32
  }
  func.func @transform_4(%arg0: i32) -> (i32, i32, i32) {
    %c0_i32 = arith.constant 0 : i32
    %c0_i32_0 = arith.constant 0 : i32
    %c0_i32_1 = arith.constant 0 : i32
    return %arg0, %c0_i32, %c0_i32_0 : i32, i32, i32
  }
}

module attributes {stable_mosaic.version = 11 : i64} {
  func.func @_layernorm_res_kernel(%arg0: i32, %arg1: memref<16x32xbf16, #tpu.memory_space<vmem>>, %arg2: memref<16x32xf32, #tpu.memory_space<vmem>>, %arg3: memref<1x32xf32, #tpu.memory_space<vmem>>, %arg4: memref<1x32xf32, #tpu.memory_space<vmem>>, %arg5: memref<16x32xf32, #tpu.memory_space<vmem>>) attributes {dimension_semantics = [#tpu.dimension_semantics<parallel>], iteration_bounds = array<i64: 1>, scalar_prefetch = 0 : i64, scratch_operands = 0 : i64, tpu.core_type = #tpu.core_type<tc>, window_params = [{transform_indices = @transform_0, window_bounds = array<i64: 16, 32>}, {transform_indices = @transform_1, window_bounds = array<i64: 16, 32>}, {pipeline_mode = #tpu.pipeline_mode<synchronous>, transform_indices = @transform_2, window_bounds = array<i64: 1, 32>}, {pipeline_mode = #tpu.pipeline_mode<synchronous>, transform_indices = @transform_3, window_bounds = array<i64: 1, 32>}, {transform_indices = @transform_4, window_bounds = array<i64: 16, 32>}]} {
    %c0 = arith.constant 0 : index
    %c0_0 = arith.constant 0 : index
    %0 = vector.load %arg1[%c0, %c0_0] : memref<16x32xbf16, #tpu.memory_space<vmem>>, vector<16x32xbf16>
    %1 = arith.extf %0 : vector<16x32xbf16> to vector<16x32xf32>
    %c0_1 = arith.constant 0 : index
    %c0_2 = arith.constant 0 : index
    %2 = vector.load %arg2[%c0_1, %c0_2] : memref<16x32xf32, #tpu.memory_space<vmem>>, vector<16x32xf32>
    %3 = arith.addf %1, %2 : vector<16x32xf32>
    %cst = arith.constant dense<0.000000e+00> : vector<16xf32>
    %4 = vector.multi_reduction <add>, %3, %cst [1] : vector<16x32xf32> to vector<16xf32>
    %5 = vector.shape_cast %4 : vector<16xf32> to vector<16x1xf32>
    %cst_3 = arith.constant 3.200000e+01 : f32
    %6 = vector.broadcast %cst_3 : f32 to vector<16x1xf32>
    %7 = arith.divf %5, %6 : vector<16x1xf32>
    %8 = vector.broadcast %7 : vector<16x1xf32> to vector<16x32xf32>
    %9 = arith.subf %3, %8 : vector<16x32xf32>
    %10 = arith.mulf %9, %9 : vector<16x32xf32>
    %cst_4 = arith.constant dense<0.000000e+00> : vector<16xf32>
    %11 = vector.multi_reduction <add>, %10, %cst_4 [1] : vector<16x32xf32> to vector<16xf32>
    %12 = vector.shape_cast %11 : vector<16xf32> to vector<16x1xf32>
    %cst_5 = arith.constant 3.200000e+01 : f32
    %13 = vector.broadcast %cst_5 : f32 to vector<16x1xf32>
    %14 = arith.divf %12, %13 : vector<16x1xf32>
    %15 = vector.broadcast %7 : vector<16x1xf32> to vector<16x32xf32>
    %16 = arith.subf %3, %15 : vector<16x32xf32>
    %cst_6 = arith.constant 9.99999996E-13 : f32
    %17 = vector.broadcast %cst_6 : f32 to vector<16x1xf32>
    %18 = arith.addf %14, %17 : vector<16x1xf32>
    %19 = math.rsqrt %18 : vector<16x1xf32>
    %20 = vector.broadcast %19 : vector<16x1xf32> to vector<16x32xf32>
    %21 = arith.mulf %16, %20 : vector<16x32xf32>
    %c0_7 = arith.constant 0 : index
    %c0_8 = arith.constant 0 : index
    %22 = vector.load %arg3[%c0_7, %c0_8] : memref<1x32xf32, #tpu.memory_space<vmem>>, vector<1x32xf32>
    %23 = vector.broadcast %22 : vector<1x32xf32> to vector<16x32xf32>
    %24 = arith.mulf %21, %23 : vector<16x32xf32>
    %c0_9 = arith.constant 0 : index
    %c0_10 = arith.constant 0 : index
    %25 = vector.load %arg4[%c0_9, %c0_10] : memref<1x32xf32, #tpu.memory_space<vmem>>, vector<1x32xf32>
    %26 = vector.broadcast %25 : vector<1x32xf32> to vector<16x32xf32>
    %27 = arith.addf %24, %26 : vector<16x32xf32>
    %c0_11 = arith.constant 0 : index
    %c0_12 = arith.constant 0 : index
    %28 = vector.load %arg5[%c0_11, %c0_12] : memref<16x32xf32, #tpu.memory_space<vmem>>, vector<16x32xf32>
    tpu.vector_store %arg5[%c0_11, %c0_12], %27 {strides = array<i32>} : memref<16x32xf32, #tpu.memory_space<vmem>>, vector<16x32xf32>,
    return
  }
  func.func @transform_0(%arg0: i32) -> (i32, i32) {
    %c0_i32 = arith.constant 0 : i32
    %c0_i32_0 = arith.constant 0 : i32
    return %arg0, %c0_i32 : i32, i32
  }
  func.func @transform_1(%arg0: i32) -> (i32, i32) {
    %c0_i32 = arith.constant 0 : i32
    %c0_i32_0 = arith.constant 0 : i32
    return %arg0, %c0_i32 : i32, i32
  }
  func.func @transform_2(%arg0: i32) -> (i32, i32) {
    %c0_i32 = arith.constant 0 : i32
    %c0_i32_0 = arith.constant 0 : i32
    %c0_i32_1 = arith.constant 0 : i32
    return %c0_i32, %c0_i32_0 : i32, i32
  }
  func.func @transform_3(%arg0: i32) -> (i32, i32) {
    %c0_i32 = arith.constant 0 : i32
    %c0_i32_0 = arith.constant 0 : i32
    %c0_i32_1 = arith.constant 0 : i32
    return %c0_i32, %c0_i32_0 : i32, i32
  }
  func.func @transform_4(%arg0: i32) -> (i32, i32) {
    %c0_i32 = arith.constant 0 : i32
    %c0_i32_0 = arith.constant 0 : i32
    return %arg0, %c0_i32 : i32, i32
  }
}

module attributes {stable_mosaic.version = 11 : i64} {
  func.func @_linear_kernel(%arg0: i32, %arg1: i32, %arg2: memref<16x32xf32, #tpu.memory_space<vmem>>, %arg3: memref<32x128xf32, #tpu.memory_space<vmem>>, %arg4: memref<1x128xf32, #tpu.memory_space<vmem>>, %arg5: memref<16x128xbf16, #tpu.memory_space<vmem>>) attributes {dimension_semantics = [#tpu.dimension_semantics<parallel>, #tpu.dimension_semantics<parallel>], iteration_bounds = array<i64: 1, 1>, scalar_prefetch = 0 : i64, scratch_operands = 0 : i64, tpu.core_type = #tpu.core_type<tc>, window_params = [{transform_indices = @transform_0, window_bounds = array<i64: 16, 32>}, {transform_indices = @transform_1, window_bounds = array<i64: 32, 128>}, {transform_indices = @transform_2, window_bounds = array<i64: 1, 128>}, {transform_indices = @transform_3, window_bounds = array<i64: 16, 128>}]} {
    %c0 = arith.constant 0 : index
    %c0_0 = arith.constant 0 : index
    %0 = vector.load %arg2[%c0, %c0_0] : memref<16x32xf32, #tpu.memory_space<vmem>>, vector<16x32xf32>
    %1 = arith.truncf %0 : vector<16x32xf32> to vector<16x32xbf16>
    %c0_1 = arith.constant 0 : index
    %c0_2 = arith.constant 0 : index
    %2 = vector.load %arg3[%c0_1, %c0_2] : memref<32x128xf32, #tpu.memory_space<vmem>>, vector<32x128xf32>
    %3 = arith.truncf %2 : vector<32x128xf32> to vector<32x128xbf16>
    %cst = arith.constant dense<0.000000e+00> : vector<16x128xf32>
    %4 = tpu.matmul %1, %3, %cst {dimension_numbers = #tpu.dot_dimension_numbers<[1], [0], [0], [1], [0, 0, 1, 1], [], []>} : vector<16x32xbf16>, vector<32x128xbf16>, vector<16x128xf32> -> vector<16x128xf32>
    %c0_3 = arith.constant 0 : index
    %c0_4 = arith.constant 0 : index
    %5 = vector.load %arg4[%c0_3, %c0_4] : memref<1x128xf32, #tpu.memory_space<vmem>>, vector<1x128xf32>
    %6 = vector.broadcast %5 : vector<1x128xf32> to vector<16x128xf32>
    %7 = arith.addf %4, %6 : vector<16x128xf32>
    %8 = arith.mulf %7, %7 : vector<16x128xf32>
    %9 = arith.mulf %7, %8 : vector<16x128xf32>
    %cst_5 = arith.constant 4.471500e-02 : f32
    %10 = vector.broadcast %cst_5 : f32 to vector<16x128xf32>
    %11 = arith.mulf %10, %9 : vector<16x128xf32>
    %12 = arith.addf %7, %11 : vector<16x128xf32>
    %cst_6 = arith.constant 0.797884583 : f32
    %13 = vector.broadcast %cst_6 : f32 to vector<16x128xf32>
    %14 = arith.mulf %13, %12 : vector<16x128xf32>
    %15 = math.tanh %14 : vector<16x128xf32>
    %cst_7 = arith.constant 1.000000e+00 : f32
    %16 = vector.broadcast %cst_7 : f32 to vector<16x128xf32>
    %17 = arith.addf %16, %15 : vector<16x128xf32>
    %cst_8 = arith.constant 5.000000e-01 : f32
    %18 = vector.broadcast %cst_8 : f32 to vector<16x128xf32>
    %19 = arith.mulf %18, %17 : vector<16x128xf32>
    %20 = arith.mulf %7, %19 : vector<16x128xf32>
    %21 = arith.truncf %20 : vector<16x128xf32> to vector<16x128xbf16>
    %c0_9 = arith.constant 0 : index
    %c0_10 = arith.constant 0 : index
    %22 = vector.load %arg5[%c0_9, %c0_10] : memref<16x128xbf16, #tpu.memory_space<vmem>>, vector<16x128xbf16>
    tpu.vector_store %arg5[%c0_9, %c0_10], %21 {strides = array<i32>} : memref<16x128xbf16, #tpu.memory_space<vmem>>, vector<16x128xbf16>,
    return
  }
  func.func @transform_0(%arg0: i32, %arg1: i32) -> (i32, i32) {
    %c0_i32 = arith.constant 0 : i32
    %c0_i32_0 = arith.constant 0 : i32
    return %arg0, %c0_i32 : i32, i32
  }
  func.func @transform_1(%arg0: i32, %arg1: i32) -> (i32, i32) {
    %c0_i32 = arith.constant 0 : i32
    %c0_i32_0 = arith.constant 0 : i32
    return %c0_i32, %arg1 : i32, i32
  }
  func.func @transform_2(%arg0: i32, %arg1: i32) -> (i32, i32) {
    %c0_i32 = arith.constant 0 : i32
    %c0_i32_0 = arith.constant 0 : i32
    return %c0_i32, %arg1 : i32, i32
  }
  func.func @transform_3(%arg0: i32, %arg1: i32) -> (i32, i32) {
    %c0_i32 = arith.constant 0 : i32
    return %arg0, %arg1 : i32, i32
  }
}

module attributes {stable_mosaic.version = 11 : i64} {
  func.func @_linear_kernel(%arg0: i32, %arg1: i32, %arg2: memref<16x128xbf16, #tpu.memory_space<vmem>>, %arg3: memref<128x32xf32, #tpu.memory_space<vmem>>, %arg4: memref<1x32xf32, #tpu.memory_space<vmem>>, %arg5: memref<16x32xbf16, #tpu.memory_space<vmem>>) attributes {dimension_semantics = [#tpu.dimension_semantics<parallel>, #tpu.dimension_semantics<parallel>], iteration_bounds = array<i64: 1, 1>, scalar_prefetch = 0 : i64, scratch_operands = 0 : i64, tpu.core_type = #tpu.core_type<tc>, window_params = [{transform_indices = @transform_0, window_bounds = array<i64: 16, 128>}, {transform_indices = @transform_1, window_bounds = array<i64: 128, 32>}, {transform_indices = @transform_2, window_bounds = array<i64: 1, 32>}, {transform_indices = @transform_3, window_bounds = array<i64: 16, 32>}]} {
    %c0 = arith.constant 0 : index
    %c0_0 = arith.constant 0 : index
    %0 = vector.load %arg2[%c0, %c0_0] : memref<16x128xbf16, #tpu.memory_space<vmem>>, vector<16x128xbf16>
    %c0_1 = arith.constant 0 : index
    %c0_2 = arith.constant 0 : index
    %1 = vector.load %arg3[%c0_1, %c0_2] : memref<128x32xf32, #tpu.memory_space<vmem>>, vector<128x32xf32>
    %2 = arith.truncf %1 : vector<128x32xf32> to vector<128x32xbf16>
    %cst = arith.constant dense<0.000000e+00> : vector<16x32xf32>
    %3 = tpu.matmul %0, %2, %cst {dimension_numbers = #tpu.dot_dimension_numbers<[1], [0], [0], [1], [0, 0, 1, 1], [], []>} : vector<16x128xbf16>, vector<128x32xbf16>, vector<16x32xf32> -> vector<16x32xf32>
    %c0_3 = arith.constant 0 : index
    %c0_4 = arith.constant 0 : index
    %4 = vector.load %arg4[%c0_3, %c0_4] : memref<1x32xf32, #tpu.memory_space<vmem>>, vector<1x32xf32>
    %5 = vector.broadcast %4 : vector<1x32xf32> to vector<16x32xf32>
    %6 = arith.addf %3, %5 : vector<16x32xf32>
    %7 = arith.truncf %6 : vector<16x32xf32> to vector<16x32xbf16>
    %c0_5 = arith.constant 0 : index
    %c0_6 = arith.constant 0 : index
    %8 = vector.load %arg5[%c0_5, %c0_6] : memref<16x32xbf16, #tpu.memory_space<vmem>>, vector<16x32xbf16>
    tpu.vector_store %arg5[%c0_5, %c0_6], %7 {strides = array<i32>} : memref<16x32xbf16, #tpu.memory_space<vmem>>, vector<16x32xbf16>,
    return
  }
  func.func @transform_0(%arg0: i32, %arg1: i32) -> (i32, i32) {
    %c0_i32 = arith.constant 0 : i32
    %c0_i32_0 = arith.constant 0 : i32
    return %arg0, %c0_i32 : i32, i32
  }
  func.func @transform_1(%arg0: i32, %arg1: i32) -> (i32, i32) {
    %c0_i32 = arith.constant 0 : i32
    %c0_i32_0 = arith.constant 0 : i32
    return %c0_i32, %arg1 : i32, i32
  }
  func.func @transform_2(%arg0: i32, %arg1: i32) -> (i32, i32) {
    %c0_i32 = arith.constant 0 : i32
    %c0_i32_0 = arith.constant 0 : i32
    return %c0_i32, %arg1 : i32, i32
  }
  func.func @transform_3(%arg0: i32, %arg1: i32) -> (i32, i32) {
    %c0_i32 = arith.constant 0 : i32
    return %arg0, %arg1 : i32, i32
  }
}

module attributes {stable_mosaic.version = 11 : i64} {
  func.func @_linear_kernel(%arg0: i32, %arg1: i32, %arg2: memref<32x48xf32, #tpu.memory_space<vmem>>, %arg3: memref<48x32xf32, #tpu.memory_space<vmem>>, %arg4: memref<1x32xf32, #tpu.memory_space<vmem>>, %arg5: memref<32x32xf32, #tpu.memory_space<vmem>>) attributes {dimension_semantics = [#tpu.dimension_semantics<parallel>, #tpu.dimension_semantics<parallel>], iteration_bounds = array<i64: 1, 1>, scalar_prefetch = 0 : i64, scratch_operands = 0 : i64, tpu.core_type = #tpu.core_type<tc>, window_params = [{transform_indices = @transform_0, window_bounds = array<i64: 32, 48>}, {transform_indices = @transform_1, window_bounds = array<i64: 48, 32>}, {transform_indices = @transform_2, window_bounds = array<i64: 1, 32>}, {transform_indices = @transform_3, window_bounds = array<i64: 32, 32>}]} {
    %c0 = arith.constant 0 : index
    %c0_0 = arith.constant 0 : index
    %0 = vector.load %arg2[%c0, %c0_0] : memref<32x48xf32, #tpu.memory_space<vmem>>, vector<32x48xf32>
    %1 = arith.truncf %0 : vector<32x48xf32> to vector<32x48xbf16>
    %c0_1 = arith.constant 0 : index
    %c0_2 = arith.constant 0 : index
    %2 = vector.load %arg3[%c0_1, %c0_2] : memref<48x32xf32, #tpu.memory_space<vmem>>, vector<48x32xf32>
    %3 = arith.truncf %2 : vector<48x32xf32> to vector<48x32xbf16>
    %cst = arith.constant dense<0.000000e+00> : vector<32x32xf32>
    %4 = tpu.matmul %1, %3, %cst {dimension_numbers = #tpu.dot_dimension_numbers<[1], [0], [0], [1], [0, 0, 1, 1], [], []>} : vector<32x48xbf16>, vector<48x32xbf16>, vector<32x32xf32> -> vector<32x32xf32>
    %c0_3 = arith.constant 0 : index
    %c0_4 = arith.constant 0 : index
    %5 = vector.load %arg4[%c0_3, %c0_4] : memref<1x32xf32, #tpu.memory_space<vmem>>, vector<1x32xf32>
    %6 = vector.broadcast %5 : vector<1x32xf32> to vector<32x32xf32>
    %7 = arith.addf %4, %6 : vector<32x32xf32>
    %c0_5 = arith.constant 0 : index
    %c0_6 = arith.constant 0 : index
    %8 = vector.load %arg5[%c0_5, %c0_6] : memref<32x32xf32, #tpu.memory_space<vmem>>, vector<32x32xf32>
    tpu.vector_store %arg5[%c0_5, %c0_6], %7 {strides = array<i32>} : memref<32x32xf32, #tpu.memory_space<vmem>>, vector<32x32xf32>,
    return
  }
  func.func @transform_0(%arg0: i32, %arg1: i32) -> (i32, i32) {
    %c0_i32 = arith.constant 0 : i32
    %c0_i32_0 = arith.constant 0 : i32
    return %arg0, %c0_i32 : i32, i32
  }
  func.func @transform_1(%arg0: i32, %arg1: i32) -> (i32, i32) {
    %c0_i32 = arith.constant 0 : i32
    %c0_i32_0 = arith.constant 0 : i32
    return %c0_i32, %arg1 : i32, i32
  }
  func.func @transform_2(%arg0: i32, %arg1: i32) -> (i32, i32) {
    %c0_i32 = arith.constant 0 : i32
    %c0_i32_0 = arith.constant 0 : i32
    return %c0_i32, %arg1 : i32, i32
  }
  func.func @transform_3(%arg0: i32, %arg1: i32) -> (i32, i32) {
    %c0_i32 = arith.constant 0 : i32
    return %arg0, %arg1 : i32, i32
  }
}

module attributes {stable_mosaic.version = 11 : i64} {
  func.func @_layernorm_kernel(%arg0: i32, %arg1: memref<48x32xf32, #tpu.memory_space<vmem>>, %arg2: memref<1x32xf32, #tpu.memory_space<vmem>>, %arg3: memref<1x32xf32, #tpu.memory_space<vmem>>, %arg4: memref<48x32xbf16, #tpu.memory_space<vmem>>) attributes {dimension_semantics = [#tpu.dimension_semantics<parallel>], iteration_bounds = array<i64: 1>, scalar_prefetch = 0 : i64, scratch_operands = 0 : i64, tpu.core_type = #tpu.core_type<tc>, window_params = [{transform_indices = @transform_0, window_bounds = array<i64: 48, 32>}, {pipeline_mode = #tpu.pipeline_mode<synchronous>, transform_indices = @transform_1, window_bounds = array<i64: 1, 32>}, {pipeline_mode = #tpu.pipeline_mode<synchronous>, transform_indices = @transform_2, window_bounds = array<i64: 1, 32>}, {transform_indices = @transform_3, window_bounds = array<i64: 48, 32>}]} {
    %c0 = arith.constant 0 : index
    %c0_0 = arith.constant 0 : index
    %0 = vector.load %arg1[%c0, %c0_0] : memref<48x32xf32, #tpu.memory_space<vmem>>, vector<48x32xf32>
    %cst = arith.constant dense<0.000000e+00> : vector<48xf32>
    %1 = vector.multi_reduction <add>, %0, %cst [1] : vector<48x32xf32> to vector<48xf32>
    %2 = vector.shape_cast %1 : vector<48xf32> to vector<48x1xf32>
    %cst_1 = arith.constant 3.200000e+01 : f32
    %3 = vector.broadcast %cst_1 : f32 to vector<48x1xf32>
    %4 = arith.divf %2, %3 : vector<48x1xf32>
    %5 = vector.broadcast %4 : vector<48x1xf32> to vector<48x32xf32>
    %6 = arith.subf %0, %5 : vector<48x32xf32>
    %7 = arith.mulf %6, %6 : vector<48x32xf32>
    %cst_2 = arith.constant dense<0.000000e+00> : vector<48xf32>
    %8 = vector.multi_reduction <add>, %7, %cst_2 [1] : vector<48x32xf32> to vector<48xf32>
    %9 = vector.shape_cast %8 : vector<48xf32> to vector<48x1xf32>
    %cst_3 = arith.constant 3.200000e+01 : f32
    %10 = vector.broadcast %cst_3 : f32 to vector<48x1xf32>
    %11 = arith.divf %9, %10 : vector<48x1xf32>
    %12 = vector.broadcast %4 : vector<48x1xf32> to vector<48x32xf32>
    %13 = arith.subf %0, %12 : vector<48x32xf32>
    %cst_4 = arith.constant 9.99999997E-7 : f32
    %14 = vector.broadcast %cst_4 : f32 to vector<48x1xf32>
    %15 = arith.addf %11, %14 : vector<48x1xf32>
    %16 = math.rsqrt %15 : vector<48x1xf32>
    %17 = vector.broadcast %16 : vector<48x1xf32> to vector<48x32xf32>
    %18 = arith.mulf %13, %17 : vector<48x32xf32>
    %c0_5 = arith.constant 0 : index
    %c0_6 = arith.constant 0 : index
    %19 = vector.load %arg2[%c0_5, %c0_6] : memref<1x32xf32, #tpu.memory_space<vmem>>, vector<1x32xf32>
    %20 = vector.broadcast %19 : vector<1x32xf32> to vector<48x32xf32>
    %21 = arith.mulf %18, %20 : vector<48x32xf32>
    %c0_7 = arith.constant 0 : index
    %c0_8 = arith.constant 0 : index
    %22 = vector.load %arg3[%c0_7, %c0_8] : memref<1x32xf32, #tpu.memory_space<vmem>>, vector<1x32xf32>
    %23 = vector.broadcast %22 : vector<1x32xf32> to vector<48x32xf32>
    %24 = arith.addf %21, %23 : vector<48x32xf32>
    %25 = arith.truncf %24 : vector<48x32xf32> to vector<48x32xbf16>
    %c0_9 = arith.constant 0 : index
    %c0_10 = arith.constant 0 : index
    %26 = vector.load %arg4[%c0_9, %c0_10] : memref<48x32xbf16, #tpu.memory_space<vmem>>, vector<48x32xbf16>
    tpu.vector_store %arg4[%c0_9, %c0_10], %25 {strides = array<i32>} : memref<48x32xbf16, #tpu.memory_space<vmem>>, vector<48x32xbf16>,
    return
  }
  func.func @transform_0(%arg0: i32) -> (i32, i32) {
    %c0_i32 = arith.constant 0 : i32
    %c0_i32_0 = arith.constant 0 : i32
    return %arg0, %c0_i32 : i32, i32
  }
  func.func @transform_1(%arg0: i32) -> (i32, i32) {
    %c0_i32 = arith.constant 0 : i32
    %c0_i32_0 = arith.constant 0 : i32
    %c0_i32_1 = arith.constant 0 : i32
    return %c0_i32, %c0_i32_0 : i32, i32
  }
  func.func @transform_2(%arg0: i32) -> (i32, i32) {
    %c0_i32 = arith.constant 0 : i32
    %c0_i32_0 = arith.constant 0 : i32
    %c0_i32_1 = arith.constant 0 : i32
    return %c0_i32, %c0_i32_0 : i32, i32
  }
  func.func @transform_3(%arg0: i32) -> (i32, i32) {
    %c0_i32 = arith.constant 0 : i32
    %c0_i32_0 = arith.constant 0 : i32
    return %arg0, %c0_i32 : i32, i32
  }
}

module attributes {stable_mosaic.version = 11 : i64} {
  func.func @_linear_kernel(%arg0: i32, %arg1: i32, %arg2: memref<48x32xbf16, #tpu.memory_space<vmem>>, %arg3: memref<32x96xf32, #tpu.memory_space<vmem>>, %arg4: memref<1x96xf32, #tpu.memory_space<vmem>>, %arg5: memref<48x96xbf16, #tpu.memory_space<vmem>>) attributes {dimension_semantics = [#tpu.dimension_semantics<parallel>, #tpu.dimension_semantics<parallel>], iteration_bounds = array<i64: 1, 1>, scalar_prefetch = 0 : i64, scratch_operands = 0 : i64, tpu.core_type = #tpu.core_type<tc>, window_params = [{transform_indices = @transform_0, window_bounds = array<i64: 48, 32>}, {transform_indices = @transform_1, window_bounds = array<i64: 32, 96>}, {transform_indices = @transform_2, window_bounds = array<i64: 1, 96>}, {transform_indices = @transform_3, window_bounds = array<i64: 48, 96>}]} {
    %c0 = arith.constant 0 : index
    %c0_0 = arith.constant 0 : index
    %0 = vector.load %arg2[%c0, %c0_0] : memref<48x32xbf16, #tpu.memory_space<vmem>>, vector<48x32xbf16>
    %c0_1 = arith.constant 0 : index
    %c0_2 = arith.constant 0 : index
    %1 = vector.load %arg3[%c0_1, %c0_2] : memref<32x96xf32, #tpu.memory_space<vmem>>, vector<32x96xf32>
    %2 = arith.truncf %1 : vector<32x96xf32> to vector<32x96xbf16>
    %cst = arith.constant dense<0.000000e+00> : vector<48x96xf32>
    %3 = tpu.matmul %0, %2, %cst {dimension_numbers = #tpu.dot_dimension_numbers<[1], [0], [0], [1], [0, 0, 1, 1], [], []>} : vector<48x32xbf16>, vector<32x96xbf16>, vector<48x96xf32> -> vector<48x96xf32>
    %c0_3 = arith.constant 0 : index
    %c0_4 = arith.constant 0 : index
    %4 = vector.load %arg4[%c0_3, %c0_4] : memref<1x96xf32, #tpu.memory_space<vmem>>, vector<1x96xf32>
    %5 = vector.broadcast %4 : vector<1x96xf32> to vector<48x96xf32>
    %6 = arith.addf %3, %5 : vector<48x96xf32>
    %7 = arith.truncf %6 : vector<48x96xf32> to vector<48x96xbf16>
    %c0_5 = arith.constant 0 : index
    %c0_6 = arith.constant 0 : index
    %8 = vector.load %arg5[%c0_5, %c0_6] : memref<48x96xbf16, #tpu.memory_space<vmem>>, vector<48x96xbf16>
    tpu.vector_store %arg5[%c0_5, %c0_6], %7 {strides = array<i32>} : memref<48x96xbf16, #tpu.memory_space<vmem>>, vector<48x96xbf16>,
    return
  }
  func.func @transform_0(%arg0: i32, %arg1: i32) -> (i32, i32) {
    %c0_i32 = arith.constant 0 : i32
    %c0_i32_0 = arith.constant 0 : i32
    return %arg0, %c0_i32 : i32, i32
  }
  func.func @transform_1(%arg0: i32, %arg1: i32) -> (i32, i32) {
    %c0_i32 = arith.constant 0 : i32
    %c0_i32_0 = arith.constant 0 : i32
    return %c0_i32, %arg1 : i32, i32
  }
  func.func @transform_2(%arg0: i32, %arg1: i32) -> (i32, i32) {
    %c0_i32 = arith.constant 0 : i32
    %c0_i32_0 = arith.constant 0 : i32
    return %c0_i32, %arg1 : i32, i32
  }
  func.func @transform_3(%arg0: i32, %arg1: i32) -> (i32, i32) {
    %c0_i32 = arith.constant 0 : i32
    return %arg0, %arg1 : i32, i32
  }
}

module attributes {stable_mosaic.version = 11 : i64} {
  func.func @_sa_packed_kernel(%arg0: i32, %arg1: memref<1x17x96xbf16, #tpu.memory_space<vmem>>, %arg2: memref<1x17x32xbf16, #tpu.memory_space<vmem>>) attributes {dimension_semantics = [#tpu.dimension_semantics<parallel>], iteration_bounds = array<i64: 2>, scalar_prefetch = 0 : i64, scratch_operands = 0 : i64, tpu.core_type = #tpu.core_type<tc>, window_params = [{transform_indices = @transform_0, window_bounds = array<i64: 1, 17, 96>}, {transform_indices = @transform_1, window_bounds = array<i64: 1, 17, 32>}]} {
    %c0 = arith.constant 0 : index
    %c0_0 = arith.constant 0 : index
    %c0_1 = arith.constant 0 : index
    %0 = vector.load %arg1[%c0, %c0_0, %c0_1] : memref<1x17x96xbf16, #tpu.memory_space<vmem>>, vector<1x17x96xbf16>
    %1 = vector.shape_cast %0 : vector<1x17x96xbf16> to vector<17x96xbf16>
    %2 = vector.extract_strided_slice %1 {offsets = [0, 0], sizes = [17, 32], strides = [1, 1]} : vector<17x96xbf16> to vector<17x32xbf16>
    %3 = vector.extract_strided_slice %1 {offsets = [0, 32], sizes = [17, 32], strides = [1, 1]} : vector<17x96xbf16> to vector<17x32xbf16>
    %4 = vector.extract_strided_slice %1 {offsets = [0, 64], sizes = [17, 32], strides = [1, 1]} : vector<17x96xbf16> to vector<17x32xbf16>
    %5 = vector.extract_strided_slice %2 {offsets = [0, 0], sizes = [17, 16], strides = [1, 1]} : vector<17x32xbf16> to vector<17x16xbf16>
    %6 = vector.extract_strided_slice %3 {offsets = [0, 0], sizes = [17, 16], strides = [1, 1]} : vector<17x32xbf16> to vector<17x16xbf16>
    %7 = vector.extract_strided_slice %4 {offsets = [0, 0], sizes = [17, 16], strides = [1, 1]} : vector<17x32xbf16> to vector<17x16xbf16>
    %cst = arith.constant dense<0.000000e+00> : vector<17x17xf32>
    %8 = tpu.matmul %5, %6, %cst {dimension_numbers = #tpu.dot_dimension_numbers<[1], [1], [0], [0], [0, 0, 1, 0], [], []>} : vector<17x16xbf16>, vector<17x16xbf16>, vector<17x17xf32> -> vector<17x17xf32>
    %cst_2 = arith.constant 2.500000e-01 : f32
    %9 = vector.broadcast %cst_2 : f32 to vector<17x17xf32>
    %10 = arith.mulf %8, %9 : vector<17x17xf32>
    %cst_3 = arith.constant dense<0xFF800000> : vector<17xf32>
    %11 = vector.multi_reduction <maximumf>, %10, %cst_3 [1] : vector<17x17xf32> to vector<17xf32>
    %12 = vector.shape_cast %11 : vector<17xf32> to vector<17x1xf32>
    %13 = vector.broadcast %12 : vector<17x1xf32> to vector<17x17xf32>
    %14 = arith.subf %10, %13 : vector<17x17xf32>
    %15 = math.exp %14 : vector<17x17xf32>
    %cst_4 = arith.constant dense<0.000000e+00> : vector<17xf32>
    %16 = vector.multi_reduction <add>, %15, %cst_4 [1] : vector<17x17xf32> to vector<17xf32>
    %17 = vector.shape_cast %16 : vector<17xf32> to vector<17x1xf32>
    %18 = tpu.reciprocal %17 {approx = true} : vector<17x1xf32> -> vector<17x1xf32>
    %19 = vector.broadcast %18 : vector<17x1xf32> to vector<17x17xf32>
    %20 = arith.mulf %15, %19 : vector<17x17xf32>
    %21 = arith.truncf %20 : vector<17x17xf32> to vector<17x17xbf16>
    %cst_5 = arith.constant dense<0.000000e+00> : vector<17x16xf32>
    %22 = tpu.matmul %21, %7, %cst_5 {dimension_numbers = #tpu.dot_dimension_numbers<[1], [0], [0], [1], [0, 0, 1, 1], [], []>} : vector<17x17xbf16>, vector<17x16xbf16>, vector<17x16xf32> -> vector<17x16xf32>
    %23 = arith.truncf %22 : vector<17x16xf32> to vector<17x16xbf16>
    %c0_6 = arith.constant 0 : index
    %c0_7 = arith.constant 0 : index
    %c0_8 = arith.constant 0 : index
    %24 = vector.load %arg2[%c0_6, %c0_7, %c0_8] : memref<1x17x32xbf16, #tpu.memory_space<vmem>>, vector<1x17x16xbf16>
    %25 = vector.shape_cast %24 : vector<1x17x16xbf16> to vector<17x16xbf16>
    %26 = vector.shape_cast %23 : vector<17x16xbf16> to vector<1x17x16xbf16>
    tpu.vector_store %arg2[%c0_6, %c0_7, %c0_8], %26 {strides = array<i32>} : memref<1x17x32xbf16, #tpu.memory_space<vmem>>, vector<1x17x16xbf16>,
    %27 = vector.extract_strided_slice %2 {offsets = [0, 16], sizes = [17, 16], strides = [1, 1]} : vector<17x32xbf16> to vector<17x16xbf16>
    %28 = vector.extract_strided_slice %3 {offsets = [0, 16], sizes = [17, 16], strides = [1, 1]} : vector<17x32xbf16> to vector<17x16xbf16>
    %29 = vector.extract_strided_slice %4 {offsets = [0, 16], sizes = [17, 16], strides = [1, 1]} : vector<17x32xbf16> to vector<17x16xbf16>
    %cst_9 = arith.constant dense<0.000000e+00> : vector<17x17xf32>
    %30 = tpu.matmul %27, %28, %cst_9 {dimension_numbers = #tpu.dot_dimension_numbers<[1], [1], [0], [0], [0, 0, 1, 0], [], []>} : vector<17x16xbf16>, vector<17x16xbf16>, vector<17x17xf32> -> vector<17x17xf32>
    %cst_10 = arith.constant 2.500000e-01 : f32
    %31 = vector.broadcast %cst_10 : f32 to vector<17x17xf32>
    %32 = arith.mulf %30, %31 : vector<17x17xf32>
    %cst_11 = arith.constant dense<0xFF800000> : vector<17xf32>
    %33 = vector.multi_reduction <maximumf>, %32, %cst_11 [1] : vector<17x17xf32> to vector<17xf32>
    %34 = vector.shape_cast %33 : vector<17xf32> to vector<17x1xf32>
    %35 = vector.broadcast %34 : vector<17x1xf32> to vector<17x17xf32>
    %36 = arith.subf %32, %35 : vector<17x17xf32>
    %37 = math.exp %36 : vector<17x17xf32>
    %cst_12 = arith.constant dense<0.000000e+00> : vector<17xf32>
    %38 = vector.multi_reduction <add>, %37, %cst_12 [1] : vector<17x17xf32> to vector<17xf32>
    %39 = vector.shape_cast %38 : vector<17xf32> to vector<17x1xf32>
    %40 = tpu.reciprocal %39 {approx = true} : vector<17x1xf32> -> vector<17x1xf32>
    %41 = vector.broadcast %40 : vector<17x1xf32> to vector<17x17xf32>
    %42 = arith.mulf %37, %41 : vector<17x17xf32>
    %43 = arith.truncf %42 : vector<17x17xf32> to vector<17x17xbf16>
    %cst_13 = arith.constant dense<0.000000e+00> : vector<17x16xf32>
    %44 = tpu.matmul %43, %29, %cst_13 {dimension_numbers = #tpu.dot_dimension_numbers<[1], [0], [0], [1], [0, 0, 1, 1], [], []>} : vector<17x17xbf16>, vector<17x16xbf16>, vector<17x16xf32> -> vector<17x16xf32>
    %45 = arith.truncf %44 : vector<17x16xf32> to vector<17x16xbf16>
    %c0_14 = arith.constant 0 : index
    %c0_15 = arith.constant 0 : index
    %c16 = arith.constant 16 : index
    %46 = vector.load %arg2[%c0_14, %c0_15, %c16] : memref<1x17x32xbf16, #tpu.memory_space<vmem>>, vector<1x17x16xbf16>
    %47 = vector.shape_cast %46 : vector<1x17x16xbf16> to vector<17x16xbf16>
    %48 = vector.shape_cast %45 : vector<17x16xbf16> to vector<1x17x16xbf16>
    tpu.vector_store %arg2[%c0_14, %c0_15, %c16], %48 {strides = array<i32>} : memref<1x17x32xbf16, #tpu.memory_space<vmem>>, vector<1x17x16xbf16>,
    return
  }
  func.func @transform_0(%arg0: i32) -> (i32, i32, i32) {
    %c0_i32 = arith.constant 0 : i32
    %c0_i32_0 = arith.constant 0 : i32
    %c0_i32_1 = arith.constant 0 : i32
    return %arg0, %c0_i32, %c0_i32_0 : i32, i32, i32
  }
  func.func @transform_1(%arg0: i32) -> (i32, i32, i32) {
    %c0_i32 = arith.constant 0 : i32
    %c0_i32_0 = arith.constant 0 : i32
    %c0_i32_1 = arith.constant 0 : i32
    return %arg0, %c0_i32, %c0_i32_0 : i32, i32, i32
  }
}

module attributes {stable_mosaic.version = 11 : i64} {
  func.func @_linear_kernel(%arg0: i32, %arg1: i32, %arg2: memref<48x32xbf16, #tpu.memory_space<vmem>>, %arg3: memref<32x32xf32, #tpu.memory_space<vmem>>, %arg4: memref<1x32xf32, #tpu.memory_space<vmem>>, %arg5: memref<48x32xf32, #tpu.memory_space<vmem>>, %arg6: memref<48x32xf32, #tpu.memory_space<vmem>>) attributes {dimension_semantics = [#tpu.dimension_semantics<parallel>, #tpu.dimension_semantics<parallel>], iteration_bounds = array<i64: 1, 1>, scalar_prefetch = 0 : i64, scratch_operands = 0 : i64, tpu.core_type = #tpu.core_type<tc>, window_params = [{transform_indices = @transform_0, window_bounds = array<i64: 48, 32>}, {transform_indices = @transform_1, window_bounds = array<i64: 32, 32>}, {transform_indices = @transform_2, window_bounds = array<i64: 1, 32>}, {transform_indices = @transform_3, window_bounds = array<i64: 48, 32>}, {transform_indices = @transform_4, window_bounds = array<i64: 48, 32>}]} {
    %c0 = arith.constant 0 : index
    %c0_0 = arith.constant 0 : index
    %0 = vector.load %arg2[%c0, %c0_0] : memref<48x32xbf16, #tpu.memory_space<vmem>>, vector<48x32xbf16>
    %c0_1 = arith.constant 0 : index
    %c0_2 = arith.constant 0 : index
    %1 = vector.load %arg3[%c0_1, %c0_2] : memref<32x32xf32, #tpu.memory_space<vmem>>, vector<32x32xf32>
    %2 = arith.truncf %1 : vector<32x32xf32> to vector<32x32xbf16>
    %cst = arith.constant dense<0.000000e+00> : vector<48x32xf32>
    %3 = tpu.matmul %0, %2, %cst {dimension_numbers = #tpu.dot_dimension_numbers<[1], [0], [0], [1], [0, 0, 1, 1], [], []>} : vector<48x32xbf16>, vector<32x32xbf16>, vector<48x32xf32> -> vector<48x32xf32>
    %c0_3 = arith.constant 0 : index
    %c0_4 = arith.constant 0 : index
    %4 = vector.load %arg4[%c0_3, %c0_4] : memref<1x32xf32, #tpu.memory_space<vmem>>, vector<1x32xf32>
    %5 = vector.broadcast %4 : vector<1x32xf32> to vector<48x32xf32>
    %6 = arith.addf %3, %5 : vector<48x32xf32>
    %c0_5 = arith.constant 0 : index
    %c0_6 = arith.constant 0 : index
    %7 = vector.load %arg5[%c0_5, %c0_6] : memref<48x32xf32, #tpu.memory_space<vmem>>, vector<48x32xf32>
    %8 = arith.addf %6, %7 : vector<48x32xf32>
    %c0_7 = arith.constant 0 : index
    %c0_8 = arith.constant 0 : index
    %9 = vector.load %arg6[%c0_7, %c0_8] : memref<48x32xf32, #tpu.memory_space<vmem>>, vector<48x32xf32>
    tpu.vector_store %arg6[%c0_7, %c0_8], %8 {strides = array<i32>} : memref<48x32xf32, #tpu.memory_space<vmem>>, vector<48x32xf32>,
    return
  }
  func.func @transform_0(%arg0: i32, %arg1: i32) -> (i32, i32) {
    %c0_i32 = arith.constant 0 : i32
    %c0_i32_0 = arith.constant 0 : i32
    return %arg0, %c0_i32 : i32, i32
  }
  func.func @transform_1(%arg0: i32, %arg1: i32) -> (i32, i32) {
    %c0_i32 = arith.constant 0 : i32
    %c0_i32_0 = arith.constant 0 : i32
    return %c0_i32, %arg1 : i32, i32
  }
  func.func @transform_2(%arg0: i32, %arg1: i32) -> (i32, i32) {
    %c0_i32 = arith.constant 0 : i32
    %c0_i32_0 = arith.constant 0 : i32
    return %c0_i32, %arg1 : i32, i32
  }
  func.func @transform_3(%arg0: i32, %arg1: i32) -> (i32, i32) {
    %c0_i32 = arith.constant 0 : i32
    return %arg0, %arg1 : i32, i32
  }
  func.func @transform_4(%arg0: i32, %arg1: i32) -> (i32, i32) {
    %c0_i32 = arith.constant 0 : i32
    return %arg0, %arg1 : i32, i32
  }
}

module attributes {stable_mosaic.version = 11 : i64} {
  func.func @_linear_kernel(%arg0: i32, %arg1: i32, %arg2: memref<48x32xbf16, #tpu.memory_space<vmem>>, %arg3: memref<32x128xf32, #tpu.memory_space<vmem>>, %arg4: memref<1x128xf32, #tpu.memory_space<vmem>>, %arg5: memref<48x128xbf16, #tpu.memory_space<vmem>>) attributes {dimension_semantics = [#tpu.dimension_semantics<parallel>, #tpu.dimension_semantics<parallel>], iteration_bounds = array<i64: 1, 1>, scalar_prefetch = 0 : i64, scratch_operands = 0 : i64, tpu.core_type = #tpu.core_type<tc>, window_params = [{transform_indices = @transform_0, window_bounds = array<i64: 48, 32>}, {transform_indices = @transform_1, window_bounds = array<i64: 32, 128>}, {transform_indices = @transform_2, window_bounds = array<i64: 1, 128>}, {transform_indices = @transform_3, window_bounds = array<i64: 48, 128>}]} {
    %c0 = arith.constant 0 : index
    %c0_0 = arith.constant 0 : index
    %0 = vector.load %arg2[%c0, %c0_0] : memref<48x32xbf16, #tpu.memory_space<vmem>>, vector<48x32xbf16>
    %c0_1 = arith.constant 0 : index
    %c0_2 = arith.constant 0 : index
    %1 = vector.load %arg3[%c0_1, %c0_2] : memref<32x128xf32, #tpu.memory_space<vmem>>, vector<32x128xf32>
    %2 = arith.truncf %1 : vector<32x128xf32> to vector<32x128xbf16>
    %cst = arith.constant dense<0.000000e+00> : vector<48x128xf32>
    %3 = tpu.matmul %0, %2, %cst {dimension_numbers = #tpu.dot_dimension_numbers<[1], [0], [0], [1], [0, 0, 1, 1], [], []>} : vector<48x32xbf16>, vector<32x128xbf16>, vector<48x128xf32> -> vector<48x128xf32>
    %c0_3 = arith.constant 0 : index
    %c0_4 = arith.constant 0 : index
    %4 = vector.load %arg4[%c0_3, %c0_4] : memref<1x128xf32, #tpu.memory_space<vmem>>, vector<1x128xf32>
    %5 = vector.broadcast %4 : vector<1x128xf32> to vector<48x128xf32>
    %6 = arith.addf %3, %5 : vector<48x128xf32>
    %7 = arith.mulf %6, %6 : vector<48x128xf32>
    %8 = arith.mulf %6, %7 : vector<48x128xf32>
    %cst_5 = arith.constant 4.471500e-02 : f32
    %9 = vector.broadcast %cst_5 : f32 to vector<48x128xf32>
    %10 = arith.mulf %9, %8 : vector<48x128xf32>
    %11 = arith.addf %6, %10 : vector<48x128xf32>
    %cst_6 = arith.constant 0.797884583 : f32
    %12 = vector.broadcast %cst_6 : f32 to vector<48x128xf32>
    %13 = arith.mulf %12, %11 : vector<48x128xf32>
    %14 = math.tanh %13 : vector<48x128xf32>
    %cst_7 = arith.constant 1.000000e+00 : f32
    %15 = vector.broadcast %cst_7 : f32 to vector<48x128xf32>
    %16 = arith.addf %15, %14 : vector<48x128xf32>
    %cst_8 = arith.constant 5.000000e-01 : f32
    %17 = vector.broadcast %cst_8 : f32 to vector<48x128xf32>
    %18 = arith.mulf %17, %16 : vector<48x128xf32>
    %19 = arith.mulf %6, %18 : vector<48x128xf32>
    %20 = arith.truncf %19 : vector<48x128xf32> to vector<48x128xbf16>
    %c0_9 = arith.constant 0 : index
    %c0_10 = arith.constant 0 : index
    %21 = vector.load %arg5[%c0_9, %c0_10] : memref<48x128xbf16, #tpu.memory_space<vmem>>, vector<48x128xbf16>
    tpu.vector_store %arg5[%c0_9, %c0_10], %20 {strides = array<i32>} : memref<48x128xbf16, #tpu.memory_space<vmem>>, vector<48x128xbf16>,
    return
  }
  func.func @transform_0(%arg0: i32, %arg1: i32) -> (i32, i32) {
    %c0_i32 = arith.constant 0 : i32
    %c0_i32_0 = arith.constant 0 : i32
    return %arg0, %c0_i32 : i32, i32
  }
  func.func @transform_1(%arg0: i32, %arg1: i32) -> (i32, i32) {
    %c0_i32 = arith.constant 0 : i32
    %c0_i32_0 = arith.constant 0 : i32
    return %c0_i32, %arg1 : i32, i32
  }
  func.func @transform_2(%arg0: i32, %arg1: i32) -> (i32, i32) {
    %c0_i32 = arith.constant 0 : i32
    %c0_i32_0 = arith.constant 0 : i32
    return %c0_i32, %arg1 : i32, i32
  }
  func.func @transform_3(%arg0: i32, %arg1: i32) -> (i32, i32) {
    %c0_i32 = arith.constant 0 : i32
    return %arg0, %arg1 : i32, i32
  }
}

module attributes {stable_mosaic.version = 11 : i64} {
  func.func @_linear_kernel(%arg0: i32, %arg1: i32, %arg2: memref<48x128xbf16, #tpu.memory_space<vmem>>, %arg3: memref<128x32xf32, #tpu.memory_space<vmem>>, %arg4: memref<1x32xf32, #tpu.memory_space<vmem>>, %arg5: memref<48x32xf32, #tpu.memory_space<vmem>>, %arg6: memref<48x32xf32, #tpu.memory_space<vmem>>) attributes {dimension_semantics = [#tpu.dimension_semantics<parallel>, #tpu.dimension_semantics<parallel>], iteration_bounds = array<i64: 1, 1>, scalar_prefetch = 0 : i64, scratch_operands = 0 : i64, tpu.core_type = #tpu.core_type<tc>, window_params = [{transform_indices = @transform_0, window_bounds = array<i64: 48, 128>}, {transform_indices = @transform_1, window_bounds = array<i64: 128, 32>}, {transform_indices = @transform_2, window_bounds = array<i64: 1, 32>}, {transform_indices = @transform_3, window_bounds = array<i64: 48, 32>}, {transform_indices = @transform_4, window_bounds = array<i64: 48, 32>}]} {
    %c0 = arith.constant 0 : index
    %c0_0 = arith.constant 0 : index
    %0 = vector.load %arg2[%c0, %c0_0] : memref<48x128xbf16, #tpu.memory_space<vmem>>, vector<48x128xbf16>
    %c0_1 = arith.constant 0 : index
    %c0_2 = arith.constant 0 : index
    %1 = vector.load %arg3[%c0_1, %c0_2] : memref<128x32xf32, #tpu.memory_space<vmem>>, vector<128x32xf32>
    %2 = arith.truncf %1 : vector<128x32xf32> to vector<128x32xbf16>
    %cst = arith.constant dense<0.000000e+00> : vector<48x32xf32>
    %3 = tpu.matmul %0, %2, %cst {dimension_numbers = #tpu.dot_dimension_numbers<[1], [0], [0], [1], [0, 0, 1, 1], [], []>} : vector<48x128xbf16>, vector<128x32xbf16>, vector<48x32xf32> -> vector<48x32xf32>
    %c0_3 = arith.constant 0 : index
    %c0_4 = arith.constant 0 : index
    %4 = vector.load %arg4[%c0_3, %c0_4] : memref<1x32xf32, #tpu.memory_space<vmem>>, vector<1x32xf32>
    %5 = vector.broadcast %4 : vector<1x32xf32> to vector<48x32xf32>
    %6 = arith.addf %3, %5 : vector<48x32xf32>
    %c0_5 = arith.constant 0 : index
    %c0_6 = arith.constant 0 : index
    %7 = vector.load %arg5[%c0_5, %c0_6] : memref<48x32xf32, #tpu.memory_space<vmem>>, vector<48x32xf32>
    %8 = arith.addf %6, %7 : vector<48x32xf32>
    %c0_7 = arith.constant 0 : index
    %c0_8 = arith.constant 0 : index
    %9 = vector.load %arg6[%c0_7, %c0_8] : memref<48x32xf32, #tpu.memory_space<vmem>>, vector<48x32xf32>
    tpu.vector_store %arg6[%c0_7, %c0_8], %8 {strides = array<i32>} : memref<48x32xf32, #tpu.memory_space<vmem>>, vector<48x32xf32>,
    return
  }
  func.func @transform_0(%arg0: i32, %arg1: i32) -> (i32, i32) {
    %c0_i32 = arith.constant 0 : i32
    %c0_i32_0 = arith.constant 0 : i32
    return %arg0, %c0_i32 : i32, i32
  }
  func.func @transform_1(%arg0: i32, %arg1: i32) -> (i32, i32) {
    %c0_i32 = arith.constant 0 : i32
    %c0_i32_0 = arith.constant 0 : i32
    return %c0_i32, %arg1 : i32, i32
  }
  func.func @transform_2(%arg0: i32, %arg1: i32) -> (i32, i32) {
    %c0_i32 = arith.constant 0 : i32
    %c0_i32_0 = arith.constant 0 : i32
    return %c0_i32, %arg1 : i32, i32
  }
  func.func @transform_3(%arg0: i32, %arg1: i32) -> (i32, i32) {
    %c0_i32 = arith.constant 0 : i32
    return %arg0, %arg1 : i32, i32
  }
  func.func @transform_4(%arg0: i32, %arg1: i32) -> (i32, i32) {
    %c0_i32 = arith.constant 0 : i32
    return %arg0, %arg1 : i32, i32
  }
}

module attributes {stable_mosaic.version = 11 : i64} {
  func.func @_linear_kernel(%arg0: i32, %arg1: i32, %arg2: memref<48x32xbf16, #tpu.memory_space<vmem>>, %arg3: memref<32x32xf32, #tpu.memory_space<vmem>>, %arg4: memref<1x32xf32, #tpu.memory_space<vmem>>, %arg5: memref<48x32xbf16, #tpu.memory_space<vmem>>) attributes {dimension_semantics = [#tpu.dimension_semantics<parallel>, #tpu.dimension_semantics<parallel>], iteration_bounds = array<i64: 1, 1>, scalar_prefetch = 0 : i64, scratch_operands = 0 : i64, tpu.core_type = #tpu.core_type<tc>, window_params = [{transform_indices = @transform_0, window_bounds = array<i64: 48, 32>}, {transform_indices = @transform_1, window_bounds = array<i64: 32, 32>}, {transform_indices = @transform_2, window_bounds = array<i64: 1, 32>}, {transform_indices = @transform_3, window_bounds = array<i64: 48, 32>}]} {
    %c0 = arith.constant 0 : index
    %c0_0 = arith.constant 0 : index
    %0 = vector.load %arg2[%c0, %c0_0] : memref<48x32xbf16, #tpu.memory_space<vmem>>, vector<48x32xbf16>
    %c0_1 = arith.constant 0 : index
    %c0_2 = arith.constant 0 : index
    %1 = vector.load %arg3[%c0_1, %c0_2] : memref<32x32xf32, #tpu.memory_space<vmem>>, vector<32x32xf32>
    %2 = arith.truncf %1 : vector<32x32xf32> to vector<32x32xbf16>
    %cst = arith.constant dense<0.000000e+00> : vector<48x32xf32>
    %3 = tpu.matmul %0, %2, %cst {dimension_numbers = #tpu.dot_dimension_numbers<[1], [0], [0], [1], [0, 0, 1, 1], [], []>} : vector<48x32xbf16>, vector<32x32xbf16>, vector<48x32xf32> -> vector<48x32xf32>
    %c0_3 = arith.constant 0 : index
    %c0_4 = arith.constant 0 : index
    %4 = vector.load %arg4[%c0_3, %c0_4] : memref<1x32xf32, #tpu.memory_space<vmem>>, vector<1x32xf32>
    %5 = vector.broadcast %4 : vector<1x32xf32> to vector<48x32xf32>
    %6 = arith.addf %3, %5 : vector<48x32xf32>
    %7 = arith.truncf %6 : vector<48x32xf32> to vector<48x32xbf16>
    %c0_5 = arith.constant 0 : index
    %c0_6 = arith.constant 0 : index
    %8 = vector.load %arg5[%c0_5, %c0_6] : memref<48x32xbf16, #tpu.memory_space<vmem>>, vector<48x32xbf16>
    tpu.vector_store %arg5[%c0_5, %c0_6], %7 {strides = array<i32>} : memref<48x32xbf16, #tpu.memory_space<vmem>>, vector<48x32xbf16>,
    return
  }
  func.func @transform_0(%arg0: i32, %arg1: i32) -> (i32, i32) {
    %c0_i32 = arith.constant 0 : i32
    %c0_i32_0 = arith.constant 0 : i32
    return %arg0, %c0_i32 : i32, i32
  }
  func.func @transform_1(%arg0: i32, %arg1: i32) -> (i32, i32) {
    %c0_i32 = arith.constant 0 : i32
    %c0_i32_0 = arith.constant 0 : i32
    return %c0_i32, %arg1 : i32, i32
  }
  func.func @transform_2(%arg0: i32, %arg1: i32) -> (i32, i32) {
    %c0_i32 = arith.constant 0 : i32
    %c0_i32_0 = arith.constant 0 : i32
    return %c0_i32, %arg1 : i32, i32
  }
  func.func @transform_3(%arg0: i32, %arg1: i32) -> (i32, i32) {
    %c0_i32 = arith.constant 0 : i32
    return %arg0, %arg1 : i32, i32
  }
}

module attributes {stable_mosaic.version = 11 : i64} {
  func.func @_mha_kernel(%arg0: i32, %arg1: memref<1x8x32xbf16, #tpu.memory_space<vmem>>, %arg2: memref<1x17x32xbf16, #tpu.memory_space<vmem>>, %arg3: memref<1x17x32xbf16, #tpu.memory_space<vmem>>, %arg4: memref<1x8x32xbf16, #tpu.memory_space<vmem>>) attributes {dimension_semantics = [#tpu.dimension_semantics<parallel>], iteration_bounds = array<i64: 2>, scalar_prefetch = 0 : i64, scratch_operands = 0 : i64, tpu.core_type = #tpu.core_type<tc>, window_params = [{transform_indices = @transform_0, window_bounds = array<i64: 1, 8, 32>}, {transform_indices = @transform_1, window_bounds = array<i64: 1, 17, 32>}, {transform_indices = @transform_2, window_bounds = array<i64: 1, 17, 32>}, {transform_indices = @transform_3, window_bounds = array<i64: 1, 8, 32>}]} {
    %c0 = arith.constant 0 : index
    %c0_0 = arith.constant 0 : index
    %c0_1 = arith.constant 0 : index
    %0 = vector.load %arg1[%c0, %c0_0, %c0_1] : memref<1x8x32xbf16, #tpu.memory_space<vmem>>, vector<1x8x32xbf16>
    %1 = vector.shape_cast %0 : vector<1x8x32xbf16> to vector<8x32xbf16>
    %c0_2 = arith.constant 0 : index
    %c0_3 = arith.constant 0 : index
    %c0_4 = arith.constant 0 : index
    %2 = vector.load %arg2[%c0_2, %c0_3, %c0_4] : memref<1x17x32xbf16, #tpu.memory_space<vmem>>, vector<1x17x32xbf16>
    %3 = vector.shape_cast %2 : vector<1x17x32xbf16> to vector<17x32xbf16>
    %c0_5 = arith.constant 0 : index
    %c0_6 = arith.constant 0 : index
    %c0_7 = arith.constant 0 : index
    %4 = vector.load %arg3[%c0_5, %c0_6, %c0_7] : memref<1x17x32xbf16, #tpu.memory_space<vmem>>, vector<1x17x32xbf16>
    %5 = vector.shape_cast %4 : vector<1x17x32xbf16> to vector<17x32xbf16>
    %6 = vector.extract_strided_slice %1 {offsets = [0, 0], sizes = [8, 16], strides = [1, 1]} : vector<8x32xbf16> to vector<8x16xbf16>
    %7 = vector.extract_strided_slice %3 {offsets = [0, 0], sizes = [17, 16], strides = [1, 1]} : vector<17x32xbf16> to vector<17x16xbf16>
    %8 = vector.extract_strided_slice %5 {offsets = [0, 0], sizes = [17, 16], strides = [1, 1]} : vector<17x32xbf16> to vector<17x16xbf16>
    %cst = arith.constant dense<0.000000e+00> : vector<8x17xf32>
    %9 = tpu.matmul %6, %7, %cst {dimension_numbers = #tpu.dot_dimension_numbers<[1], [1], [0], [0], [0, 0, 1, 0], [], []>} : vector<8x16xbf16>, vector<17x16xbf16>, vector<8x17xf32> -> vector<8x17xf32>
    %cst_8 = arith.constant 2.500000e-01 : f32
    %10 = vector.broadcast %cst_8 : f32 to vector<8x17xf32>
    %11 = arith.mulf %9, %10 : vector<8x17xf32>
    %cst_9 = arith.constant dense<0xFF800000> : vector<8xf32>
    %12 = vector.multi_reduction <maximumf>, %11, %cst_9 [1] : vector<8x17xf32> to vector<8xf32>
    %13 = vector.shape_cast %12 : vector<8xf32> to vector<8x1xf32>
    %14 = vector.broadcast %13 : vector<8x1xf32> to vector<8x17xf32>
    %15 = arith.subf %11, %14 : vector<8x17xf32>
    %16 = math.exp %15 : vector<8x17xf32>
    %cst_10 = arith.constant dense<0.000000e+00> : vector<8xf32>
    %17 = vector.multi_reduction <add>, %16, %cst_10 [1] : vector<8x17xf32> to vector<8xf32>
    %18 = vector.shape_cast %17 : vector<8xf32> to vector<8x1xf32>
    %19 = tpu.reciprocal %18 {approx = true} : vector<8x1xf32> -> vector<8x1xf32>
    %20 = vector.broadcast %19 : vector<8x1xf32> to vector<8x17xf32>
    %21 = arith.mulf %16, %20 : vector<8x17xf32>
    %22 = arith.truncf %21 : vector<8x17xf32> to vector<8x17xbf16>
    %cst_11 = arith.constant dense<0.000000e+00> : vector<8x16xf32>
    %23 = tpu.matmul %22, %8, %cst_11 {dimension_numbers = #tpu.dot_dimension_numbers<[1], [0], [0], [1], [0, 0, 1, 1], [], []>} : vector<8x17xbf16>, vector<17x16xbf16>, vector<8x16xf32> -> vector<8x16xf32>
    %24 = arith.truncf %23 : vector<8x16xf32> to vector<8x16xbf16>
    %c0_12 = arith.constant 0 : index
    %c0_13 = arith.constant 0 : index
    %c0_14 = arith.constant 0 : index
    %25 = vector.load %arg4[%c0_12, %c0_13, %c0_14] : memref<1x8x32xbf16, #tpu.memory_space<vmem>>, vector<1x8x16xbf16>
    %26 = vector.shape_cast %25 : vector<1x8x16xbf16> to vector<8x16xbf16>
    %27 = vector.shape_cast %24 : vector<8x16xbf16> to vector<1x8x16xbf16>
    tpu.vector_store %arg4[%c0_12, %c0_13, %c0_14], %27 {strides = array<i32>} : memref<1x8x32xbf16, #tpu.memory_space<vmem>>, vector<1x8x16xbf16>,
    %28 = vector.extract_strided_slice %1 {offsets = [0, 16], sizes = [8, 16], strides = [1, 1]} : vector<8x32xbf16> to vector<8x16xbf16>
    %29 = vector.extract_strided_slice %3 {offsets = [0, 16], sizes = [17, 16], strides = [1, 1]} : vector<17x32xbf16> to vector<17x16xbf16>
    %30 = vector.extract_strided_slice %5 {offsets = [0, 16], sizes = [17, 16], strides = [1, 1]} : vector<17x32xbf16> to vector<17x16xbf16>
    %cst_15 = arith.constant dense<0.000000e+00> : vector<8x17xf32>
    %31 = tpu.matmul %28, %29, %cst_15 {dimension_numbers = #tpu.dot_dimension_numbers<[1], [1], [0], [0], [0, 0, 1, 0], [], []>} : vector<8x16xbf16>, vector<17x16xbf16>, vector<8x17xf32> -> vector<8x17xf32>
    %cst_16 = arith.constant 2.500000e-01 : f32
    %32 = vector.broadcast %cst_16 : f32 to vector<8x17xf32>
    %33 = arith.mulf %31, %32 : vector<8x17xf32>
    %cst_17 = arith.constant dense<0xFF800000> : vector<8xf32>
    %34 = vector.multi_reduction <maximumf>, %33, %cst_17 [1] : vector<8x17xf32> to vector<8xf32>
    %35 = vector.shape_cast %34 : vector<8xf32> to vector<8x1xf32>
    %36 = vector.broadcast %35 : vector<8x1xf32> to vector<8x17xf32>
    %37 = arith.subf %33, %36 : vector<8x17xf32>
    %38 = math.exp %37 : vector<8x17xf32>
    %cst_18 = arith.constant dense<0.000000e+00> : vector<8xf32>
    %39 = vector.multi_reduction <add>, %38, %cst_18 [1] : vector<8x17xf32> to vector<8xf32>
    %40 = vector.shape_cast %39 : vector<8xf32> to vector<8x1xf32>
    %41 = tpu.reciprocal %40 {approx = true} : vector<8x1xf32> -> vector<8x1xf32>
    %42 = vector.broadcast %41 : vector<8x1xf32> to vector<8x17xf32>
    %43 = arith.mulf %38, %42 : vector<8x17xf32>
    %44 = arith.truncf %43 : vector<8x17xf32> to vector<8x17xbf16>
    %cst_19 = arith.constant dense<0.000000e+00> : vector<8x16xf32>
    %45 = tpu.matmul %44, %30, %cst_19 {dimension_numbers = #tpu.dot_dimension_numbers<[1], [0], [0], [1], [0, 0, 1, 1], [], []>} : vector<8x17xbf16>, vector<17x16xbf16>, vector<8x16xf32> -> vector<8x16xf32>
    %46 = arith.truncf %45 : vector<8x16xf32> to vector<8x16xbf16>
    %c0_20 = arith.constant 0 : index
    %c0_21 = arith.constant 0 : index
    %c16 = arith.constant 16 : index
    %47 = vector.load %arg4[%c0_20, %c0_21, %c16] : memref<1x8x32xbf16, #tpu.memory_space<vmem>>, vector<1x8x16xbf16>
    %48 = vector.shape_cast %47 : vector<1x8x16xbf16> to vector<8x16xbf16>
    %49 = vector.shape_cast %46 : vector<8x16xbf16> to vector<1x8x16xbf16>
    tpu.vector_store %arg4[%c0_20, %c0_21, %c16], %49 {strides = array<i32>} : memref<1x8x32xbf16, #tpu.memory_space<vmem>>, vector<1x8x16xbf16>,
    return
  }
  func.func @transform_0(%arg0: i32) -> (i32, i32, i32) {
    %c0_i32 = arith.constant 0 : i32
    %c0_i32_0 = arith.constant 0 : i32
    %c0_i32_1 = arith.constant 0 : i32
    return %arg0, %c0_i32, %c0_i32_0 : i32, i32, i32
  }
  func.func @transform_1(%arg0: i32) -> (i32, i32, i32) {
    %c0_i32 = arith.constant 0 : i32
    %c0_i32_0 = arith.constant 0 : i32
    %c0_i32_1 = arith.constant 0 : i32
    return %arg0, %c0_i32, %c0_i32_0 : i32, i32, i32
  }
  func.func @transform_2(%arg0: i32) -> (i32, i32, i32) {
    %c0_i32 = arith.constant 0 : i32
    %c0_i32_0 = arith.constant 0 : i32
    %c0_i32_1 = arith.constant 0 : i32
    return %arg0, %c0_i32, %c0_i32_0 : i32, i32, i32
  }
  func.func @transform_3(%arg0: i32) -> (i32, i32, i32) {
    %c0_i32 = arith.constant 0 : i32
    %c0_i32_0 = arith.constant 0 : i32
    %c0_i32_1 = arith.constant 0 : i32
    return %arg0, %c0_i32, %c0_i32_0 : i32, i32, i32
  }
}

</mosaic_0001>

<bundles_post_ra>
// kernel: albef_forward.81
= control target key start
LH: loop header
LB: loop body
LE: loop exit
PB: predicated region body
PF: predicated region fallthrough
CT: control target
= control target key end

     0   :  { %vm16_vm0 = vcmask 261120   ;;  %v95_v4 = vmov 32.0   ;;  %s140_s0 = inlined_call_operand.vmem [shape: f32[16,32], index: 0, kind: input, shape index: {}]   ;;  %s141_s1 = inlined_call_operand.vmem [shape: f32[1,32], index: 1, kind: input, shape index: {}]   ;;  %s142_s2 = inlined_call_operand.vmem [shape: f32[1,32], index: 2, kind: input, shape index: {}]   ;;  %s143_s3 = inlined_call_operand.vmem [shape: f32[16,32], index: 3, kind: output, shape index: {}]  }
   0x1   :  { %v14_v0 = vld [vmem:[%s140_s0] sm:$0xff]  ;;  %v15_v2 = vld [vmem:[%s140_s0 + $0x8] sm:$0xff]  ;;  %89 = vrcp.f32 %v95_v4 }
   0x2   :  { %v17_v1 = vsel %vm16_vm0, %v14_v0, 0.0  ;;  %v20_v3 = vsel %vm16_vm0, %v15_v2, 0.0  ;;  %v87_v35 = vld [vmem:[%s141_s1] ss:$0 sm:$0xff] }
   0x3   :  { %18 = vadd.xlane.f32.xlu0 %v17_v1  ;;  %v88_v38 = vld [vmem:[%s142_s2] ss:$0 sm:$0xff] }
   0x7   :  { %v90_v5 = vpop.eup %89 }
   0x8   :  { %v24_v6 = vmul.f32 32.0, %v90_v5  ;;  %vm28_vm1 = vweird.f32 %v90_v5 }
   0xa   :  { %v25_v7 = vsub.f32 1.0, %v24_v6 }
   0xb   :  { %21 = vadd.xlane.f32.xlu0 %v20_v3 }
   0xc   :  { %v26_v8 = vmul.f32 %v90_v5, %v25_v7 }
   0xe   :  { %v27_v9 = vadd.f32 %v90_v5, %v26_v8 }
  0x10   :  { %v29_v10 = vsel %vm28_vm1, %v90_v5, %v27_v9 }
  0x76   :  { %v19_v11 = vpop.xlane.xlu0 %18 }
  0x77   :  { %v30_v12 = vmul.f32 %v29_v10, %v19_v11 }
  0x79   :  { %v32_v13 = vsub.f32 %v14_v0, %v30_v12 }
  0x7b   :  { %v34_v14 = vmul.f32 %v32_v13, %v32_v13 }
  0x7d   :  { %v36_v15 = vsel %vm16_vm0, %v34_v14, 0.0 }
  0x7e   :  { %37 = vadd.xlane.f32.xlu1 %v36_v15  ;;  %v22_v16 = vpop.xlane.xlu0 %21 }
  0x7f   :  { %v31_v17 = vmul.f32 %v29_v10, %v22_v16 }
  0x81   :  { %v33_v18 = vsub.f32 %v15_v2, %v31_v17 }
  0x83   :  { %v35_v19 = vmul.f32 %v33_v18, %v33_v18 }
  0x85   :  { %v39_v20 = vsel %vm16_vm0, %v35_v19, 0.0 }
  0x86   :  { %40 = vadd.xlane.f32.xlu1 %v39_v20 }
  0xf1   :  { %v38_v21 = vpop.xlane.xlu1 %37 }
  0xf2   :  { %v42_v22 = vmul.f32 %v38_v21, %v29_v10 }
  0xf4   :  { %v44_v23 = vadd.f32 1e-12, %v42_v22 }
  0xf6   :  { %91 = vrsqrt.f32 %v44_v23  ;;  %vm52_vm3 = vweird.f32 %v44_v23 }
  0xf9   :  { %v41_v24 = vpop.xlane.xlu1 %40 }
  0xfa   :  { %v43_v25 = vmul.f32 %v41_v24, %v29_v10 }
  0xfc   :  { %v92_v26 = vpop.eup %91  ;;  %v45_v27 = vadd.f32 1e-12, %v43_v25 }
  0xfd   :  { %v47_v28 = vmul.f32 %v92_v26, %v44_v23  ;;  %vm53_vm2 = vweird.f32 %v92_v26 }
  0xfe   :  { %93 = vrsqrt.f32 %v45_v27  ;;  %vm54_vm4 = vmor %vm52_vm3, %vm53_vm2  ;;  %vm62_vm6 = vweird.f32 %v45_v27 }
  0xff   :  { %v48_v29 = vmul.f32 %v92_v26, %v47_v28 }
 0x101   :  { %v49_v30 = vmul.f32 0.5, %v48_v29 }
 0x103   :  { %v50_v31 = vsub.f32 1.5, %v49_v30 }
 0x104   :  { %v94_v32 = vpop.eup %93 }
 0x105   :  { %v51_v33 = vmul.f32 %v92_v26, %v50_v31  ;;  %v57_v34 = vmul.f32 %v94_v32, %v45_v27  ;;  %vm63_vm5 = vweird.f32 %v94_v32 }
 0x106   :  { %vm64_vm7 = vmor %vm62_vm6, %vm63_vm5 }
 0x107   :  { %v55_v36 = vsel %vm54_vm4, %v92_v26, %v51_v33  ;;  %v58_v37 = vmul.f32 %v94_v32, %v57_v34 }
 0x108   :  { %v66_v39 = vmul.f32 %v55_v36, %v32_v13 }
 0x109   :  { %v59_v40 = vmul.f32 0.5, %v58_v37 }
 0x10a   :  { %v72_v41 = vmul.f32 %v87_v35, %v66_v39 }
 0x10b   :  { %v60_v42 = vsub.f32 1.5, %v59_v40 }
 0x10c   :  { %v78_v43 = vadd.f32 %v88_v38, %v72_v41 }
 0x10d   :  { %v61_v44 = vmul.f32 %v94_v32, %v60_v42 }
 0x10e   :  { %80 = vst.msk [vmem:[%s143_s3] sm:$0xff] %vm16_vm0, %v78_v43 }
 0x10f   :  { %v65_v45 = vsel %vm64_vm7, %v94_v32, %v61_v44 }
 0x110   :  { %v67_v46 = vmul.f32 %v65_v45, %v33_v18 }
 0x112   :  { %v73_v47 = vmul.f32 %v87_v35, %v67_v46 }
 0x114   :  { %v79_v48 = vadd.f32 %v88_v38, %v73_v47 }
 0x116   :  { %81 = vst.msk [vmem:[%s143_s3 + $0x8] sm:$0xff] %vm16_vm0, %v79_v48 }

// kernel: albef_forward.84
= control target key start
LH: loop header
LB: loop body
LE: loop exit
PB: predicated region body
PF: predicated region fallthrough
CT: control target
= control target key end

     0   :  { %vm28_vm0 = vcmask 261120   ;;  %vm48_vm1 = vcmask 257024   ;;  %s104_s1 = inlined_call_operand.vmem [shape: f32[32,32], index: 1, kind: input, shape index: {}]   ;;  %s105_s0 = inlined_call_operand.vmem [shape: f32[16,32], index: 0, kind: input, shape index: {}]   ;;  %s106_s2 = inlined_call_operand.vmem [shape: f32[1,32], index: 2, kind: input, shape index: {}]   ;;  %s107_s3 = inlined_call_operand.vmem [shape: bf16[16,32], index: 3, kind: output, shape index: {}]  }
   0x1   :  { %v20_v0 = vld [vmem:[%s104_s1 + $0x10] sm:$0xff]  ;;  %v21_v1 = vld [vmem:[%s104_s1 + $0x18] sm:$0xff]  ;;  %v18_v2 = vld [vmem:[%s104_s1] sm:$0xff] }
   0x2   :  { %v23_v3 = vpack.c.bf16 %v21_v1, %v20_v0  ;;  %v19_v4 = vld [vmem:[%s104_s1 + $0x8] sm:$0xff]  ;;  %v15_v6 = vld [vmem:[%s105_s0] sm:$0xff] }
   0x3   :  { %v22_v5 = vpack.c.bf16 %v19_v4, %v18_v2  ;;  %v16_v7 = vld [vmem:[%s105_s0 + $0x8] sm:$0xff]  ;;  %v56_v9 = vld [vmem:[%s106_s2] ss:$0 sm:$0xff] }
   0x4   :  { %38 = vmatpush.bf16.msra.mxu0 %v23_v3  ;;  %v17_v8 = vpack.c.bf16 %v16_v7, %v15_v6 }
   0x8   :  { %39 = vmatpush.bf16.msra.mxu0 %v22_v5 }
   0xb   :  { %55 = vmatmul.msk.bf16.vlgmr.msra.gmra.mxu0 %vm28_vm0, %v17_v8 }
  0x88   :  { %v41_v10 = vpop.f32.mrf.mxu0 }
  0x89   :  { %v42_v11 = vadd.f32 %v56_v9, %v41_v10 }
  0x8b   :  { %v46_v12 = vpack.c.bf16 %v42_v11, %v42_v11 }
  0x8d   :  { %49 = vst.msk [vmem:[%s107_s3] sm:$0xf] %vm48_vm1, %v46_v12 }
  0x90   :  { %v43_v13 = vpop.f32.mrf.mxu0 }
  0x91   :  { %v44_v14 = vadd.f32 %v56_v9, %v43_v13 }
  0x93   :  { %v47_v15 = vpack.c.bf16 %v44_v14, %v44_v14 }
  0x95   :  { %50 = vst.msk [vmem:[%s107_s3 + $0x4] sm:$0xf] %vm48_vm1, %v47_v15 }

// kernel: albef_forward.86
= control target key start
LH: loop header
LB: loop body
LE: loop exit
PB: predicated region body
PF: predicated region fallthrough
CT: control target
= control target key end

     0   :  { %vm32_vm0 = vcmask 261120   ;;  %vm52_vm1 = vcmask 257024   ;;  %s110_s1 = inlined_call_operand.vmem [shape: f32[32,32], index: 1, kind: input, shape index: {}]   ;;  %s111_s2 = inlined_call_operand.vmem [shape: f32[1,32], index: 2, kind: input, shape index: {}]   ;;  %s112_s0 = inlined_call_operand.vmem [shape: bf16[16,32], index: 0, kind: input, shape index: {}]   ;;  %s113_s3 = inlined_call_operand.vmem [shape: bf16[16,32], index: 3, kind: output, shape index: {}]  }
   0x1   :  { %v19_v0 = vld [vmem:[%s110_s1 + $0x10] sm:$0xff]  ;;  %v20_v1 = vld [vmem:[%s110_s1 + $0x18] sm:$0xff]  ;;  %v17_v2 = vld [vmem:[%s110_s1] sm:$0xff] }
   0x2   :  { %v22_v3 = vpack.c.bf16 %v20_v1, %v19_v0  ;;  %v18_v4 = vld [vmem:[%s110_s1 + $0x8] sm:$0xff]  ;;  %v64_v6 = vld [vmem:[%s112_s0] sm:$0xff] }
   0x3   :  { %v21_v5 = vpack.c.bf16 %v18_v4, %v17_v2  ;;  %v65_v7 = vld [vmem:[%s111_s2] ss:$0 sm:$0xff] }
   0x4   :  { %42 = vmatpush.bf16.msra.mxu0 %v22_v3 }
   0x8   :  { %43 = vmatpush.bf16.msra.mxu0 %v21_v5 }
   0xb   :  { %63 = vmatmul.msk.bf16.vlgmr.msra.gmra.mxu0 %vm32_vm0, %v64_v6 }
  0x88   :  { %v45_v8 = vpop.f32.mrf.mxu0 }
  0x89   :  { %v46_v9 = vadd.f32 %v65_v7, %v45_v8 }
  0x8b   :  { %v50_v10 = vpack.c.bf16 %v46_v9, %v46_v9 }
  0x8d   :  { %53 = vst.msk [vmem:[%s113_s3] sm:$0xf] %vm52_vm1, %v50_v10 }
  0x90   :  { %v47_v11 = vpop.f32.mrf.mxu0 }
  0x91   :  { %v48_v12 = vadd.f32 %v65_v7, %v47_v11 }
  0x93   :  { %v51_v13 = vpack.c.bf16 %v48_v12, %v48_v12 }
  0x95   :  { %54 = vst.msk [vmem:[%s113_s3 + $0x4] sm:$0xf] %vm52_vm1, %v51_v13 }

// kernel: albef_forward.85
= control target key start
LH: loop header
LB: loop body
LE: loop exit
PB: predicated region body
PF: predicated region fallthrough
CT: control target
= control target key end

     0   :  { %s537_s15 = smov 0   ;;  %s578_s0 = inlined_call_operand.vmem [shape: bf16[2,8,32], index: 0, kind: input, shape index: {}]   ;;  %s579_s1 = inlined_call_operand.vmem [shape: bf16[2,8,32], index: 1, kind: input, shape index: {}]   ;;  %s580_s2 = inlined_call_operand.vmem [shape: bf16[2,8,32], index: 2, kind: input, shape index: {}]   ;;  %s581_s3 = inlined_call_operand.vmem [shape: f32[2,1,8], index: 3, kind: input, shape index: {}]   ;;  %s582_s4 = inlined_call_operand.vmem [shape: bf16[2,8,32], index: 4, kind: output, shape index: {}]  }
   0x1 LB: > { %s469_s16 = sadd.s32 4294967295, %s508_s15   ;;  %p473_p0 = scmp.ge.s32.totalorder %s508_s15, 1  ;;  %s508_s15 = sphi %s537_s15, %s14_s15  }
   0x2   : > { %p187_p1 = scmp.lt.s32.totalorder %s508_s15, 3 }
   0x4   : > { %p188_p2 = pnand %p473_p0, %p187_p1 }
   0x5   : > { %p222_p3 = scmp.lt.s32.totalorder (!%p188_p2), %s469_s16, 1  ;;  %s510_s24 = smov (!%p188_p2), 112  }
   0x6   : > { %191 = sbr.rel (%p188_p2) target bundleno = 785 (0x311), region = 36  ;;  %s511_s8 = smov (!%p188_p2), 16  }
   0xb   : > { %s584_s16 = smov (!%p222_p3, %s469_s16), 1  ;;  %vm248_vm0 = vcmask 130048   ;;  %vm273_vm1 = vcmask 64512   ;;  %vm289_vm2 = vcmask 1043456   ;;  %vm307_vm3 = vcmask 125952  }
   0xc   : > { %s545_s17 = sshll.u32 %s584_s16, 2  ;;  %s236_s27 = scalar_lea.vmem %s581_s3, %s584_s16  ;;  %vm381_vm4 = vcmask 257152  }
   0xd   : > { %s229_s20 = scalar_lea.vmem %s579_s1, %s545_s17  ;;  %s225_s23 = scalar_lea.vmem %s578_s0, %s545_s17  ;;  %v242_v12 = vld [vmem:[%s236_s27] sm:$0x1] }
   0xe   : > { %v246_v0 = vld [vmem:[%s229_s20] sm:$0xf]  ;;  %v243_v13 = vsub.f32 1.0, %v242_v12  ;;  %s233_s30 = scalar_lea.vmem %s580_s2, %s545_s17  ;;  %s240_s7 = scalar_lea.vmem %s582_s4, %s545_s17 }
   0xf   : > { %v315_v1 = vunpack.c.l.b16 %v246_v0  ;;  %v245_v2 = vld [vmem:[%s225_s23] sm:$0xf]  ;;  %v253_v6 = vsel %vm248_vm0, %v246_v0, 0 }
  0x10   : > { %v310_v4 = vunpack.c.l.b16 %v245_v2  ;;  %262 = vmatpush.bf16.xpose.msra.mxu0 %v253_v6  ;;  %v244_v14 = vmul.f32 -10000.0, %v243_v13  ;;  %v247_v34 = vld [vmem:[%s233_s30] sm:$0xf] }
  0x11   : > { %v316_v3 = vpack.c.b16 %v315_v1, %v315_v1  ;;  %v353_v35 = vunpack.c.l.b16 %v247_v34  ;;  %v291_v37 = vsel %vm289_vm2, %v247_v34, 0 }
  0x12   : > { %v311_v5 = vpack.c.b16 %v310_v4, %v310_v4  ;;  %v270_v15 = vperm.slane %v244_v14, 0  ;;  %300 = vmatpush.bf16.msra.mxu1 %v291_v37 }
  0x13   : > { %317 = vrot.lane.b32.xlu0 %v316_v3, %s510_s24  ;;  %v354_v36 = vpack.c.b16 %v353_v35, %v353_v35 }
  0x17   : > { %478 = vmatmul.msk.bf16.vlgmr.msra.gmra.mxu0 %vm248_vm0, %v245_v2 }
  0x1b   : > { %312 = vrot.lane.b32.xlu0 %v311_v5, %s510_s24 }
  0x85   : > { %v318_v7 = vpop.permute.xlu0 %317 }
  0x86   : > { %v323_v8 = vsel %vm248_vm0, %v318_v7, 0 }
  0x87   : > { %332 = vmatpush.bf16.xpose.msra.mxu2 %v323_v8 }
  0x8d   : > { %v313_v9 = vpop.permute.xlu0 %312 }
  0x8e   : > { %480 = vmatmul.msk.bf16.vlgmr.msra.gmra.mxu2 %vm248_vm0, %v313_v9 }
  0x94   : > { %v264_v10 = vpop.f32.mrf.mxu0 }
  0x95   : > { %v268_v19 = vmul.f32 0.25, %v264_v10 }
  0x97   : > { %v272_v21 = vadd.f32 %v270_v15, %v268_v19 }
  0x99   : > { %v274_v23 = vsel %vm273_vm1, %v272_v21, -inf }
  0x9c   : > { %v266_v11 = vpop.f32.mrf.mxu0 }
 0x111   : > { %v334_v16 = vpop.f32.mrf.mxu2 }
 0x112   : > { %v338_v17 = vmul.f32 0.25, %v334_v16 }
 0x114   : > { %v339_v18 = vadd.f32 %v338_v17, %v270_v15 }
 0x116   : > { %v340_v20 = vsel %vm273_vm1, %v339_v18, -inf }
 0x117   : > { %341 = vmax.xlane.f32.xlu1 %v340_v20 }
 0x119   : > { %v336_v22 = vpop.f32.mrf.mxu2 }
 0x11f   : > { %275 = vmax.xlane.f32.xlu1 %v274_v23 }
 0x18a   : > { %v342_v24 = vpop.xlane.xlu1 %341 }
 0x18b   : > { %v343_v25 = vsub.f32 %v339_v18, %v342_v24 }
 0x18d   : > { %v344_v26 = vmul.f32 1.442695, %v343_v25 }
 0x18f   : > { %494 = vpow2.f32 %v344_v26 }
 0x192   : > { %v276_v27 = vpop.xlane.xlu1 %275 }
 0x193   : > { %v277_v28 = vsub.f32 %v272_v21, %v276_v27 }
 0x195   : > { %v495_v29 = vpop.eup %494  ;;  %v278_v30 = vmul.f32 1.442695, %v277_v28 }
 0x196   : > { %v346_v31 = vsel %vm273_vm1, %v495_v29, 0.0 }
 0x197   : > { %496 = vpow2.f32 %v278_v30  ;;  %347 = vadd.xlane.f32.xlu2 %v346_v31 }
 0x19d   : > { %v497_v32 = vpop.eup %496 }
 0x19e   : > { %v280_v33 = vsel %vm273_vm1, %v497_v32, 0.0 }
 0x19f   : > { %281 = vadd.xlane.f32.xlu0 %v280_v33 }
 0x1af   : > { %355 = vrot.lane.b32.xlu2 %v354_v36, %s510_s24 }
 0x20a   : > { %v348_v38 = vpop.xlane.xlu2 %347 }
 0x20b   : > { %498 = vrcp.f32 %v348_v38 }
 0x211   : > { %v499_v39 = vpop.eup %498 }
 0x212   : > { %v356_v40 = vpop.permute.xlu2 %355  ;;  %v282_v41 = vpop.xlane.xlu0 %281  ;;  %v350_v42 = vmul.f32 %v499_v39, %v495_v29 }
 0x213   : > { %500 = vrcp.f32 %v282_v41  ;;  %v361_v43 = vsel %vm289_vm2, %v356_v40, 0 }
 0x214   : > { %370 = vmatpush.bf16.msra.mxu3 %v361_v43  ;;  %v351_v44 = vpack.c.bf16 %v350_v42, %v350_v42 }
 0x217   : > { %481 = vmatmul.msk.bf16.vlgmr.msra.gmra.mxu3 %vm273_vm1, %v351_v44 }
 0x219   : > { %v501_v45 = vpop.eup %500 }
 0x21a   : > { %v284_v46 = vmul.f32 %v501_v45, %v497_v32 }
 0x21c   : > { %v285_v47 = vpack.c.bf16 %v284_v46, %v284_v46 }
 0x21e   : > { %479 = vmatmul.msk.bf16.vlgmr.msra.gmra.mxu1 %vm273_vm1, %v285_v47 }
 0x29a   : > { %v372_v48 = vpop.f32.mrf.mxu3 }
 0x29b   : > { %v376_v49 = vpack.c.bf16 %v372_v48, %v372_v48  ;;  %v302_v50 = vpop.f32.mrf.mxu1 }
 0x29c   : > { %v306_v51 = vpack.c.bf16 %v302_v50, %v302_v50 }
 0x29d   : > { %378 = vrot.lane.b32.xlu1 %v376_v49, %s511_s8 }
 0x29e   : > { %308 = vst.msk [vmem:[%s240_s7] sm:$0xf] %vm307_vm3, %v306_v51 }
 0x2a2   : > { %v374_v52 = vpop.f32.mrf.mxu3 }
 0x2a3   : > { %v304_v53 = vpop.f32.mrf.mxu1 }
 0x30f   : > { %v379_v54 = vpop.permute.xlu1 %378 }
 0x310   : > { %382 = vst.msk [vmem:[%s240_s7] sm:$0xf] %vm381_vm4, %v379_v54 }
 0x311 PF: > { %s14_s15 = sadd.s32 1, %s508_s15  }
 0x312   : > { %p11_p4 = scmp.ge.s32.totalorder %s14_s15, 4  }
 0x314   :  { %13 = sbr.rel (!%p11_p4) target bundleno = 1 (0x1), region = 75 }

// kernel: albef_forward.87
= control target key start
LH: loop header
LB: loop body
LE: loop exit
PB: predicated region body
PF: predicated region fallthrough
CT: control target
= control target key end

     0   :  { %vm25_vm0 = vcmask 261120   ;;  %v108_v9 = vmov 32.0   ;;  %s161_s0 = inlined_call_operand.vmem [shape: bf16[16,32], index: 0, kind: input, shape index: {}]   ;;  %s162_s1 = inlined_call_operand.vmem [shape: f32[16,32], index: 1, kind: input, shape index: {}]   ;;  %s163_s2 = inlined_call_operand.vmem [shape: f32[1,32], index: 2, kind: input, shape index: {}]   ;;  %s164_s3 = inlined_call_operand.vmem [shape: f32[1,32], index: 3, kind: input, shape index: {}]   ;;  %s165_s4 = inlined_call_operand.vmem [shape: f32[16,32], index: 4, kind: output, shape index: {}]  }
   0x1   :  { %v96_v0 = vld [vmem:[%s161_s0] sm:$0xff]   ;;  %v22_v5 = vld [vmem:[%s162_s1 + $0x8] sm:$0xff]  ;;  %102 = vrcp.f32 %v108_v9 }
   0x2   :  { %v21_v1 = vld [vmem:[%s162_s1] sm:$0xff]  ;;  %v97_v2 = vunpack.c.l.bf16 %v96_v0  ;;  %v98_v4 = vunpack.c.h.bf16 %v96_v0 }
   0x3   :  { %v100_v40 = vld [vmem:[%s163_s2] ss:$0 sm:$0xff] }
   0x4   :  { %v23_v3 = vadd.f32 %v97_v2, %v21_v1  ;;  %v24_v7 = vadd.f32 %v98_v4, %v22_v5  ;;  %v101_v43 = vld [vmem:[%s164_s3] ss:$0 sm:$0xff] }
   0x6   :  { %v26_v6 = vsel %vm25_vm0, %v23_v3, 0.0  ;;  %v29_v8 = vsel %vm25_vm0, %v24_v7, 0.0 }
   0x7   :  { %27 = vadd.xlane.f32.xlu0 %v26_v6  ;;  %v103_v10 = vpop.eup %102 }
   0x8   :  { %v33_v11 = vmul.f32 32.0, %v103_v10  ;;  %vm37_vm1 = vweird.f32 %v103_v10 }
   0xa   :  { %v34_v12 = vsub.f32 1.0, %v33_v11 }
   0xc   :  { %v35_v13 = vmul.f32 %v103_v10, %v34_v12 }
   0xe   :  { %v36_v14 = vadd.f32 %v103_v10, %v35_v13 }
   0xf   :  { %30 = vadd.xlane.f32.xlu0 %v29_v8 }
  0x10   :  { %v38_v15 = vsel %vm37_vm1, %v103_v10, %v36_v14 }
  0x7a   :  { %v28_v16 = vpop.xlane.xlu0 %27 }
  0x7b   :  { %v39_v17 = vmul.f32 %v38_v15, %v28_v16 }
  0x7d   :  { %v41_v18 = vsub.f32 %v23_v3, %v39_v17 }
  0x7f   :  { %v43_v19 = vmul.f32 %v41_v18, %v41_v18 }
  0x81   :  { %v45_v20 = vsel %vm25_vm0, %v43_v19, 0.0 }
  0x82   :  { %46 = vadd.xlane.f32.xlu1 %v45_v20  ;;  %v31_v21 = vpop.xlane.xlu0 %30 }
  0x83   :  { %v40_v22 = vmul.f32 %v38_v15, %v31_v21 }
  0x85   :  { %v42_v23 = vsub.f32 %v24_v7, %v40_v22 }
  0x87   :  { %v44_v24 = vmul.f32 %v42_v23, %v42_v23 }
  0x89   :  { %v48_v25 = vsel %vm25_vm0, %v44_v24, 0.0 }
  0x8a   :  { %49 = vadd.xlane.f32.xlu1 %v48_v25 }
  0xf5   :  { %v47_v26 = vpop.xlane.xlu1 %46 }
  0xf6   :  { %v51_v27 = vmul.f32 %v47_v26, %v38_v15 }
  0xf8   :  { %v53_v28 = vadd.f32 1e-12, %v51_v27 }
  0xfa   :  { %104 = vrsqrt.f32 %v53_v28  ;;  %vm61_vm3 = vweird.f32 %v53_v28 }
  0xfd   :  { %v50_v29 = vpop.xlane.xlu1 %49 }
  0xfe   :  { %v52_v30 = vmul.f32 %v50_v29, %v38_v15 }
 0x100   :  { %v105_v31 = vpop.eup %104  ;;  %v54_v32 = vadd.f32 1e-12, %v52_v30 }
 0x101   :  { %v56_v33 = vmul.f32 %v105_v31, %v53_v28  ;;  %vm62_vm2 = vweird.f32 %v105_v31 }
 0x102   :  { %106 = vrsqrt.f32 %v54_v32  ;;  %vm63_vm4 = vmor %vm61_vm3, %vm62_vm2  ;;  %vm71_vm6 = vweird.f32 %v54_v32 }
 0x103   :  { %v57_v34 = vmul.f32 %v105_v31, %v56_v33 }
 0x105   :  { %v58_v35 = vmul.f32 0.5, %v57_v34 }
 0x107   :  { %v59_v36 = vsub.f32 1.5, %v58_v35 }
 0x108   :  { %v107_v37 = vpop.eup %106 }
 0x109   :  { %v60_v38 = vmul.f32 %v105_v31, %v59_v36  ;;  %v66_v39 = vmul.f32 %v107_v37, %v54_v32  ;;  %vm72_vm5 = vweird.f32 %v107_v37 }
 0x10a   :  { %vm73_vm7 = vmor %vm71_vm6, %vm72_vm5 }
 0x10b   :  { %v64_v41 = vsel %vm63_vm4, %v105_v31, %v60_v38  ;;  %v67_v42 = vmul.f32 %v107_v37, %v66_v39 }
 0x10c   :  { %v75_v44 = vmul.f32 %v64_v41, %v41_v18 }
 0x10d   :  { %v68_v45 = vmul.f32 0.5, %v67_v42 }
 0x10e   :  { %v81_v46 = vmul.f32 %v100_v40, %v75_v44 }
 0x10f   :  { %v69_v47 = vsub.f32 1.5, %v68_v45 }
 0x110   :  { %v87_v48 = vadd.f32 %v101_v43, %v81_v46 }
 0x111   :  { %v70_v49 = vmul.f32 %v107_v37, %v69_v47 }
 0x112   :  { %89 = vst.msk [vmem:[%s165_s4] sm:$0xff] %vm25_vm0, %v87_v48 }
 0x113   :  { %v74_v50 = vsel %vm73_vm7, %v107_v37, %v70_v49 }
 0x114   :  { %v76_v51 = vmul.f32 %v74_v50, %v42_v23 }
 0x116   :  { %v82_v52 = vmul.f32 %v100_v40, %v76_v51 }
 0x118   :  { %v88_v53 = vadd.f32 %v101_v43, %v82_v52 }
 0x11a   :  { %90 = vst.msk [vmem:[%s165_s4 + $0x8] sm:$0xff] %vm25_vm0, %v88_v53 }

// kernel: albef_forward.89
= control target key start
LH: loop header
LB: loop body
LE: loop exit
PB: predicated region body
PF: predicated region fallthrough
CT: control target
= control target key end

     0   :  { %vm66_vm0 = vcmask 257024   ;;  %s159_s1 = inlined_call_operand.vmem [shape: f32[128,32], index: 1, kind: input, shape index: {}]   ;;  %s160_s2 = inlined_call_operand.vmem [shape: f32[1,32], index: 2, kind: input, shape index: {}]   ;;  %s161_s0 = inlined_call_operand.vmem [shape: bf16[16,128], index: 0, kind: input, shape index: {}]   ;;  %s162_s3 = inlined_call_operand.vmem [shape: bf16[16,32], index: 3, kind: output, shape index: {}]  }
   0x1   :  { %v30_v0 = vld [vmem:[%s159_s1 + $0x70] sm:$0xff]  ;;  %v31_v1 = vld [vmem:[%s159_s1 + $0x78] sm:$0xff]  ;;  %v28_v2 = vld [vmem:[%s159_s1 + $0x60] sm:$0xff] }
   0x2   :  { %v39_v3 = vpack.c.bf16 %v31_v1, %v30_v0  ;;  %v29_v4 = vld [vmem:[%s159_s1 + $0x68] sm:$0xff]  ;;  %v26_v6 = vld [vmem:[%s159_s1 + $0x50] sm:$0xff]  ;;  %v27_v7 = vld [vmem:[%s159_s1 + $0x58] sm:$0xff] }
   0x3   :  { %v38_v5 = vpack.c.bf16 %v29_v4, %v28_v2  ;;  %v37_v8 = vpack.c.bf16 %v27_v7, %v26_v6  ;;  %v24_v9 = vld [vmem:[%s159_s1 + $0x40] sm:$0xff]  ;;  %v25_v10 = vld [vmem:[%s159_s1 + $0x48] sm:$0xff]  ;;  %v22_v12 = vld [vmem:[%s159_s1 + $0x30] sm:$0xff] }
   0x4   :  { %50 = vmatpush.bf16.msra.mxu0 %v39_v3  ;;  %v36_v11 = vpack.c.bf16 %v25_v10, %v24_v9  ;;  %v23_v13 = vld [vmem:[%s159_s1 + $0x38] sm:$0xff]  ;;  %v20_v15 = vld [vmem:[%s159_s1 + $0x20] sm:$0xff]  ;;  %v21_v16 = vld [vmem:[%s159_s1 + $0x28] sm:$0xff] }
   0x5   :  { %v35_v14 = vpack.c.bf16 %v23_v13, %v22_v12  ;;  %v34_v17 = vpack.c.bf16 %v21_v16, %v20_v15  ;;  %v18_v18 = vld [vmem:[%s159_s1 + $0x10] sm:$0xff]  ;;  %v19_v19 = vld [vmem:[%s159_s1 + $0x18] sm:$0xff]  ;;  %v16_v21 = vld [vmem:[%s159_s1] sm:$0xff] }
   0x6   :  { %v33_v20 = vpack.c.bf16 %v19_v19, %v18_v18  ;;  %v17_v22 = vld [vmem:[%s159_s1 + $0x8] sm:$0xff]  ;;  %v77_v24 = vld [vmem:[%s161_s0] sm:$0xff] }
   0x7   :  { %v32_v23 = vpack.c.bf16 %v17_v22, %v16_v21  ;;  %v78_v25 = vld [vmem:[%s160_s2] ss:$0 sm:$0xff] }
   0x8   :  { %51 = vmatpush.bf16.msra.mxu0 %v38_v5 }
   0xc   :  { %52 = vmatpush.bf16.msra.mxu0 %v37_v8 }
  0x10   :  { %53 = vmatpush.bf16.msra.mxu0 %v36_v11 }
  0x14   :  { %54 = vmatpush.bf16.msra.mxu0 %v35_v14 }
  0x18   :  { %55 = vmatpush.bf16.msra.mxu0 %v34_v17 }
  0x1c   :  { %56 = vmatpush.bf16.msra.mxu0 %v33_v20 }
  0x20   :  { %57 = vmatpush.bf16.msra.mxu0 %v32_v23 }
  0x23   :  { %58 = vmatmul.bf16.vlgmr.msra.gmra.mxu0 %v77_v24 }
  0xa0   :  { %v59_v26 = vpop.f32.mrf.mxu0 }
  0xa1   :  { %v60_v27 = vadd.f32 %v78_v25, %v59_v26 }
  0xa3   :  { %v64_v28 = vpack.c.bf16 %v60_v27, %v60_v27 }
  0xa5   :  { %67 = vst.msk [vmem:[%s162_s3] sm:$0xf] %vm66_vm0, %v64_v28 }
  0xa8   :  { %v61_v29 = vpop.f32.mrf.mxu0 }
  0xa9   :  { %v62_v30 = vadd.f32 %v78_v25, %v61_v29 }
  0xab   :  { %v65_v31 = vpack.c.bf16 %v62_v30, %v62_v30 }
  0xad   :  { %68 = vst.msk [vmem:[%s162_s3 + $0x4] sm:$0xf] %vm66_vm0, %v65_v31 }

// kernel: albef_forward.88
= control target key start
LH: loop header
LB: loop body
LE: loop exit
PB: predicated region body
PF: predicated region fallthrough
CT: control target
= control target key end

     0   :  { %vm28_vm0 = vcmask 261120   ;;  %s127_s1 = inlined_call_operand.vmem [shape: f32[32,128], index: 1, kind: input, shape index: {}]   ;;  %s128_s0 = inlined_call_operand.vmem [shape: f32[16,32], index: 0, kind: input, shape index: {}]   ;;  %s129_s2 = inlined_call_operand.vmem [shape: f32[1,128], index: 2, kind: input, shape index: {}]   ;;  %s130_s3 = inlined_call_operand.vmem [shape: bf16[16,128], index: 3, kind: output, shape index: {}]  }
   0x1   :  { %v20_v0 = vld [vmem:[%s127_s1 + $0x10] sm:$0xff]  ;;  %v21_v1 = vld [vmem:[%s127_s1 + $0x18] sm:$0xff]  ;;  %v18_v2 = vld [vmem:[%s127_s1] sm:$0xff] }
   0x2   :  { %v23_v3 = vpack.c.bf16 %v21_v1, %v20_v0  ;;  %v19_v4 = vld [vmem:[%s127_s1 + $0x8] sm:$0xff]  ;;  %v15_v6 = vld [vmem:[%s128_s0] sm:$0xff] }
   0x3   :  { %v22_v5 = vpack.c.bf16 %v19_v4, %v18_v2  ;;  %v16_v7 = vld [vmem:[%s128_s0 + $0x8] sm:$0xff]  ;;  %v78_v9 = vld [vmem:[%s129_s2] ss:$0 sm:$0xff] }
   0x4   :  { %38 = vmatpush.bf16.msra.mxu0 %v23_v3  ;;  %v17_v8 = vpack.c.bf16 %v16_v7, %v15_v6 }
   0x8   :  { %39 = vmatpush.bf16.msra.mxu0 %v22_v5 }
   0xb   :  { %72 = vmatmul.msk.bf16.vlgmr.msra.gmra.mxu0 %vm28_vm0, %v17_v8 }
  0x88   :  { %v41_v10 = vpop.f32.mrf.mxu0 }
  0x89   :  { %v42_v11 = vadd.f32 %v78_v9, %v41_v10 }
  0x8b   :  { %v46_v12 = vmul.f32 %v42_v11, %v42_v11 }
  0x8d   :  { %v48_v13 = vmul.f32 %v46_v12, %v42_v11 }
  0x8f   :  { %v50_v14 = vmul.f32 0.044715, %v48_v13 }
  0x90   :  { %v43_v15 = vpop.f32.mrf.mxu0 }
  0x91   :  { %v52_v16 = vadd.f32 %v50_v14, %v42_v11  ;;  %v44_v17 = vadd.f32 %v78_v9, %v43_v15 }
  0x93   :  { %v54_v18 = vmul.f32 0.7978846, %v52_v16  ;;  %v47_v19 = vmul.f32 %v44_v17, %v44_v17 }
  0x95   :  { %v49_v20 = vmul.f32 %v47_v19, %v44_v17  ;;  %79 = vtanh.f32 %v54_v18 }
  0x97   :  { %v51_v21 = vmul.f32 0.044715, %v49_v20 }
  0x99   :  { %v53_v22 = vadd.f32 %v51_v21, %v44_v17 }
  0x9b   :  { %v55_v23 = vmul.f32 0.7978846, %v53_v22  ;;  %v80_v24 = vpop.eup %79 }
  0x9c   :  { %v58_v25 = vadd.f32 1.0, %v80_v24 }
  0x9d   :  { %81 = vtanh.f32 %v55_v23 }
  0x9e   :  { %v60_v27 = vmul.f32 0.5, %v58_v25 }
  0xa0   :  { %v62_v30 = vmul.f32 %v60_v27, %v42_v11 }
  0xa3   :  { %v82_v26 = vpop.eup %81 }
  0xa4   :  { %v59_v28 = vadd.f32 1.0, %v82_v26 }
  0xa6   :  { %v61_v29 = vmul.f32 0.5, %v59_v28 }
  0xa8   :  { %v63_v31 = vmul.f32 %v61_v29, %v44_v17 }
  0xaa   :  { %v76_v32 = vpack.c.bf16 %v63_v31, %v62_v30 }
  0xac   :  { %77 = vst [vmem:[%s130_s3] sm:$0xff] %v76_v32  }

// kernel: albef_forward.65
= control target key start
LH: loop header
LB: loop body
LE: loop exit
PB: predicated region body
PF: predicated region fallthrough
CT: control target
= control target key end

     0   :  { %vm34_vm0 = vcmask 392192   ;;  %vm60_vm1 = vcmask 261120   ;;  %s140_s1 = inlined_call_operand.vmem [shape: f32[48,32], index: 1, kind: input, shape index: {}]   ;;  %s141_s2 = inlined_call_operand.vmem [shape: f32[1,32], index: 2, kind: input, shape index: {}]   ;;  %s142_s0 = inlined_call_operand.vmem [shape: f32[32,48], index: 0, kind: input, shape index: {}]   ;;  %s143_s3 = inlined_call_operand.vmem [shape: f32[32,32], index: 3, kind: output, shape index: {}]  }
   0x1   :  { %v25_v0 = vld [vmem:[%s140_s1 + $0x20] sm:$0xff]  ;;  %v26_v1 = vld [vmem:[%s140_s1 + $0x28] sm:$0xff]  ;;  %v23_v2 = vld [vmem:[%s140_s1 + $0x10] sm:$0xff] }
   0x2   :  { %v29_v3 = vpack.c.bf16 %v26_v1, %v25_v0  ;;  %v24_v4 = vld [vmem:[%s140_s1 + $0x18] sm:$0xff]  ;;  %v21_v6 = vld [vmem:[%s140_s1] sm:$0xff]  ;;  %v22_v7 = vld [vmem:[%s140_s1 + $0x8] sm:$0xff] }
   0x3   :  { %v28_v5 = vpack.c.bf16 %v24_v4, %v23_v2  ;;  %v15_v8 = vld [vmem:[%s142_s0] sm:$0xff]  ;;  %v27_v9 = vpack.c.bf16 %v22_v7, %v21_v6  ;;  %v16_v10 = vld [vmem:[%s142_s0 + $0x8] sm:$0xff]  ;;  %v17_v11 = vld [vmem:[%s142_s0 + $0x10] sm:$0xff] }
   0x4   :  { %46 = vmatpush.bf16.msra.mxu0 %v29_v3  ;;  %71 = vmatpush.bf16.msra.mxu1 %v29_v3  ;;  %v18_v12 = vld [vmem:[%s142_s0 + $0x18] sm:$0xff]  ;;  %v19_v13 = vpack.c.bf16 %v16_v10, %v15_v8  ;;  %v74_v15 = vld [vmem:[%s141_s2] ss:$0 sm:$0xff] }
   0x5   :  { %v20_v14 = vpack.c.bf16 %v18_v12, %v17_v11 }
   0x8   :  { %47 = vmatpush.bf16.msra.mxu0 %v28_v5  ;;  %72 = vmatpush.bf16.msra.mxu1 %v28_v5 }
   0xc   :  { %48 = vmatpush.bf16.msra.mxu0 %v27_v9  ;;  %73 = vmatpush.bf16.msra.mxu1 %v27_v9 }
   0xf   :  { %69 = vmatmul.msk.bf16.vlgmr.msra.gmra.mxu0 %vm34_vm0, %v19_v13  ;;  %70 = vmatmul.msk.bf16.vlgmr.msra.gmra.mxu1 %vm34_vm0, %v20_v14 }
  0x8c   :  { %v50_v16 = vpop.f32.mrf.mxu0  ;;  %v55_v17 = vpop.f32.mrf.mxu1 }
  0x8d   :  { %v51_v18 = vadd.f32 %v74_v15, %v50_v16  ;;  %v56_v19 = vadd.f32 %v74_v15, %v55_v17 }
  0x8f   :  { %61 = vst.msk [vmem:[%s143_s3] sm:$0xff] %vm60_vm1, %v51_v18 }
  0x90   :  { %63 = vst.msk [vmem:[%s143_s3 + $0x10] sm:$0xff] %vm60_vm1, %v56_v19 }
  0x94   :  { %v52_v20 = vpop.f32.mrf.mxu0  ;;  %v57_v21 = vpop.f32.mrf.mxu1 }
  0x95   :  { %v53_v22 = vadd.f32 %v74_v15, %v52_v20  ;;  %v58_v23 = vadd.f32 %v74_v15, %v57_v21 }
  0x97   :  { %62 = vst.msk [vmem:[%s143_s3 + $0x8] sm:$0xff] %vm60_vm1, %v53_v22 }
  0x98   :  { %64 = vst.msk [vmem:[%s143_s3 + $0x18] sm:$0xff] %vm60_vm1, %v58_v23 }

// kernel: albef_forward.67
= control target key start
LH: loop header
LB: loop body
LE: loop exit
PB: predicated region body
PF: predicated region fallthrough
CT: control target
= control target key end

     0   :  { %vm46_vm0 = vcmask 261120   ;;  %vm86_vm1 = vcmask 781312   ;;  %s188_s1 = inlined_call_operand.vmem [shape: f32[32,96], index: 1, kind: input, shape index: {}]   ;;  %s189_s2 = inlined_call_operand.vmem [shape: f32[1,96], index: 2, kind: input, shape index: {}]   ;;  %s190_s0 = inlined_call_operand.vmem [shape: bf16[48,32], index: 0, kind: input, shape index: {}]   ;;  %s191_s3 = inlined_call_operand.vmem [shape: bf16[48,96], index: 3, kind: output, shape index: {}]  }
   0x1   :  { %v23_v0 = vld [vmem:[%s188_s1 + $0x10] sm:$0xff]  ;;  %v24_v1 = vld [vmem:[%s188_s1 + $0x18] sm:$0xff]  ;;  %v21_v2 = vld [vmem:[%s188_s1] sm:$0xff] }
   0x2   :  { %v26_v3 = vpack.c.bf16 %v24_v1, %v23_v0  ;;  %v22_v4 = vld [vmem:[%s188_s1 + $0x8] sm:$0xff]  ;;  %v112_v6 = vld [vmem:[%s190_s0] sm:$0xff]  ;;  %v114_v8 = vld [vmem:[%s190_s0 + $0x10] sm:$0xff] }
   0x3   :  { %v25_v5 = vpack.c.bf16 %v22_v4, %v21_v2  ;;  %v113_v7 = vld [vmem:[%s190_s0 + $0x8] sm:$0xff]  ;;  %v119_v9 = vld [vmem:[%s189_s2] ss:$0 sm:$0xff] }
   0x4   :  { %62 = vmatpush.bf16.msra.mxu0 %v26_v3  ;;  %115 = vmatpush.bf16.msra.mxu1 %v26_v3 }
   0x5   :  { %116 = vmatpush.bf16.msra.mxu2 %v26_v3 }
   0x8   :  { %63 = vmatpush.bf16.msra.mxu0 %v25_v5  ;;  %117 = vmatpush.bf16.msra.mxu1 %v25_v5 }
   0x9   :  { %118 = vmatpush.bf16.msra.mxu2 %v25_v5 }
   0xb   :  { %109 = vmatmul.msk.bf16.vlgmr.msra.gmra.mxu0 %vm46_vm0, %v112_v6  ;;  %110 = vmatmul.msk.bf16.vlgmr.msra.gmra.mxu1 %vm46_vm0, %v113_v7 }
   0xc   :  { %111 = vmatmul.msk.bf16.vlgmr.msra.gmra.mxu2 %vm46_vm0, %v114_v8 }
  0x88   :  { %v65_v10 = vpop.f32.mrf.mxu0  ;;  %v70_v11 = vpop.f32.mrf.mxu1 }
  0x89   :  { %v66_v12 = vadd.f32 %v119_v9, %v65_v10  ;;  %v71_v13 = vadd.f32 %v119_v9, %v70_v11 }
  0x8b   :  { %v80_v14 = vpack.c.bf16 %v66_v12, %v66_v12  ;;  %v82_v15 = vpack.c.bf16 %v71_v13, %v71_v13 }
  0x8d   :  { %87 = vst.msk [vmem:[%s191_s3] sm:$0xf] %vm86_vm1, %v80_v14 }
  0x8e   :  { %89 = vst.msk [vmem:[%s191_s3 + $0x8] sm:$0xf] %vm86_vm1, %v82_v15 }
  0x8f   :  { %v75_v16 = vpop.f32.mrf.mxu2 }
  0x90   :  { %v76_v17 = vadd.f32 %v119_v9, %v75_v16  ;;  %v67_v18 = vpop.f32.mrf.mxu0  ;;  %v72_v19 = vpop.f32.mrf.mxu1 }
  0x91   :  { %v68_v20 = vadd.f32 %v119_v9, %v67_v18  ;;  %v73_v21 = vadd.f32 %v119_v9, %v72_v19 }
  0x92   :  { %v84_v22 = vpack.c.bf16 %v76_v17, %v76_v17 }
  0x93   :  { %v81_v23 = vpack.c.bf16 %v68_v20, %v68_v20  ;;  %v83_v24 = vpack.c.bf16 %v73_v21, %v73_v21 }
  0x94   :  { %91 = vst.msk [vmem:[%s191_s3 + $0x10] sm:$0xf] %vm86_vm1, %v84_v22 }
  0x95   :  { %88 = vst.msk [vmem:[%s191_s3 + $0x4] sm:$0xf] %vm86_vm1, %v81_v23 }
  0x96   :  { %90 = vst.msk [vmem:[%s191_s3 + $0xc] sm:$0xf] %vm86_vm1, %v83_v24 }
  0x97   :  { %v77_v25 = vpop.f32.mrf.mxu2 }
  0x98   :  { %v78_v26 = vadd.f32 %v119_v9, %v77_v25 }
  0x9a   :  { %v85_v27 = vpack.c.bf16 %v78_v26, %v78_v26 }
  0x9c   :  { %92 = vst.msk [vmem:[%s191_s3 + $0x14] sm:$0xf] %vm86_vm1, %v85_v27 }

// kernel: albef_forward.66
= control target key start
LH: loop header
LB: loop body
LE: loop exit
PB: predicated region body
PF: predicated region fallthrough
CT: control target
= control target key end

     0   :  { %vm20_vm0 = vcmask 261120   ;;  %v214_v12 = vmov 32.0   ;;  %vm186_vm8 = vcmask 257024   ;;  %s373_s0 = inlined_call_operand.vmem [shape: f32[48,32], index: 0, kind: input, shape index: {}]   ;;  %s374_s1 = inlined_call_operand.vmem [shape: f32[1,32], index: 1, kind: input, shape index: {}]   ;;  %s375_s2 = inlined_call_operand.vmem [shape: f32[1,32], index: 2, kind: input, shape index: {}]   ;;  %s376_s3 = inlined_call_operand.vmem [shape: bf16[48,32], index: 3, kind: output, shape index: {}]  }
   0x1   :  { %v18_v0 = vld [vmem:[%s373_s0 + $0x20] sm:$0xff]  ;;  %v16_v1 = vld [vmem:[%s373_s0 + $0x10] sm:$0xff]  ;;  %v19_v6 = vld [vmem:[%s373_s0 + $0x28] sm:$0xff]  ;;  %200 = vrcp.f32 %v214_v12 }
   0x2   :  { %v14_v2 = vld [vmem:[%s373_s0] sm:$0xff]  ;;  %v33_v3 = vsel %vm20_vm0, %v18_v0, 0.0  ;;  %v27_v4 = vsel %vm20_vm0, %v16_v1, 0.0  ;;  %v17_v7 = vld [vmem:[%s373_s0 + $0x18] sm:$0xff]  ;;  %v15_v8 = vld [vmem:[%s373_s0 + $0x8] sm:$0xff]  ;;  %v36_v9 = vsel %vm20_vm0, %v19_v6, 0.0 }
   0x3   :  { %v21_v5 = vsel %vm20_vm0, %v14_v2, 0.0  ;;  %34 = vadd.xlane.f32.xlu2 %v33_v3  ;;  %28 = vadd.xlane.f32.xlu1 %v27_v4  ;;  %v30_v10 = vsel %vm20_vm0, %v17_v7, 0.0  ;;  %v24_v11 = vsel %vm20_vm0, %v15_v8, 0.0 }
   0x4   :  { %22 = vadd.xlane.f32.xlu0 %v21_v5 }
   0x7   :  { %v201_v13 = vpop.eup %200 }
   0x8   :  { %v40_v14 = vmul.f32 32.0, %v201_v13  ;;  %vm44_vm1 = vweird.f32 %v201_v13 }
   0xa   :  { %v41_v15 = vsub.f32 1.0, %v40_v14 }
   0xb   :  { %37 = vadd.xlane.f32.xlu2 %v36_v9  ;;  %31 = vadd.xlane.f32.xlu1 %v30_v10 }
   0xc   :  { %25 = vadd.xlane.f32.xlu0 %v24_v11  ;;  %v42_v16 = vmul.f32 %v201_v13, %v41_v15 }
   0xe   :  { %v43_v17 = vadd.f32 %v201_v13, %v42_v16 }
  0x10   :  { %v259_v18 = vsel %vm44_vm1, %v201_v13, %v43_v17 }
  0x76   :  { %v35_v19 = vpop.xlane.xlu2 %34  ;;  %v29_v20 = vpop.xlane.xlu1 %28 }
  0x77   :  { %v48_v21 = vmul.f32 %v259_v18, %v29_v20  ;;  %v23_v22 = vpop.xlane.xlu0 %22  ;;  %v50_v38 = vmul.f32 %v259_v18, %v35_v19  ;;  %v314_v19 = vld [vmem:[%s374_s1] ss:$0 sm:$0xff] }
  0x78   :  { %v46_v23 = vmul.f32 %v259_v18, %v23_v22 }
  0x79   :  { %v263_v24 = vsub.f32 %v16_v1, %v48_v21  ;;  %v291_v45 = vsub.f32 %v18_v0, %v50_v38 }
  0x7a   :  { %v265_v25 = vsub.f32 %v14_v2, %v46_v23 }
  0x7b   :  { %v60_v26 = vmul.f32 %v263_v24, %v263_v24  ;;  %v62_v47 = vmul.f32 %v291_v45, %v291_v45 }
  0x7c   :  { %v58_v27 = vmul.f32 %v265_v25, %v265_v25 }
  0x7d   :  { %v70_v28 = vsel %vm20_vm0, %v60_v26, 0.0  ;;  %v76_v48 = vsel %vm20_vm0, %v62_v47, 0.0  ;;  %v321_v26 = vld [vmem:[%s375_s2] ss:$0 sm:$0xff] }
  0x7e   :  { %v38_v29 = vpop.xlane.xlu2 %37  ;;  %71 = vadd.xlane.f32.xlu2 %v70_v28  ;;  %v32_v30 = vpop.xlane.xlu1 %31  ;;  %v64_v31 = vsel %vm20_vm0, %v58_v27, 0.0 }
  0x7f   :  { %v51_v32 = vmul.f32 %v259_v18, %v38_v29  ;;  %v49_v33 = vmul.f32 %v259_v18, %v32_v30  ;;  %65 = vadd.xlane.f32.xlu0 %v64_v31  ;;  %v26_v34 = vpop.xlane.xlu0 %25 }
  0x80   :  { %v47_v35 = vmul.f32 %v259_v18, %v26_v34 }
  0x81   :  { %v276_v36 = vsub.f32 %v19_v6, %v51_v32  ;;  %v278_v37 = vsub.f32 %v17_v7, %v49_v33 }
  0x82   :  { %v281_v39 = vsub.f32 %v15_v8, %v47_v35 }
  0x83   :  { %v63_v40 = vmul.f32 %v276_v36, %v276_v36  ;;  %v61_v41 = vmul.f32 %v278_v37, %v278_v37 }
  0x84   :  { %v59_v42 = vmul.f32 %v281_v39, %v281_v39 }
  0x85   :  { %v79_v43 = vsel %vm20_vm0, %v63_v40, 0.0  ;;  %v73_v44 = vsel %vm20_vm0, %v61_v41, 0.0 }
  0x86   :  { %80 = vadd.xlane.f32.xlu2 %v79_v43  ;;  %v67_v46 = vsel %vm20_vm0, %v59_v42, 0.0 }
  0x87   :  { %74 = vadd.xlane.f32.xlu0 %v73_v44  ;;  %68 = vadd.xlane.f32.xlu1 %v67_v46 }
  0x8f   :  { %77 = vadd.xlane.f32.xlu1 %v76_v48 }
  0xf1   :  { %v72_v49 = vpop.xlane.xlu2 %71 }
  0xf2   :  { %v84_v50 = vmul.f32 %v72_v49, %v259_v18  ;;  %v66_v51 = vpop.xlane.xlu0 %65 }
  0xf3   :  { %v82_v52 = vmul.f32 %v66_v51, %v259_v18 }
  0xf4   :  { %v90_v53 = vadd.f32 1e-06, %v84_v50 }
  0xf5   :  { %v88_v54 = vadd.f32 1e-06, %v82_v52 }
  0xf6   :  { %202 = vrsqrt.f32 %v90_v53  ;;  %vm120_vm2 = vweird.f32 %v90_v53 }
  0xf7   :  { %204 = vrsqrt.f32 %v88_v54  ;;  %vm100_vm6 = vweird.f32 %v88_v54 }
  0xf9   :  { %v81_v55 = vpop.xlane.xlu2 %80 }
  0xfa   :  { %v87_v56 = vmul.f32 %v81_v55, %v259_v18  ;;  %v69_v57 = vpop.xlane.xlu1 %68  ;;  %v75_v58 = vpop.xlane.xlu0 %74 }
  0xfb   :  { %v83_v59 = vmul.f32 %v69_v57, %v259_v18  ;;  %v85_v60 = vmul.f32 %v75_v58, %v259_v18 }
  0xfc   :  { %v203_v61 = vpop.eup %202  ;;  %v93_v62 = vadd.f32 1e-06, %v87_v56 }
  0xfd   :  { %v205_v63 = vpop.eup %204  ;;  %v115_v0 = vmul.f32 %v203_v61, %v90_v53  ;;  %v302_v1 = vadd.f32 1e-06, %v83_v59  ;;  %v304_v2 = vadd.f32 1e-06, %v85_v60  ;;  %vm121_vm3 = vweird.f32 %v203_v61 }
  0xfe   :  { %v95_v3 = vmul.f32 %v205_v63, %v88_v54  ;;  %206 = vrsqrt.f32 %v93_v62  ;;  %vm101_vm4 = vweird.f32 %v205_v63  ;;  %vm122_vm5 = vmor %vm120_vm2, %vm121_vm3  ;;  %vm150_vm9 = vweird.f32 %v93_v62 }
  0xff   :  { %v116_v4 = vmul.f32 %v203_v61, %v115_v0  ;;  %208 = vrsqrt.f32 %v302_v1  ;;  %vm102_vm7 = vmor %vm100_vm6, %vm101_vm4  ;;  %vm130_vm12 = vweird.f32 %v304_v2  ;;  %vm110_vm15 = vweird.f32 %v302_v1 }
 0x100   :  { %v96_v5 = vmul.f32 %v205_v63, %v95_v3  ;;  %210 = vrsqrt.f32 %v304_v2 }
 0x101   :  { %v117_v6 = vmul.f32 0.5, %v116_v4 }
 0x102   :  { %v97_v7 = vmul.f32 0.5, %v96_v5  ;;  %v78_v8 = vpop.xlane.xlu1 %77 }
 0x103   :  { %v118_v9 = vsub.f32 1.5, %v117_v6  ;;  %v86_v10 = vmul.f32 %v78_v8, %v259_v18 }
 0x104   :  { %v207_v11 = vpop.eup %206  ;;  %v98_v12 = vsub.f32 1.5, %v97_v7 }
 0x105   :  { %v209_v13 = vpop.eup %208  ;;  %v119_v14 = vmul.f32 %v203_v61, %v118_v9  ;;  %v145_v15 = vmul.f32 %v207_v11, %v93_v62  ;;  %v309_v16 = vadd.f32 1e-06, %v86_v10  ;;  %vm151_vm10 = vweird.f32 %v207_v11 }
 0x106   :  { %v211_v17 = vpop.eup %210  ;;  %v99_v20 = vmul.f32 %v205_v63, %v98_v12  ;;  %v105_v21 = vmul.f32 %v209_v13, %v302_v1  ;;  %vm111_vm11 = vweird.f32 %v209_v13  ;;  %vm152_vm14 = vmor %vm150_vm9, %vm151_vm10 }
 0x107   :  { %v123_v18 = vsel %vm122_vm5, %v203_v61, %v119_v14  ;;  %v146_v22 = vmul.f32 %v207_v11, %v145_v15  ;;  %v125_v23 = vmul.f32 %v211_v17, %v304_v2  ;;  %212 = vrsqrt.f32 %v309_v16  ;;  %vm112_vm0 = vmor %vm110_vm15, %vm111_vm11 }
 0x108   :  { %v156_v27 = vmul.f32 %v123_v18, %v263_v24  ;;  %v103_v28 = vsel %vm102_vm7, %v205_v63, %v99_v20  ;;  %v106_v29 = vmul.f32 %v209_v13, %v105_v21  ;;  %vm131_vm13 = vweird.f32 %v211_v17 }
 0x109   :  { %v154_v30 = vmul.f32 %v103_v28, %v265_v25  ;;  %v147_v31 = vmul.f32 0.5, %v146_v22  ;;  %v126_v32 = vmul.f32 %v211_v17, %v125_v23  ;;  %vm132_vm1 = vmor %vm130_vm12, %vm131_vm13  ;;  %vm140_vm3 = vweird.f32 %v309_v16 }
 0x10a   :  { %v166_v33 = vmul.f32 %v314_v19, %v156_v27  ;;  %v107_v34 = vmul.f32 0.5, %v106_v29 }
 0x10b   :  { %v164_v35 = vmul.f32 %v314_v19, %v154_v30  ;;  %v148_v38 = vsub.f32 1.5, %v147_v31  ;;  %v127_v40 = vmul.f32 0.5, %v126_v32 }
 0x10c   :  { %v176_v24 = vadd.f32 %v321_v26, %v166_v33  ;;  %v108_v41 = vsub.f32 1.5, %v107_v34 }
 0x10d   :  { %v174_v25 = vadd.f32 %v321_v26, %v164_v35  ;;  %v149_v42 = vmul.f32 %v207_v11, %v148_v38  ;;  %v128_v43 = vsub.f32 1.5, %v127_v40  ;;  %v213_v44 = vpop.eup %212 }
 0x10e   :  { %v182_v46 = vpack.c.bf16 %v176_v24, %v176_v24  ;;  %v109_v47 = vmul.f32 %v209_v13, %v108_v41  ;;  %v135_v51 = vmul.f32 %v213_v44, %v309_v16  ;;  %vm141_vm2 = vweird.f32 %v213_v44 }
 0x10f   :  { %v180_v48 = vpack.c.bf16 %v174_v25, %v174_v25  ;;  %v153_v49 = vsel %vm152_vm14, %v207_v11, %v149_v42  ;;  %v129_v50 = vmul.f32 %v211_v17, %v128_v43  ;;  %vm142_vm4 = vmor %vm140_vm3, %vm141_vm2 }
 0x110   :  { %189 = vst.msk [vmem:[%s376_s3 + $0x8] sm:$0xf] %vm186_vm8, %v182_v46  ;;  %v159_v52 = vmul.f32 %v153_v49, %v276_v36  ;;  %v113_v53 = vsel %vm112_vm0, %v209_v13, %v109_v47  ;;  %v136_v56 = vmul.f32 %v213_v44, %v135_v51 }
 0x111   :  { %187 = vst.msk [vmem:[%s376_s3] sm:$0xf] %vm186_vm8, %v180_v48  ;;  %v155_v54 = vmul.f32 %v113_v53, %v281_v39  ;;  %v133_v55 = vsel %vm132_vm1, %v211_v17, %v129_v50 }
 0x112   :  { %v169_v57 = vmul.f32 %v314_v19, %v159_v52  ;;  %v157_v58 = vmul.f32 %v133_v55, %v278_v37  ;;  %v137_v36 = vmul.f32 0.5, %v136_v56 }
 0x113   :  { %v165_v59 = vmul.f32 %v314_v19, %v155_v54 }
 0x114   :  { %v179_v60 = vadd.f32 %v321_v26, %v169_v57  ;;  %v167_v61 = vmul.f32 %v314_v19, %v157_v58  ;;  %v138_v63 = vsub.f32 1.5, %v137_v36 }
 0x115   :  { %v175_v62 = vadd.f32 %v321_v26, %v165_v59 }
 0x116   :  { %v185_v0 = vpack.c.bf16 %v179_v60, %v179_v60  ;;  %v177_v39 = vadd.f32 %v321_v26, %v167_v61  ;;  %v139_v2 = vmul.f32 %v213_v44, %v138_v63 }
 0x117   :  { %v181_v1 = vpack.c.bf16 %v175_v62, %v175_v62 }
 0x118   :  { %192 = vst.msk [vmem:[%s376_s3 + $0x14] sm:$0xf] %vm186_vm8, %v185_v0  ;;  %v183_v37 = vpack.c.bf16 %v177_v39, %v177_v39  ;;  %v143_v3 = vsel %vm142_vm4, %v213_v44, %v139_v2 }
 0x119   :  { %188 = vst.msk [vmem:[%s376_s3 + $0x4] sm:$0xf] %vm186_vm8, %v181_v1  ;;  %v158_v4 = vmul.f32 %v143_v3, %v291_v45 }
 0x11a   :  { %190 = vst.msk [vmem:[%s376_s3 + $0xc] sm:$0xf] %vm186_vm8, %v183_v37 }
 0x11b   :  { %v168_v5 = vmul.f32 %v314_v19, %v158_v4 }
 0x11d   :  { %v178_v6 = vadd.f32 %v321_v26, %v168_v5 }
 0x11f   :  { %v184_v7 = vpack.c.bf16 %v178_v6, %v178_v6 }
 0x121   :  { %191 = vst.msk [vmem:[%s376_s3 + $0x10] sm:$0xf] %vm186_vm8, %v184_v7 }

// kernel: albef_forward.68
= control target key start
LH: loop header
LB: loop body
LE: loop exit
PB: predicated region body
PF: predicated region fallthrough
CT: control target
= control target key end

     0   :  { %s524_s6 = smov 0   ;;  %s584_s0 = inlined_call_operand.vmem [shape: bf16[2,17,96], index: 0, kind: input, shape index: {}]   ;;  %s585_s1 = inlined_call_operand.vmem [shape: bf16[2,17,32], index: 1, kind: output, shape index: {}]  }
   0x1 LB: > { %s437_s7 = sadd.s32 4294967295, %s505_s6   ;;  %p441_p0 = scmp.ge.s32.totalorder %s505_s6, 1  ;;  %s505_s6 = sphi %s524_s6, %s11_s6  }
   0x2   : > { %p87_p1 = scmp.lt.s32.totalorder %s505_s6, 3 }
   0x4   : > { %p88_p2 = pnand %p441_p0, %p87_p1 }
   0x5   : > { %p107_p3 = scmp.lt.s32.totalorder (!%p88_p2), %s437_s7, 1  ;;  %s507_s12 = smov (!%p88_p2), 112  }
   0x6   : > { %91 = sbr.rel (%p88_p2) target bundleno = 816 (0x330), region = 24  ;;  %s508_s13 = smov (!%p88_p2), 96  }
   0x7   : > { %s509_s14 = smov (!%p88_p2), 80   ;;  %s510_s15 = smov (!%p88_p2), 48  }
   0x8   : > { %s511_s16 = smov (!%p88_p2), 64   ;;  %s513_s17 = smov (!%p88_p2), 16  }
   0xb   : > { %s587_s7 = smov (!%p107_p3, %s437_s7), 1  ;;  %vm133_vm0 = vcmask 130048   ;;  %vm167_vm1 = vcmask 138240   ;;  %vm174_vm2 = vcmask 131072   ;;  %vm215_vm3 = vcmask 1040384  }
   0xc   : > { %s459_s8 = smul.u32 12, %s587_s7  ;;  %vm242_vm4 = vcmask 125952   ;;  %vm245_vm5 = vcmask 122880   ;;  %vm246_vm6 = vsmask.f32 256  ;;  %vm374_vm8 = vcmask 257152  }
   0xd   : > { %vm247_vm7 = vmand %vm245_vm5, %vm246_vm6  ;;  %vm377_vm9 = vcmask 254080  }
   0xe   : > { %s111_s11 = scalar_lea.vmem %s584_s0, %s459_s8  ;;  %s116_s20 = scalar_lea.vmem %s585_s1, %s459_s8  ;;  %vm378_vm10 = vmand %vm377_vm9, %vm246_vm6 }
   0xf   : > { %v120_v0 = vld [vmem:[%s111_s11 + $0x8] sm:$0x1]  ;;  %v540_v1 = vld [vmem:[%s111_s11] sm:$0xff] }
  0x10   : > { %v126_v2 = vunpack.c.l.b16 %v120_v0  ;;  %251 = vrot.lane.b32.xlu1 %v540_v1, %s507_s12 }
  0x12   : > { %v128_v3 = vpack.c.b16 %v126_v2, %v126_v2  ;;  %v512_v2 = vmov 0  }
  0x14   : > { %131 = vrot.lane.b32.xlu2 %v128_v3, %s508_s13  ;;  %257 = vrot.lane.b32.xlu0 %v128_v3, %s509_s14 }
  0x18   : > { %253 = vrot.lane.b32.xlu1 %v128_v3, %s507_s12 }
  0x1c   : > { %129 = vrot.lane.b32.xlu2 %v540_v1, %s508_s13  ;;  %255 = vrot.lane.b32.xlu0 %v540_v1, %s509_s14 }
  0x6e   : > { %v132_v4 = vpop.permute.xlu2 %131 }
  0x6f   : > { %v144_v5 = vsel %vm133_vm0, %v132_v4, 0 }
  0x70   : > { %152 = vmatpush.bf16.xpose.msra.mxu0 %v144_v5 }
  0x76   : > { %v130_v6 = vpop.permute.xlu2 %129 }
  0x77   : > { %v141_v7 = vsel %vm133_vm0, %v130_v6, 0 }
  0x78   : > { %153 = vmatpush.bf16.xpose.msra.mxu0 %v141_v7 }
  0x7f   : > { %448 = vmatmul.msk.bf16.vlgmr.msra.gmra.mxu0 %vm133_vm0, %v540_v1 }
  0x82   : > { %v252_v12 = vpop.permute.xlu1 %251 }
  0x86   : > { %v258_v8 = vpop.permute.xlu0 %257 }
  0x87   : > { %v269_v9 = vsel %vm133_vm0, %v258_v8, 0 }
  0x88   : > { %277 = vmatpush.bf16.xpose.msra.mxu2 %v269_v9 }
  0x8a   : > { %v254_v13 = vpop.permute.xlu1 %253 }
  0x8e   : > { %v256_v10 = vpop.permute.xlu0 %255 }
  0x8f   : > { %v266_v11 = vsel %vm133_vm0, %v256_v10, 0  ;;  %449 = vmatmul.msk.bf16.gmra.mxu0 %vm133_vm0, %v128_v3 }
  0x90   : > { %278 = vmatpush.bf16.xpose.msra.mxu2 %v266_v11 }
  0x97   : > { %452 = vmatmul.msk.bf16.vlgmr.msra.gmra.mxu2 %vm133_vm0, %v252_v12 }
  0xa7   : > { %453 = vmatmul.msk.bf16.gmra.mxu2 %vm133_vm0, %v254_v13 }
  0xfc   : > { %v155_v14 = vpop.f32.mrf.mxu0 }
  0xfd   : > { %v164_v15 = vmul.f32 0.25, %v155_v14 }
  0xff   : > { %v168_v16 = vsel %vm167_vm1, %v164_v15, -inf }
 0x100   : > { %169 = vmax.xlane.f32.xlu2 %v168_v16 }
 0x104   : > { %v157_v17 = vpop.f32.mrf.mxu0 }
 0x105   : > { %v165_v23 = vmul.f32 0.25, %v157_v17 }
 0x107   : > { %v171_v26 = vsel %vm167_vm1, %v165_v23, -inf }
 0x10c   : > { %v160_v18 = vpop.f32.mrf.mxu0 }
 0x10d   : > { %v166_v28 = vmul.f32 0.25, %v160_v18 }
 0x10f   : > { %v175_v31 = vsel %vm174_vm2, %v166_v28, -inf }
 0x114   : > { %v162_v19 = vpop.f32.mrf.mxu0 }
 0x11a   : > { %v280_v20 = vpop.f32.mrf.mxu2 }
 0x11b   : > { %v289_v21 = vmul.f32 0.25, %v280_v20 }
 0x11d   : > { %v292_v22 = vsel %vm167_vm1, %v289_v21, -inf }
 0x11e   : > { %293 = vmax.xlane.f32.xlu0 %v292_v22 }
 0x122   : > { %v282_v24 = vpop.f32.mrf.mxu2 }
 0x123   : > { %v290_v25 = vmul.f32 0.25, %v282_v24 }
 0x125   : > { %v295_v27 = vsel %vm167_vm1, %v290_v25, -inf }
 0x126   : > { %172 = vmax.xlane.f32.xlu0 %v171_v26  ;;  %296 = vmax.xlane.f32.xlu1 %v295_v27 }
 0x12a   : > { %v285_v29 = vpop.f32.mrf.mxu2 }
 0x12b   : > { %v291_v30 = vmul.f32 0.25, %v285_v29 }
 0x12d   : > { %v298_v32 = vsel %vm174_vm2, %v291_v30, -inf }
 0x12e   : > { %176 = vmax.xlane.f32.xlu1 %v175_v31  ;;  %299 = vmax.xlane.f32.xlu2 %v298_v32 }
 0x132   : > { %v287_v33 = vpop.f32.mrf.mxu2 }
 0x147   : > { %329 = vrot.lane.b32.xlu1 %v128_v3, %s510_s15 }
 0x14f   : > { %206 = vrot.lane.b32.xlu1 %v128_v3, %s511_s16  ;;  %v217_v3 = vsel %vm215_vm3, 65535, %v512_v2 }
 0x173   : > { %v170_v37 = vpop.xlane.xlu2 %169 }
 0x174   : > { %v178_v47 = vsub.f32 %v164_v15, %v170_v37 }
 0x176   : > { %v181_v49 = vmul.f32 1.442695, %v178_v47 }
 0x191   : > { %v294_v34 = vpop.xlane.xlu0 %293 }
 0x192   : > { %v301_v35 = vsub.f32 %v289_v21, %v294_v34 }
 0x194   : > { %v304_v36 = vmul.f32 1.442695, %v301_v35 }
 0x196   : > { %475 = vpow2.f32 %v304_v36 }
 0x199   : > { %v297_v38 = vpop.xlane.xlu1 %296  ;;  %v173_v50 = vpop.xlane.xlu0 %172 }
 0x19a   : > { %v302_v39 = vsub.f32 %v290_v25, %v297_v38  ;;  %v179_v52 = vsub.f32 %v165_v23, %v173_v50 }
 0x19c   : > { %v476_v40 = vpop.eup %475  ;;  %v306_v41 = vmul.f32 1.442695, %v302_v39  ;;  %v183_v54 = vmul.f32 1.442695, %v179_v52 }
 0x19d   : > { %v310_v42 = vsel %vm167_vm1, %v476_v40, 0.0 }
 0x19e   : > { %311 = vadd.xlane.f32.xlu2 %v310_v42  ;;  %477 = vpow2.f32 %v306_v41  ;;  %v248_v42 = vld [vmem:[%s116_s20 + $0x8] sm:$0x1] }
 0x1a1   : > { %v300_v43 = vpop.xlane.xlu2 %299  ;;  %v177_v55 = vpop.xlane.xlu1 %176 }
 0x1a2   : > { %v303_v44 = vsub.f32 %v291_v30, %v300_v43  ;;  %v180_v57 = vsub.f32 %v166_v28, %v177_v55 }
 0x1a4   : > { %v308_v45 = vmul.f32 1.442695, %v303_v44  ;;  %v478_v46 = vpop.eup %477  ;;  %v185_v59 = vmul.f32 1.442695, %v180_v57 }
 0x1a5   : > { %v313_v48 = vsel %vm167_vm1, %v478_v46, 0.0 }
 0x1a6   : > { %479 = vpow2.f32 %v308_v45  ;;  %314 = vadd.xlane.f32.xlu0 %v313_v48 }
 0x1a7   : > { %481 = vpow2.f32 %v181_v49 }
 0x1a8   : > { %483 = vpow2.f32 %v183_v54 }
 0x1a9   : > { %485 = vpow2.f32 %v185_v59 }
 0x1ac   : > { %v480_v51 = vpop.eup %479 }
 0x1ad   : > { %v316_v53 = vsel %vm174_vm2, %v480_v51, 0.0  ;;  %v482_v56 = vpop.eup %481 }
 0x1ae   : > { %317 = vadd.xlane.f32.xlu0 %v316_v53  ;;  %v187_v58 = vsel %vm167_vm1, %v482_v56, 0.0  ;;  %v484_v60 = vpop.eup %483 }
 0x1af   : > { %v190_v61 = vsel %vm167_vm1, %v484_v60, 0.0  ;;  %v486_v62 = vpop.eup %485 }
 0x1b0   : > { %v193_v63 = vsel %vm174_vm2, %v486_v62, 0.0 }
 0x1b6   : > { %327 = vrot.lane.b32.xlu2 %v540_v1, %s510_s15  ;;  %188 = vadd.xlane.f32.xlu0 %v187_v58 }
 0x1b9   : > { %v330_v0 = vpop.permute.xlu1 %329 }
 0x1ba   : > { %v339_v4 = vand.u32 %v330_v0, %v217_v3 }
 0x1bc   : > { %347 = vmatpush.bf16.msra.mxu3 %v339_v4 }
 0x1be   : > { %204 = vrot.lane.b32.xlu2 %v540_v1, %s511_s16  ;;  %191 = vadd.xlane.f32.xlu0 %v190_v61 }
 0x1c1   : > { %v207_v6 = vpop.permute.xlu1 %206 }
 0x1c2   : > { %v219_v7 = vand.u32 %v217_v3, %v207_v6 }
 0x1c4   : > { %227 = vmatpush.bf16.msra.mxu1 %v219_v7 }
 0x1c6   : > { %194 = vadd.xlane.f32.xlu0 %v193_v63 }
 0x211   : > { %v312_v5 = vpop.xlane.xlu2 %311 }
 0x212   : > { %487 = vrcp.f32 %v312_v5 }
 0x218   : > { %v488_v1 = vpop.eup %487 }
 0x219   : > { %v328_v8 = vpop.permute.xlu2 %327  ;;  %v315_v9 = vpop.xlane.xlu0 %314  ;;  %v322_v13 = vmul.f32 %v488_v1, %v476_v40 }
 0x21a   : > { %348 = vmatpush.bf16.msra.mxu3 %v328_v8  ;;  %489 = vrcp.f32 %v315_v9 }
 0x220   : > { %v490_v10 = vpop.eup %489 }
 0x221   : > { %v205_v11 = vpop.permute.xlu2 %204  ;;  %v318_v12 = vpop.xlane.xlu0 %317  ;;  %v323_v14 = vmul.f32 %v490_v10, %v478_v46 }
 0x222   : > { %228 = vmatpush.bf16.msra.mxu1 %v205_v11  ;;  %491 = vrcp.f32 %v318_v12 }
 0x223   : > { %v325_v15 = vpack.c.bf16 %v323_v14, %v322_v13 }
 0x225   : > { %454 = vmatmul.msk.bf16.vlgmr.msra.gmra.mxu3 %vm167_vm1, %v325_v15 }
 0x228   : > { %v492_v17 = vpop.eup %491 }
 0x229   : > { %v189_v16 = vpop.xlane.xlu0 %188  ;;  %v324_v18 = vmul.f32 %v492_v17, %v480_v51 }
 0x22a   : > { %493 = vrcp.f32 %v189_v16 }
 0x22b   : > { %v326_v20 = vpack.c.bf16 %v324_v18, %v324_v18 }
 0x230   : > { %v494_v21 = vpop.eup %493 }
 0x231   : > { %v192_v19 = vpop.xlane.xlu0 %191  ;;  %v199_v23 = vmul.f32 %v494_v21, %v482_v56 }
 0x232   : > { %495 = vrcp.f32 %v192_v19 }
 0x235   : > { %455 = vmatmul.msk.bf16.gmra.mxu3 %vm167_vm1, %v326_v20 }
 0x238   : > { %v496_v22 = vpop.eup %495 }
 0x239   : > { %v200_v24 = vmul.f32 %v496_v22, %v484_v60  ;;  %v195_v25 = vpop.xlane.xlu0 %194 }
 0x23a   : > { %497 = vrcp.f32 %v195_v25 }
 0x23b   : > { %v202_v26 = vpack.c.bf16 %v200_v24, %v199_v23 }
 0x23d   : > { %450 = vmatmul.msk.bf16.vlgmr.msra.gmra.mxu1 %vm167_vm1, %v202_v26 }
 0x240   : > { %v498_v27 = vpop.eup %497 }
 0x241   : > { %v201_v28 = vmul.f32 %v498_v27, %v486_v62 }
 0x243   : > { %v203_v29 = vpack.c.bf16 %v201_v28, %v201_v28 }
 0x24d   : > { %451 = vmatmul.msk.bf16.gmra.mxu1 %vm167_vm1, %v203_v29 }
 0x2a8   : > { %v350_v30 = vpop.f32.mrf.mxu3 }
 0x2a9   : > { %v359_v31 = vpack.c.bf16 %v350_v30, %v350_v30 }
 0x2ab   : > { %365 = vrot.lane.b32.xlu2 %v359_v31, %s513_s17 }
 0x2b0   : > { %v352_v32 = vpop.f32.mrf.mxu3 }
 0x2b1   : > { %v360_v33 = vpack.c.bf16 %v352_v32, %v352_v32 }
 0x2b3   : > { %367 = vrot.lane.b32.xlu0 %v360_v33, %s513_s17 }
 0x2b8   : > { %v355_v34 = vpop.f32.mrf.mxu3 }
 0x2b9   : > { %v361_v35 = vpack.c.bf16 %v355_v34, %v355_v34 }
 0x2ba   : > { %v230_v36 = vpop.f32.mrf.mxu1 }
 0x2bb   : > { %v239_v37 = vpack.c.bf16 %v230_v36, %v230_v36  ;;  %369 = vrot.lane.b32.xlu1 %v361_v35, %s513_s17 }
 0x2bd   : > { %243 = vst.msk [vmem:[%s116_s20] sm:$0xf] %vm242_vm4, %v239_v37 }
 0x2c0   : > { %v357_v38 = vpop.f32.mrf.mxu3 }
 0x2c2   : > { %v232_v39 = vpop.f32.mrf.mxu1 }
 0x2c3   : > { %v240_v40 = vpack.c.bf16 %v232_v39, %v232_v39 }
 0x2c5   : > { %244 = vst.msk [vmem:[%s116_s20 + $0x4] sm:$0xf] %vm242_vm4, %v240_v40 }
 0x2ca   : > { %v235_v41 = vpop.f32.mrf.mxu1 }
 0x2cb   : > { %v241_v43 = vpack.c.bf16 %v235_v41, %v235_v41 }
 0x2cd   : > { %v249_v44 = vsel %vm247_vm7, %v241_v43, %v248_v42 }
 0x2ce   : > { %250 = vst [vmem:[%s116_s20 + $0x8] sm:$0x1] %v249_v44 }
 0x2d2   : > { %v237_v45 = vpop.f32.mrf.mxu1 }
 0x2d5   : > { %v379_v49 = vld [vmem:[%s116_s20 + $0x8] sm:$0x1] }
 0x305   : > { %v366_v46 = vpop.permute.xlu2 %365 }
 0x306   : > { %375 = vst.msk [vmem:[%s116_s20] sm:$0xf] %vm374_vm8, %v366_v46 }
 0x325   : > { %v368_v47 = vpop.permute.xlu0 %367 }
 0x326   : > { %376 = vst.msk [vmem:[%s116_s20 + $0x4] sm:$0xf] %vm374_vm8, %v368_v47 }
 0x32d   : > { %v370_v48 = vpop.permute.xlu1 %369 }
 0x32e   : > { %v380_v50 = vsel %vm378_vm10, %v370_v48, %v379_v49 }
 0x32f   : > { %381 = vst [vmem:[%s116_s20 + $0x8] sm:$0x1] %v380_v50 }
 0x330 PF: > { %s11_s6 = sadd.s32 1, %s505_s6  }
 0x331   : > { %p8_p4 = scmp.ge.s32.totalorder %s11_s6, 4  }
 0x333   :  { %10 = sbr.rel (!%p8_p4) target bundleno = 1 (0x1), region = 54 }

// kernel: albef_forward.69
= control target key start
LH: loop header
LB: loop body
LE: loop exit
PB: predicated region body
PF: predicated region fallthrough
CT: control target
= control target key end

     0   :  { %vm49_vm0 = vcmask 261120   ;;  %s222_s1 = inlined_call_operand.vmem [shape: f32[32,32], index: 1, kind: input, shape index: {}]   ;;  %s223_s2 = inlined_call_operand.vmem [shape: f32[1,32], index: 2, kind: input, shape index: {}]   ;;  %s224_s0 = inlined_call_operand.vmem [shape: bf16[48,32], index: 0, kind: input, shape index: {}]   ;;  %s225_s3 = inlined_call_operand.vmem [shape: f32[48,32], index: 3, kind: input, shape index: {}]   ;;  %s226_s4 = inlined_call_operand.vmem [shape: f32[48,32], index: 4, kind: output, shape index: {}]  }
   0x1   :  { %v26_v0 = vld [vmem:[%s222_s1 + $0x10] sm:$0xff]  ;;  %v27_v1 = vld [vmem:[%s222_s1 + $0x18] sm:$0xff]  ;;  %v24_v2 = vld [vmem:[%s222_s1] sm:$0xff] }
   0x2   :  { %v29_v3 = vpack.c.bf16 %v27_v1, %v26_v0  ;;  %v25_v4 = vld [vmem:[%s222_s1 + $0x8] sm:$0xff]  ;;  %v120_v6 = vld [vmem:[%s224_s0] sm:$0xff]  ;;  %v122_v8 = vld [vmem:[%s224_s0 + $0x10] sm:$0xff] }
   0x3   :  { %v28_v5 = vpack.c.bf16 %v25_v4, %v24_v2  ;;  %v121_v7 = vld [vmem:[%s224_s0 + $0x8] sm:$0xff]  ;;  %v127_v9 = vld [vmem:[%s223_s2] ss:$0 sm:$0xff]  ;;  %v85_v13 = vld [vmem:[%s225_s3 + $0x10] sm:$0xff] }
   0x4   :  { %65 = vmatpush.bf16.msra.mxu0 %v29_v3  ;;  %123 = vmatpush.bf16.msra.mxu1 %v29_v3  ;;  %v83_v11 = vld [vmem:[%s225_s3] sm:$0xff]  ;;  %v84_v22 = vld [vmem:[%s225_s3 + $0x8] sm:$0xff]  ;;  %v86_v24 = vld [vmem:[%s225_s3 + $0x18] sm:$0xff] }
   0x5   :  { %124 = vmatpush.bf16.msra.mxu2 %v29_v3  ;;  %v87_v19 = vld [vmem:[%s225_s3 + $0x20] sm:$0xff]  ;;  %v88_v31 = vld [vmem:[%s225_s3 + $0x28] sm:$0xff] }
   0x8   :  { %66 = vmatpush.bf16.msra.mxu0 %v28_v5  ;;  %125 = vmatpush.bf16.msra.mxu1 %v28_v5 }
   0x9   :  { %126 = vmatpush.bf16.msra.mxu2 %v28_v5 }
   0xb   :  { %117 = vmatmul.msk.bf16.vlgmr.msra.gmra.mxu0 %vm49_vm0, %v120_v6  ;;  %118 = vmatmul.msk.bf16.vlgmr.msra.gmra.mxu1 %vm49_vm0, %v121_v7 }
   0xc   :  { %119 = vmatmul.msk.bf16.vlgmr.msra.gmra.mxu2 %vm49_vm0, %v122_v8 }
  0x88   :  { %v68_v10 = vpop.f32.mrf.mxu0  ;;  %v73_v12 = vpop.f32.mrf.mxu1 }
  0x89   :  { %v69_v14 = vadd.f32 %v127_v9, %v68_v10  ;;  %v74_v15 = vadd.f32 %v127_v9, %v73_v12 }
  0x8b   :  { %v89_v16 = vadd.f32 %v83_v11, %v69_v14  ;;  %v91_v17 = vadd.f32 %v85_v13, %v74_v15 }
  0x8d   :  { %95 = vst.msk [vmem:[%s226_s4] sm:$0xff] %vm49_vm0, %v89_v16 }
  0x8e   :  { %97 = vst.msk [vmem:[%s226_s4 + $0x10] sm:$0xff] %vm49_vm0, %v91_v17 }
  0x8f   :  { %v78_v18 = vpop.f32.mrf.mxu2 }
  0x90   :  { %v79_v20 = vadd.f32 %v127_v9, %v78_v18  ;;  %v70_v21 = vpop.f32.mrf.mxu0  ;;  %v75_v23 = vpop.f32.mrf.mxu1 }
  0x91   :  { %v71_v25 = vadd.f32 %v127_v9, %v70_v21  ;;  %v76_v26 = vadd.f32 %v127_v9, %v75_v23 }
  0x92   :  { %v93_v27 = vadd.f32 %v87_v19, %v79_v20 }
  0x93   :  { %v90_v28 = vadd.f32 %v84_v22, %v71_v25  ;;  %v92_v29 = vadd.f32 %v86_v24, %v76_v26 }
  0x94   :  { %99 = vst.msk [vmem:[%s226_s4 + $0x20] sm:$0xff] %vm49_vm0, %v93_v27 }
  0x95   :  { %96 = vst.msk [vmem:[%s226_s4 + $0x8] sm:$0xff] %vm49_vm0, %v90_v28 }
  0x96   :  { %98 = vst.msk [vmem:[%s226_s4 + $0x18] sm:$0xff] %vm49_vm0, %v92_v29 }
  0x97   :  { %v80_v30 = vpop.f32.mrf.mxu2 }
  0x98   :  { %v81_v32 = vadd.f32 %v127_v9, %v80_v30 }
  0x9a   :  { %v94_v33 = vadd.f32 %v88_v31, %v81_v32 }
  0x9c   :  { %100 = vst.msk [vmem:[%s226_s4 + $0x28] sm:$0xff] %vm49_vm0, %v94_v33 }

// kernel: albef_forward.71
= control target key start
LH: loop header
LB: loop body
LE: loop exit
PB: predicated region body
PF: predicated region fallthrough
CT: control target
= control target key end

     0   :  { %vm46_vm0 = vcmask 261120   ;;  %s262_s1 = inlined_call_operand.vmem [shape: f32[32,128], index: 1, kind: input, shape index: {}]   ;;  %s263_s2 = inlined_call_operand.vmem [shape: f32[1,128], index: 2, kind: input, shape index: {}]   ;;  %s264_s0 = inlined_call_operand.vmem [shape: bf16[48,32], index: 0, kind: input, shape index: {}]   ;;  %s265_s3 = inlined_call_operand.vmem [shape: bf16[48,128], index: 3, kind: output, shape index: {}]  }
   0x1   :  { %v23_v0 = vld [vmem:[%s262_s1 + $0x10] sm:$0xff]  ;;  %v24_v1 = vld [vmem:[%s262_s1 + $0x18] sm:$0xff]  ;;  %v21_v2 = vld [vmem:[%s262_s1] sm:$0xff] }
   0x2   :  { %v26_v3 = vpack.c.bf16 %v24_v1, %v23_v0  ;;  %v22_v4 = vld [vmem:[%s262_s1 + $0x8] sm:$0xff]  ;;  %v165_v6 = vld [vmem:[%s264_s0] sm:$0xff]  ;;  %v167_v8 = vld [vmem:[%s264_s0 + $0x10] sm:$0xff] }
   0x3   :  { %v25_v5 = vpack.c.bf16 %v22_v4, %v21_v2  ;;  %v166_v7 = vld [vmem:[%s264_s0 + $0x8] sm:$0xff]  ;;  %v189_v9 = vld [vmem:[%s263_s2] ss:$0 sm:$0xff] }
   0x4   :  { %62 = vmatpush.bf16.msra.mxu0 %v26_v3  ;;  %185 = vmatpush.bf16.msra.mxu1 %v26_v3 }
   0x5   :  { %186 = vmatpush.bf16.msra.mxu2 %v26_v3 }
   0x8   :  { %63 = vmatpush.bf16.msra.mxu0 %v25_v5  ;;  %187 = vmatpush.bf16.msra.mxu1 %v25_v5 }
   0x9   :  { %188 = vmatpush.bf16.msra.mxu2 %v25_v5 }
   0xb   :  { %162 = vmatmul.msk.bf16.vlgmr.msra.gmra.mxu0 %vm46_vm0, %v165_v6  ;;  %163 = vmatmul.msk.bf16.vlgmr.msra.gmra.mxu1 %vm46_vm0, %v166_v7 }
   0xc   :  { %164 = vmatmul.msk.bf16.vlgmr.msra.gmra.mxu2 %vm46_vm0, %v167_v8 }
  0x88   :  { %v65_v10 = vpop.f32.mrf.mxu0  ;;  %v70_v11 = vpop.f32.mrf.mxu1 }
  0x89   :  { %v66_v12 = vadd.f32 %v189_v9, %v65_v10  ;;  %v71_v13 = vadd.f32 %v189_v9, %v70_v11 }
  0x8b   :  { %v80_v14 = vmul.f32 %v66_v12, %v66_v12  ;;  %v82_v15 = vmul.f32 %v71_v13, %v71_v13 }
  0x8d   :  { %v86_v16 = vmul.f32 %v80_v14, %v66_v12  ;;  %v88_v17 = vmul.f32 %v82_v15, %v71_v13 }
  0x8f   :  { %v92_v18 = vmul.f32 0.044715, %v86_v16  ;;  %v94_v19 = vmul.f32 0.044715, %v88_v17  ;;  %v75_v20 = vpop.f32.mrf.mxu2 }
  0x90   :  { %v246_v21 = vadd.f32 %v189_v9, %v75_v20  ;;  %v67_v22 = vpop.f32.mrf.mxu0  ;;  %v72_v23 = vpop.f32.mrf.mxu1 }
  0x91   :  { %v98_v24 = vadd.f32 %v92_v18, %v66_v12  ;;  %v100_v25 = vadd.f32 %v94_v19, %v71_v13  ;;  %v68_v26 = vadd.f32 %v189_v9, %v67_v22  ;;  %v73_v27 = vadd.f32 %v189_v9, %v72_v23 }
  0x92   :  { %v84_v28 = vmul.f32 %v246_v21, %v246_v21 }
  0x93   :  { %v104_v29 = vmul.f32 0.7978846, %v98_v24  ;;  %v81_v30 = vmul.f32 %v68_v26, %v68_v26  ;;  %v83_v31 = vmul.f32 %v73_v27, %v73_v27  ;;  %v106_v32 = vmul.f32 0.7978846, %v100_v25 }
  0x94   :  { %v90_v33 = vmul.f32 %v84_v28, %v246_v21 }
  0x95   :  { %v87_v34 = vmul.f32 %v81_v30, %v68_v26  ;;  %v89_v35 = vmul.f32 %v83_v31, %v73_v27  ;;  %190 = vtanh.f32 %v104_v29 }
  0x96   :  { %v96_v36 = vmul.f32 0.044715, %v90_v33  ;;  %192 = vtanh.f32 %v106_v32 }
  0x97   :  { %v93_v37 = vmul.f32 0.044715, %v87_v34  ;;  %v95_v38 = vmul.f32 0.044715, %v89_v35  ;;  %v77_v39 = vpop.f32.mrf.mxu2 }
  0x98   :  { %v102_v40 = vadd.f32 %v96_v36, %v246_v21  ;;  %v78_v41 = vadd.f32 %v189_v9, %v77_v39 }
  0x99   :  { %v99_v42 = vadd.f32 %v93_v37, %v68_v26  ;;  %v101_v43 = vadd.f32 %v95_v38, %v73_v27 }
  0x9a   :  { %v108_v44 = vmul.f32 0.7978846, %v102_v40  ;;  %v85_v45 = vmul.f32 %v78_v41, %v78_v41 }
  0x9b   :  { %v105_v46 = vmul.f32 0.7978846, %v99_v42  ;;  %v107_v47 = vmul.f32 0.7978846, %v101_v43  ;;  %v191_v49 = vpop.eup %190 }
  0x9c   :  { %194 = vtanh.f32 %v108_v44  ;;  %v91_v48 = vmul.f32 %v85_v45, %v78_v41  ;;  %v193_v50 = vpop.eup %192  ;;  %v116_v52 = vadd.f32 1.0, %v191_v49 }
  0x9d   :  { %196 = vtanh.f32 %v105_v46  ;;  %v118_v54 = vadd.f32 1.0, %v193_v50 }
  0x9e   :  { %198 = vtanh.f32 %v107_v47  ;;  %v97_v51 = vmul.f32 0.044715, %v91_v48  ;;  %v122_v59 = vmul.f32 0.5, %v116_v52 }
  0x9f   :  { %v124_v61 = vmul.f32 0.5, %v118_v54 }
  0xa0   :  { %v103_v53 = vadd.f32 %v97_v51, %v78_v41  ;;  %v128_v2 = vmul.f32 %v122_v59, %v66_v12 }
  0xa1   :  { %v130_v4 = vmul.f32 %v124_v61, %v71_v13 }
  0xa2   :  { %v195_v55 = vpop.eup %194  ;;  %v109_v56 = vmul.f32 0.7978846, %v103_v53 }
  0xa3   :  { %v197_v57 = vpop.eup %196  ;;  %v120_v0 = vadd.f32 1.0, %v195_v55 }
  0xa4   :  { %v199_v58 = vpop.eup %198  ;;  %v117_v60 = vadd.f32 1.0, %v197_v57  ;;  %200 = vtanh.f32 %v109_v56 }
  0xa5   :  { %v119_v62 = vadd.f32 1.0, %v199_v58  ;;  %v126_v8 = vmul.f32 0.5, %v120_v0 }
  0xa6   :  { %v123_v63 = vmul.f32 0.5, %v117_v60 }
  0xa7   :  { %v125_v1 = vmul.f32 0.5, %v119_v62  ;;  %v132_v14 = vmul.f32 %v126_v8, %v246_v21 }
  0xa8   :  { %v129_v3 = vmul.f32 %v123_v63, %v68_v26 }
  0xa9   :  { %v131_v5 = vmul.f32 %v125_v1, %v73_v27 }
  0xaa   :  { %v201_v6 = vpop.eup %200  ;;  %v171_v7 = vpack.c.bf16 %v129_v3, %v128_v2 }
  0xab   :  { %v176_v9 = vpack.c.bf16 %v131_v5, %v130_v4  ;;  %v121_v10 = vadd.f32 1.0, %v201_v6 }
  0xac   :  { %172 = vst [vmem:[%s265_s3] sm:$0xff] %v171_v7  }
  0xad   :  { %183 = vst [vmem:[%s265_s3 + $0x8] sm:$0xff] %v176_v9   ;;  %v127_v11 = vmul.f32 0.5, %v121_v10 }
  0xaf   :  { %v133_v12 = vmul.f32 %v127_v11, %v78_v41 }
  0xb1   :  { %v181_v15 = vpack.c.bf16 %v133_v12, %v132_v14 }
  0xb3   :  { %184 = vst [vmem:[%s265_s3 + $0x10] sm:$0xff] %v181_v15  }

// kernel: albef_forward.72
= control target key start
LH: loop header
LB: loop body
LE: loop exit
PB: predicated region body
PF: predicated region fallthrough
CT: control target
= control target key end

     0   :  { %vm105_vm0 = vcmask 261120   ;;  %s275_s1 = inlined_call_operand.vmem [shape: f32[128,32], index: 1, kind: input, shape index: {}]   ;;  %s276_s2 = inlined_call_operand.vmem [shape: f32[1,32], index: 2, kind: input, shape index: {}]   ;;  %s277_s0 = inlined_call_operand.vmem [shape: bf16[48,128], index: 0, kind: input, shape index: {}]   ;;  %s278_s3 = inlined_call_operand.vmem [shape: f32[48,32], index: 3, kind: input, shape index: {}]   ;;  %s279_s4 = inlined_call_operand.vmem [shape: f32[48,32], index: 4, kind: output, shape index: {}]  }
   0x1   :  { %v37_v0 = vld [vmem:[%s275_s1 + $0x70] sm:$0xff]  ;;  %v38_v1 = vld [vmem:[%s275_s1 + $0x78] sm:$0xff]  ;;  %v35_v2 = vld [vmem:[%s275_s1 + $0x60] sm:$0xff] }
   0x2   :  { %v46_v3 = vpack.c.bf16 %v38_v1, %v37_v0  ;;  %v36_v4 = vld [vmem:[%s275_s1 + $0x68] sm:$0xff]  ;;  %v33_v6 = vld [vmem:[%s275_s1 + $0x50] sm:$0xff]  ;;  %v34_v7 = vld [vmem:[%s275_s1 + $0x58] sm:$0xff] }
   0x3   :  { %v45_v5 = vpack.c.bf16 %v36_v4, %v35_v2  ;;  %v44_v8 = vpack.c.bf16 %v34_v7, %v33_v6  ;;  %v31_v9 = vld [vmem:[%s275_s1 + $0x40] sm:$0xff]  ;;  %v32_v10 = vld [vmem:[%s275_s1 + $0x48] sm:$0xff]  ;;  %v29_v12 = vld [vmem:[%s275_s1 + $0x30] sm:$0xff] }
   0x4   :  { %69 = vmatpush.bf16.msra.mxu0 %v46_v3  ;;  %131 = vmatpush.bf16.msra.mxu1 %v46_v3  ;;  %v43_v11 = vpack.c.bf16 %v32_v10, %v31_v9  ;;  %v30_v13 = vld [vmem:[%s275_s1 + $0x38] sm:$0xff]  ;;  %v27_v15 = vld [vmem:[%s275_s1 + $0x20] sm:$0xff]  ;;  %v28_v16 = vld [vmem:[%s275_s1 + $0x28] sm:$0xff] }
   0x5   :  { %132 = vmatpush.bf16.msra.mxu2 %v46_v3  ;;  %v42_v14 = vpack.c.bf16 %v30_v13, %v29_v12  ;;  %v41_v17 = vpack.c.bf16 %v28_v16, %v27_v15  ;;  %v25_v18 = vld [vmem:[%s275_s1 + $0x10] sm:$0xff]  ;;  %v26_v19 = vld [vmem:[%s275_s1 + $0x18] sm:$0xff]  ;;  %v23_v21 = vld [vmem:[%s275_s1] sm:$0xff] }
   0x6   :  { %v40_v20 = vpack.c.bf16 %v26_v19, %v25_v18  ;;  %v24_v22 = vld [vmem:[%s275_s1 + $0x8] sm:$0xff]  ;;  %v128_v24 = vld [vmem:[%s277_s0] sm:$0xff]  ;;  %v130_v26 = vld [vmem:[%s277_s0 + $0x10] sm:$0xff] }
   0x7   :  { %v39_v23 = vpack.c.bf16 %v24_v22, %v23_v21  ;;  %v129_v25 = vld [vmem:[%s277_s0 + $0x8] sm:$0xff]  ;;  %v147_v27 = vld [vmem:[%s276_s2] ss:$0 sm:$0xff]  ;;  %v95_v31 = vld [vmem:[%s278_s3 + $0x10] sm:$0xff] }
   0x8   :  { %70 = vmatpush.bf16.msra.mxu0 %v45_v5  ;;  %133 = vmatpush.bf16.msra.mxu1 %v45_v5  ;;  %v93_v29 = vld [vmem:[%s278_s3] sm:$0xff]  ;;  %v94_v40 = vld [vmem:[%s278_s3 + $0x8] sm:$0xff]  ;;  %v96_v42 = vld [vmem:[%s278_s3 + $0x18] sm:$0xff] }
   0x9   :  { %134 = vmatpush.bf16.msra.mxu2 %v45_v5  ;;  %v97_v37 = vld [vmem:[%s278_s3 + $0x20] sm:$0xff]  ;;  %v98_v49 = vld [vmem:[%s278_s3 + $0x28] sm:$0xff] }
   0xc   :  { %71 = vmatpush.bf16.msra.mxu0 %v44_v8  ;;  %135 = vmatpush.bf16.msra.mxu1 %v44_v8 }
   0xd   :  { %136 = vmatpush.bf16.msra.mxu2 %v44_v8 }
  0x10   :  { %72 = vmatpush.bf16.msra.mxu0 %v43_v11  ;;  %137 = vmatpush.bf16.msra.mxu1 %v43_v11 }
  0x11   :  { %138 = vmatpush.bf16.msra.mxu2 %v43_v11 }
  0x14   :  { %73 = vmatpush.bf16.msra.mxu0 %v42_v14  ;;  %139 = vmatpush.bf16.msra.mxu1 %v42_v14 }
  0x15   :  { %140 = vmatpush.bf16.msra.mxu2 %v42_v14 }
  0x18   :  { %74 = vmatpush.bf16.msra.mxu0 %v41_v17  ;;  %141 = vmatpush.bf16.msra.mxu1 %v41_v17 }
  0x19   :  { %142 = vmatpush.bf16.msra.mxu2 %v41_v17 }
  0x1c   :  { %75 = vmatpush.bf16.msra.mxu0 %v40_v20  ;;  %143 = vmatpush.bf16.msra.mxu1 %v40_v20 }
  0x1d   :  { %144 = vmatpush.bf16.msra.mxu2 %v40_v20 }
  0x20   :  { %76 = vmatpush.bf16.msra.mxu0 %v39_v23  ;;  %145 = vmatpush.bf16.msra.mxu1 %v39_v23 }
  0x21   :  { %146 = vmatpush.bf16.msra.mxu2 %v39_v23 }
  0x23   :  { %77 = vmatmul.bf16.vlgmr.msra.gmra.mxu0 %v128_v24  ;;  %82 = vmatmul.bf16.vlgmr.msra.gmra.mxu1 %v129_v25 }
  0x24   :  { %87 = vmatmul.bf16.vlgmr.msra.gmra.mxu2 %v130_v26 }
  0xa0   :  { %v78_v28 = vpop.f32.mrf.mxu0  ;;  %v83_v30 = vpop.f32.mrf.mxu1 }
  0xa1   :  { %v79_v32 = vadd.f32 %v147_v27, %v78_v28  ;;  %v84_v33 = vadd.f32 %v147_v27, %v83_v30 }
  0xa3   :  { %v99_v34 = vadd.f32 %v93_v29, %v79_v32  ;;  %v101_v35 = vadd.f32 %v95_v31, %v84_v33 }
  0xa5   :  { %106 = vst.msk [vmem:[%s279_s4] sm:$0xff] %vm105_vm0, %v99_v34 }
  0xa6   :  { %108 = vst.msk [vmem:[%s279_s4 + $0x10] sm:$0xff] %vm105_vm0, %v101_v35 }
  0xa7   :  { %v88_v36 = vpop.f32.mrf.mxu2 }
  0xa8   :  { %v89_v38 = vadd.f32 %v147_v27, %v88_v36  ;;  %v80_v39 = vpop.f32.mrf.mxu0  ;;  %v85_v41 = vpop.f32.mrf.mxu1 }
  0xa9   :  { %v81_v43 = vadd.f32 %v147_v27, %v80_v39  ;;  %v86_v44 = vadd.f32 %v147_v27, %v85_v41 }
  0xaa   :  { %v103_v45 = vadd.f32 %v97_v37, %v89_v38 }
  0xab   :  { %v100_v46 = vadd.f32 %v94_v40, %v81_v43  ;;  %v102_v47 = vadd.f32 %v96_v42, %v86_v44 }
  0xac   :  { %110 = vst.msk [vmem:[%s279_s4 + $0x20] sm:$0xff] %vm105_vm0, %v103_v45 }
  0xad   :  { %107 = vst.msk [vmem:[%s279_s4 + $0x8] sm:$0xff] %vm105_vm0, %v100_v46 }
  0xae   :  { %109 = vst.msk [vmem:[%s279_s4 + $0x18] sm:$0xff] %vm105_vm0, %v102_v47 }
  0xaf   :  { %v90_v48 = vpop.f32.mrf.mxu2 }
  0xb0   :  { %v91_v50 = vadd.f32 %v147_v27, %v90_v48 }
  0xb2   :  { %v104_v51 = vadd.f32 %v98_v49, %v91_v50 }
  0xb4   :  { %111 = vst.msk [vmem:[%s279_s4 + $0x28] sm:$0xff] %vm105_vm0, %v104_v51 }

// kernel: albef_forward.107
= control target key start
LH: loop header
LB: loop body
LE: loop exit
PB: predicated region body
PF: predicated region fallthrough
CT: control target
= control target key end

     0   :  { %vm46_vm0 = vcmask 261120   ;;  %vm86_vm1 = vcmask 257024   ;;  %s188_s1 = inlined_call_operand.vmem [shape: f32[32,32], index: 1, kind: input, shape index: {}]   ;;  %s189_s2 = inlined_call_operand.vmem [shape: f32[1,32], index: 2, kind: input, shape index: {}]   ;;  %s190_s0 = inlined_call_operand.vmem [shape: bf16[48,32], index: 0, kind: input, shape index: {}]   ;;  %s191_s3 = inlined_call_operand.vmem [shape: bf16[48,32], index: 3, kind: output, shape index: {}]  }
   0x1   :  { %v23_v0 = vld [vmem:[%s188_s1 + $0x10] sm:$0xff]  ;;  %v24_v1 = vld [vmem:[%s188_s1 + $0x18] sm:$0xff]  ;;  %v21_v2 = vld [vmem:[%s188_s1] sm:$0xff] }
   0x2   :  { %v26_v3 = vpack.c.bf16 %v24_v1, %v23_v0  ;;  %v22_v4 = vld [vmem:[%s188_s1 + $0x8] sm:$0xff]  ;;  %v112_v6 = vld [vmem:[%s190_s0] sm:$0xff]  ;;  %v114_v8 = vld [vmem:[%s190_s0 + $0x10] sm:$0xff] }
   0x3   :  { %v25_v5 = vpack.c.bf16 %v22_v4, %v21_v2  ;;  %v113_v7 = vld [vmem:[%s190_s0 + $0x8] sm:$0xff]  ;;  %v119_v9 = vld [vmem:[%s189_s2] ss:$0 sm:$0xff] }
   0x4   :  { %62 = vmatpush.bf16.msra.mxu0 %v26_v3  ;;  %115 = vmatpush.bf16.msra.mxu1 %v26_v3 }
   0x5   :  { %116 = vmatpush.bf16.msra.mxu2 %v26_v3 }
   0x8   :  { %63 = vmatpush.bf16.msra.mxu0 %v25_v5  ;;  %117 = vmatpush.bf16.msra.mxu1 %v25_v5 }
   0x9   :  { %118 = vmatpush.bf16.msra.mxu2 %v25_v5 }
   0xb   :  { %109 = vmatmul.msk.bf16.vlgmr.msra.gmra.mxu0 %vm46_vm0, %v112_v6  ;;  %110 = vmatmul.msk.bf16.vlgmr.msra.gmra.mxu1 %vm46_vm0, %v113_v7 }
   0xc   :  { %111 = vmatmul.msk.bf16.vlgmr.msra.gmra.mxu2 %vm46_vm0, %v114_v8 }
  0x88   :  { %v65_v10 = vpop.f32.mrf.mxu0  ;;  %v70_v11 = vpop.f32.mrf.mxu1 }
  0x89   :  { %v66_v12 = vadd.f32 %v119_v9, %v65_v10  ;;  %v71_v13 = vadd.f32 %v119_v9, %v70_v11 }
  0x8b   :  { %v80_v14 = vpack.c.bf16 %v66_v12, %v66_v12  ;;  %v82_v15 = vpack.c.bf16 %v71_v13, %v71_v13 }
  0x8d   :  { %87 = vst.msk [vmem:[%s191_s3] sm:$0xf] %vm86_vm1, %v80_v14 }
  0x8e   :  { %89 = vst.msk [vmem:[%s191_s3 + $0x8] sm:$0xf] %vm86_vm1, %v82_v15 }
  0x8f   :  { %v75_v16 = vpop.f32.mrf.mxu2 }
  0x90   :  { %v76_v17 = vadd.f32 %v119_v9, %v75_v16  ;;  %v67_v18 = vpop.f32.mrf.mxu0  ;;  %v72_v19 = vpop.f32.mrf.mxu1 }
  0x91   :  { %v68_v20 = vadd.f32 %v119_v9, %v67_v18  ;;  %v73_v21 = vadd.f32 %v119_v9, %v72_v19 }
  0x92   :  { %v84_v22 = vpack.c.bf16 %v76_v17, %v76_v17 }
  0x93   :  { %v81_v23 = vpack.c.bf16 %v68_v20, %v68_v20  ;;  %v83_v24 = vpack.c.bf16 %v73_v21, %v73_v21 }
  0x94   :  { %91 = vst.msk [vmem:[%s191_s3 + $0x10] sm:$0xf] %vm86_vm1, %v84_v22 }
  0x95   :  { %88 = vst.msk [vmem:[%s191_s3 + $0x4] sm:$0xf] %vm86_vm1, %v81_v23 }
  0x96   :  { %90 = vst.msk [vmem:[%s191_s3 + $0xc] sm:$0xf] %vm86_vm1, %v83_v24 }
  0x97   :  { %v77_v25 = vpop.f32.mrf.mxu2 }
  0x98   :  { %v78_v26 = vadd.f32 %v119_v9, %v77_v25 }
  0x9a   :  { %v85_v27 = vpack.c.bf16 %v78_v26, %v78_v26 }
  0x9c   :  { %92 = vst.msk [vmem:[%s191_s3 + $0x14] sm:$0xf] %vm86_vm1, %v85_v27 }

// kernel: albef_forward.109
= control target key start
LH: loop header
LB: loop body
LE: loop exit
PB: predicated region body
PF: predicated region fallthrough
CT: control target
= control target key end

     0   :  { %s521_s12 = smov 0   ;;  %s573_s0 = inlined_call_operand.vmem [shape: bf16[2,8,32], index: 0, kind: input, shape index: {}]   ;;  %s574_s1 = inlined_call_operand.vmem [shape: bf16[2,17,32], index: 1, kind: input, shape index: {}]   ;;  %s575_s2 = inlined_call_operand.vmem [shape: bf16[2,17,32], index: 2, kind: input, shape index: {}]   ;;  %s576_s3 = inlined_call_operand.vmem [shape: bf16[2,8,32], index: 3, kind: output, shape index: {}]  }
   0x1 LB: > { %s445_s13 = sadd.s32 4294967295, %s496_s12   ;;  %p449_p0 = scmp.ge.s32.totalorder %s496_s12, 1  ;;  %s496_s12 = sphi %s521_s12, %s13_s12  }
   0x2   : > { %p156_p1 = scmp.lt.s32.totalorder %s496_s12, 3 }
   0x4   : > { %p157_p2 = pnand %p449_p0, %p156_p1 }
   0x5   : > { %p188_p3 = scmp.lt.s32.totalorder (!%p157_p2), %s445_s13, 1  ;;  %s498_s22 = smov (!%p157_p2), 112  }
   0x6   : > { %160 = sbr.rel (%p157_p2) target bundleno = 767 (0x2ff), region = 32  ;;  %s500_s29 = smov (!%p157_p2), 16  }
   0xb   : > { %s578_s13 = smov (!%p188_p3, %s445_s13), 1  ;;  %vm222_vm0 = vcmask 130048   ;;  %vm246_vm1 = vcmask 138240   ;;  %vm271_vm2 = vcmask 1040384   ;;  %v499_v30 = vmov 0  }
   0xc   : > { %s470_s14 = smul.u32 12, %s578_s13  ;;  %s450_s15 = sshll.u32 %s578_s13, 2  ;;  %v273_v31 = vsel %vm271_vm2, 65535, %v499_v30  ;;  %vm291_vm3 = vcmask 125952   ;;  %vm366_vm4 = vcmask 257152  }
   0xd   : > { %s191_s18 = scalar_lea.vmem %s573_s0, %s450_s15  ;;  %s205_s28 = scalar_lea.vmem %s576_s3, %s450_s15 }
   0xe   : > { %s196_s21 = scalar_lea.vmem %s574_s1, %s470_s14  ;;  %v207_v0 = vld [vmem:[%s191_s18] sm:$0xf]  ;;  %s550_s25 = scalar_lea.vmem %s575_s2, %s470_s14 }
   0xf   : > { %v210_v1 = vld [vmem:[%s196_s21 + $0x8] sm:$0x1]  ;;  %v294_v2 = vunpack.c.l.b16 %v207_v0  ;;  %v468_v7 = vld [vmem:[%s196_s21] sm:$0xff] }
  0x10   : > { %v219_v3 = vunpack.c.l.b16 %v210_v1  ;;  %v227_v8 = vsel %vm222_vm0, %v468_v7, 0  ;;  %v213_v9 = vld [vmem:[%s550_s25 + $0x8] sm:$0x1]  ;;  %v469_v33 = vld [vmem:[%s550_s25] sm:$0xff] }
  0x11   : > { %v295_v4 = vpack.c.b16 %v294_v2, %v294_v2  ;;  %v264_v11 = vunpack.c.l.b16 %v213_v9 }
  0x12   : > { %v221_v5 = vpack.c.b16 %v219_v3, %v219_v3 }
  0x13   : > { %296 = vrot.lane.b32.xlu1 %v295_v4, %s498_s22  ;;  %v266_v13 = vpack.c.b16 %v264_v11, %v264_v11 }
  0x14   : > { %300 = vrot.lane.b32.xlu0 %v221_v5, %s498_s22  ;;  %v230_v6 = vsel %vm222_vm0, %v221_v5, 0 }
  0x15   : > { %238 = vmatpush.bf16.xpose.msra.mxu0 %v230_v6  ;;  %v275_v32 = vand.u32 %v273_v31, %v266_v13 }
  0x17   : > { %283 = vmatpush.bf16.msra.mxu1 %v275_v32 }
  0x1b   : > { %284 = vmatpush.bf16.msra.mxu1 %v469_v33 }
  0x1c   : > { %298 = vrot.lane.b32.xlu0 %v468_v7, %s498_s22 }
  0x1d   : > { %239 = vmatpush.bf16.xpose.msra.mxu0 %v227_v8 }
  0x24   : > { %458 = vmatmul.msk.bf16.vlgmr.msra.gmra.mxu0 %vm222_vm0, %v207_v0  ;;  %339 = vrot.lane.b32.xlu0 %v266_v13, %s498_s22 }
  0x85   : > { %v297_v16 = vpop.permute.xlu1 %296 }
  0x86   : > { %v301_v10 = vpop.permute.xlu0 %300 }
  0x87   : > { %v309_v12 = vsel %vm222_vm0, %v301_v10, 0 }
  0x88   : > { %317 = vmatpush.bf16.xpose.msra.mxu2 %v309_v12 }
  0x8e   : > { %v299_v14 = vpop.permute.xlu0 %298 }
  0x8f   : > { %v306_v15 = vsel %vm222_vm0, %v299_v14, 0 }
  0x90   : > { %318 = vmatpush.bf16.xpose.msra.mxu2 %v306_v15 }
  0x96   : > { %v340_v34 = vpop.permute.xlu0 %339 }
  0x97   : > { %464 = vmatmul.msk.bf16.vlgmr.msra.gmra.mxu2 %vm222_vm0, %v297_v16  ;;  %v346_v44 = vand.u32 %v340_v34, %v273_v31 }
  0x99   : > { %354 = vmatpush.bf16.msra.mxu3 %v346_v44 }
  0xa1   : > { %v241_v17 = vpop.f32.mrf.mxu0 }
  0xa2   : > { %v245_v18 = vmul.f32 0.25, %v241_v17 }
  0xa4   : > { %v247_v19 = vsel %vm246_vm1, %v245_v18, -inf }
  0xa5   : > { %248 = vmax.xlane.f32.xlu2 %v247_v19 }
  0xa9   : > { %v243_v20 = vpop.f32.mrf.mxu0 }
 0x118   : > { %v249_v21 = vpop.xlane.xlu2 %248 }
 0x119   : > { %v250_v22 = vsub.f32 %v245_v18, %v249_v21 }
 0x11a   : > { %v320_v23 = vpop.f32.mrf.mxu2 }
 0x11b   : > { %v251_v24 = vmul.f32 1.442695, %v250_v22  ;;  %v324_v25 = vmul.f32 0.25, %v320_v23 }
 0x11d   : > { %482 = vpow2.f32 %v251_v24  ;;  %v325_v26 = vsel %vm246_vm1, %v324_v25, -inf }
 0x11e   : > { %326 = vmax.xlane.f32.xlu1 %v325_v26 }
 0x122   : > { %v322_v27 = vpop.f32.mrf.mxu2 }
 0x123   : > { %v483_v28 = vpop.eup %482 }
 0x124   : > { %v253_v29 = vsel %vm246_vm1, %v483_v28, 0.0 }
 0x125   : > { %254 = vadd.xlane.f32.xlu0 %v253_v29 }
 0x191   : > { %v327_v35 = vpop.xlane.xlu1 %326 }
 0x192   : > { %v328_v36 = vsub.f32 %v324_v25, %v327_v35 }
 0x194   : > { %v329_v37 = vmul.f32 1.442695, %v328_v36 }
 0x196   : > { %484 = vpow2.f32 %v329_v37 }
 0x198   : > { %v255_v38 = vpop.xlane.xlu0 %254 }
 0x199   : > { %486 = vrcp.f32 %v255_v38 }
 0x19c   : > { %v485_v39 = vpop.eup %484 }
 0x19d   : > { %v331_v40 = vsel %vm246_vm1, %v485_v39, 0.0 }
 0x19e   : > { %332 = vadd.xlane.f32.xlu2 %v331_v40 }
 0x19f   : > { %v487_v41 = vpop.eup %486 }
 0x1a0   : > { %v257_v42 = vmul.f32 %v487_v41, %v483_v28 }
 0x1a2   : > { %v258_v43 = vpack.c.bf16 %v257_v42, %v257_v42 }
 0x1a4   : > { %463 = vmatmul.msk.bf16.vlgmr.msra.gmra.mxu1 %vm246_vm1, %v258_v43 }
 0x1b6   : > { %337 = vrot.lane.b32.xlu2 %v469_v33, %s498_s22 }
 0x211   : > { %v333_v45 = vpop.xlane.xlu2 %332 }
 0x212   : > { %488 = vrcp.f32 %v333_v45 }
 0x218   : > { %v489_v46 = vpop.eup %488 }
 0x219   : > { %v338_v47 = vpop.permute.xlu2 %337  ;;  %v335_v48 = vmul.f32 %v489_v46, %v485_v39 }
 0x21a   : > { %355 = vmatpush.bf16.msra.mxu3 %v338_v47 }
 0x21b   : > { %v336_v49 = vpack.c.bf16 %v335_v48, %v335_v48 }
 0x21d   : > { %465 = vmatmul.msk.bf16.vlgmr.msra.gmra.mxu3 %vm246_vm1, %v336_v49 }
 0x221   : > { %v286_v50 = vpop.f32.mrf.mxu1 }
 0x222   : > { %v290_v51 = vpack.c.bf16 %v286_v50, %v286_v50 }
 0x224   : > { %292 = vst.msk [vmem:[%s205_s28] sm:$0xf] %vm291_vm3, %v290_v51 }
 0x229   : > { %v288_v52 = vpop.f32.mrf.mxu1 }
 0x2a0   : > { %v357_v53 = vpop.f32.mrf.mxu3 }
 0x2a1   : > { %v361_v54 = vpack.c.bf16 %v357_v53, %v357_v53 }
 0x2a3   : > { %363 = vrot.lane.b32.xlu2 %v361_v54, %s500_s29 }
 0x2a8   : > { %v359_v55 = vpop.f32.mrf.mxu3 }
 0x2fd   : > { %v364_v56 = vpop.permute.xlu2 %363 }
 0x2fe   : > { %367 = vst.msk [vmem:[%s205_s28] sm:$0xf] %vm366_vm4, %v364_v56 }
 0x2ff PF: > { %s13_s12 = sadd.s32 1, %s496_s12  }
 0x300   : > { %p10_p4 = scmp.ge.s32.totalorder %s13_s12, 4  }
 0x302   :  { %12 = sbr.rel (!%p10_p4) target bundleno = 1 (0x1), region = 68 }

</bundles_post_ra>
